<compile_context>
chip_gen: v7x
topology: tpu7x:2x2x1
jax: 0.10.0
libtpu: 0.0.40
codegen_flags: <defaults>
</compile_context>

<pallas_src>
import jax
import jax.numpy as jnp
from jax import lax
from jax.experimental import pallas as pl
from jax.experimental.pallas import tpu as pltpu


# --------------------- plain-JAX helper (outside the kernel) -----------------

def _upsample2x_bilinear_nhwc(x):
    """Matches F.interpolate(scale_factor=2, mode='bilinear', align_corners=False)."""
    _, H, W, _ = x.shape

    def idx_w(size):
        src = (jnp.arange(2 * size, dtype=jnp.float32) + 0.5) * 0.5 - 0.5
        src = jnp.maximum(src, 0.0)
        i0 = jnp.minimum(jnp.floor(src).astype(jnp.int32), size - 1)
        i1 = jnp.minimum(i0 + 1, size - 1)
        lam = src - i0.astype(jnp.float32)
        return i0, i1, lam

    h0, h1, lh = idx_w(H)
    w0, w1, lw = idx_w(W)
    xr = (x[:, h0, :, :] * (1.0 - lh)[None, :, None, None]
          + x[:, h1, :, :] * lh[None, :, None, None])
    return (xr[:, :, w0, :] * (1.0 - lw)[None, None, :, None]
            + xr[:, :, w1, :] * lw[None, None, :, None])


# ------------------------------ Pallas kernel --------------------------------

def _make_offset_block_kernel(H, W, Cin, C, Hs, has_conv2, bn):
    """One grid step = `bn` images x one row strip of Hs output rows."""
    hx = 3 if has_conv2 else 2          # input halo rows for the conv chain
    h1 = Hs + 2 * (hx - 1)              # conv1 output rows per strip

    def lrelu(v):
        return jnp.maximum(v, 0.2 * v)

    def conv3x3(src, w_ref, rows_out, acc=None):
        # src: (bn, rows_out+2, W+2, cin) value; w_ref: (3, 3*cin, cout) ref.
        # 3 matmuls accumulated over kh (K = 3*cin) instead of one 9-tap concat.
        cin = src.shape[-1]
        for kh in range(3):
            taps = [src[:, kh:kh + rows_out, kw:kw + W, :] for kw in range(3)]
            patch = jnp.concatenate(taps, axis=-1).reshape(bn * rows_out * W, 3 * cin)
            part = jnp.dot(patch, w_ref[kh], preferred_element_type=jnp.float32)
            acc = part if acc is None else acc + part
        return acc                                       # (bn*rows_out*W, cout) f32

    def mask_rows(v, rows_out, first_img_row):
        # Zero rows that fall outside the image so the next conv sees true zero
        # padding at the top/bottom image borders (only fires on edge strips).
        j = lax.broadcasted_iota(jnp.int32, (1, rows_out, 1, 1), 1)
        r = first_img_row + j
        return jnp.where((r >= 0) & (r < H), v, 0.0)

    def store_padded(dst_ref, v):
        # dst_ref: (bn, rows, W+2, C) zero-W-bordered scratch.  Write interior,
        # re-zero only the two border columns (cheap, megacore-safe) instead of
        # materializing a jnp.pad copy every conv.
        z = jnp.zeros((v.shape[0], v.shape[1], 1, v.shape[3]), dst_ref.dtype)
        dst_ref[:, :, 0:1, :] = z
        dst_ref[:, :, W + 1:W + 2, :] = z
        dst_ref[:, :, 1:W + 1, :] = v.astype(dst_ref.dtype)

    def kernel(*refs):
        if has_conv2:
            (xs_ref, lo_ref, w1_ref, b1_ref, w2a_ref, w2b_ref, b2_ref,
             w3_ref, b3_ref, o_ref, s_a, s_c) = refs
        else:
            xs_ref, w1_ref, b1_ref, w3_ref, b3_ref, o_ref, s_a = refs

        r0 = pl.program_id(1) * Hs       # first output image row of this strip

        # conv1 over the haloed, pre-padded input strip
        xs = xs_ref[...].reshape(bn, Hs + 2 * hx, W + 2, Cin)
        y1 = lrelu(conv3x3(xs, w1_ref, h1) + b1_ref[...])
        y1 = mask_rows(y1.reshape(bn, h1, W, C), h1, r0 - (hx - 1))
        store_padded(s_a, y1)

        if has_conv2:
            # conv2 input = concat([conv1_out, 2*lo_up]); the 2x is folded into
            # w2b, and the concat becomes two accumulated matmul groups.
            lo = lo_ref[...].reshape(bn, Hs + 4, W + 2, C)
            acc = conv3x3(s_a[...], w2a_ref, Hs + 2)
            acc = conv3x3(lo, w2b_ref, Hs + 2, acc=acc)
            y2 = lrelu(acc + b2_ref[...])
            y2 = mask_rows(y2.reshape(bn, Hs + 2, W, C), Hs + 2, r0 - 1)
            store_padded(s_c, y2)
            src = s_c
        else:
            src = s_a

        # conv3: transpose the raw accumulator first, then bias + LeakyReLU as a
        # lane-dense (C,1) column broadcast; store full-lane (bn, C, Hs*W).
        acc3 = conv3x3(src[...], w3_ref, Hs).reshape(bn, Hs * W, C)
        y3 = jnp.transpose(acc3, (0, 2, 1)) + b3_ref[...]     # (bn, C, Hs*W)
        o_ref[...] = lrelu(y3).astype(o_ref.dtype)

    return kernel


# ------------------------- VMEM model & tiling choice --------------------------

def _padded_bytes(shape, itemsize):
    if len(shape) < 2:
        return max(1, -(-shape[-1] // 128) * 128) * itemsize
    lane = -(-shape[-1] // 128) * 128
    sub_tile = 8 * (4 // itemsize)            # 8 for f32, 16 for bf16
    sub = -(-shape[-2] // sub_tile) * sub_tile
    lead = 1
    for d in shape[:-2]:
        lead *= d
    return lead * sub * lane * itemsize


def _step_vmem_bytes(bn, hs, W, Cin, C, has_conv2):
    hx = 3 if has_conv2 else 2
    rows_in = hs + 2 * hx
    h1 = rows_in - 2
    b = 0
    b += 2 * _padded_bytes((bn, 1, rows_in, W + 2, Cin), 2)          # x strip (x2 buf)
    if has_conv2:
        b += 2 * _padded_bytes((bn, 1, hs + 4, W + 2, C), 2)         # lo strip (x2 buf)
    b += 2 * _padded_bytes((bn, C, hs * W), 4)                       # output (x2 buf)
    b += _padded_bytes((bn, h1, W + 2, C), 2)                        # scratch A
    if has_conv2:
        b += _padded_bytes((bn, hs + 2, W + 2, C), 2)                # scratch C
    m = bn * h1 * W
    b += 2 * _padded_bytes((m, 3 * max(Cin, C)), 2)                  # im2col patches
    b += _padded_bytes((m, C), 4)                                    # f32 accumulator
    b += _padded_bytes((bn, C, hs * W), 4)                           # transposed epilogue
    b += _padded_bytes((3, 3 * Cin, C), 2)
    b += _padded_bytes((3, 3 * C, C), 2) * (3 if has_conv2 else 1)
    return b


def _vmem_limit_bytes():
    try:
        cap = pltpu.get_tpu_info().vmem_capacity_bytes
        return int(min(cap * 3 // 4, 100 << 20))
    except Exception:
        return 32 << 20


def _choose_tiling(N, H, W, Cin, C, has_conv2, vmem_limit, strip_rows=None):
    target = min(12 << 20, vmem_limit // 3)    # per-step working-set target

    def est(bn, hs):
        return _step_vmem_bytes(bn, hs, W, Cin, C, has_conv2)

    if strip_rows is not None:
        assert H % strip_rows == 0, "strip_rows must divide H"
        assert strip_rows == H or (strip_rows * W) % 128 == 0, \
            "strip_rows*W must be a multiple of 128 (lane-dense output strips)"
        hs = strip_rows
    else:
        cands = [d for d in range(1, H + 1)
                 if H % d == 0 and (d == H or (d >= 8 and (d * W) % 128 == 0))]
        fitting = [d for d in cands if est(1, d) <= target]
        hs = max(fitting) if fitting else min(cands)

    bdivs = [d for d in range(1, N + 1) if N % d == 0]
    fitting_b = [d for d in bdivs if est(d, hs) <= target]
    bn = max(fitting_b) if fitting_b else 1
    return bn, hs


# --------------------------------- wrapper -----------------------------------

def offset_block_pallas(x_nchw, params, last_offset_nchw=None, *, strip_rows=None):
    """x_nchw: (N, Cin, H, W) f32.  params: HWIO conv weights / biases."""
    N, Cin, H, W = x_nchw.shape
    C = params["w1"].shape[-1]
    has_conv2 = last_offset_nchw is not None
    if has_conv2:
        assert "w2" in params, "module must be constructed with last_offset=True"
    hx = 3 if has_conv2 else 2

    vmem_limit = _vmem_limit_bytes()
    bn, Hs = _choose_tiling(N, H, W, Cin, C, has_conv2, vmem_limit, strip_rows)
    n_strips = H // Hs

    # ---- wrapper prep: bf16 before layout passes, haloed strips for BlockSpec ----
    x_nhwc = jnp.transpose(x_nchw.astype(jnp.bfloat16), (0, 2, 3, 1))
    xpad = jnp.pad(x_nhwc, ((0, 0), (hx, hx), (1, 1), (0, 0)))
    rows = (jnp.arange(n_strips) * Hs)[:, None] + jnp.arange(Hs + 2 * hx)[None, :]
    xstrips = xpad[:, rows]                      # (N, n_strips, Hs+2*hx, W+2, Cin)

    tensor_args = [xstrips]
    if has_conv2:
        # TODO(synk): the 2x bilinear upsample (F.interpolate, align_corners=False)
        # stays in plain JAX outside the Pallas kernel.
        lo_nhwc = jnp.transpose(last_offset_nchw, (0, 2, 3, 1))
        lo_up = _upsample2x_bilinear_nhwc(lo_nhwc).astype(jnp.bfloat16)   # (N,H,W,C)
        lopad = jnp.pad(lo_up, ((0, 0), (2, 2), (1, 1), (0, 0)))
        lrows = (jnp.arange(n_strips) * Hs)[:, None] + jnp.arange(Hs + 4)[None, :]
        tensor_args.append(lopad[:, lrows])      # (N, n_strips, Hs+4, W+2, C)

    weight_args = [params["w1"].reshape(3, 3 * Cin, C).astype(jnp.bfloat16),
                   params["b1"].reshape(1, C).astype(jnp.float32)]
    if has_conv2:
        w2 = params["w2"]
        weight_args += [w2[:, :, :C, :].reshape(3, 3 * C, C).astype(jnp.bfloat16),
                        (2.0 * w2[:, :, C:, :]).reshape(3, 3 * C, C).astype(jnp.bfloat16),
                        params["b2"].reshape(1, C).astype(jnp.float32)]
    weight_args += [params["w3"].reshape(3, 3 * C, C).astype(jnp.bfloat16),
                    params["b3"].reshape(C, 1).astype(jnp.float32)]

    in_specs = [pl.BlockSpec((bn, 1, Hs + 2 * hx, W + 2, Cin),
                             lambda bi, si: (bi, si, 0, 0, 0))]
    if has_conv2:
        in_specs.append(pl.BlockSpec((bn, 1, Hs + 4, W + 2, C),
                                     lambda bi, si: (bi, si, 0, 0, 0)))
    # weights / biases are grid-invariant: constant index_map => no per-step refetch
    for a in weight_args:
        in_specs.append(pl.BlockSpec(a.shape, lambda bi, si, _r=a.ndim: (0,) * _r))

    out_specs = pl.BlockSpec((bn, C, Hs * W), lambda bi, si: (bi, 0, si))

    scratch = [pltpu.VMEM((bn, Hs + 2 * (hx - 1), W + 2, C), jnp.bfloat16)]
    if has_conv2:
        scratch.append(pltpu.VMEM((bn, Hs + 2, W + 2, C), jnp.bfloat16))

    kernel = _make_offset_block_kernel(H, W, Cin, C, Hs, has_conv2, bn)

    flops = 2 * N * H * W * C * 9 * (Cin + (2 * C if has_conv2 else 0) + C)
    bytes_accessed = int(sum(a.size * a.dtype.itemsize for a in tensor_args)
                         + sum(a.size * a.dtype.itemsize for a in weight_args)
                         + N * C * H * W * 4)

    out = pl.pallas_call(
        kernel,
        out_shape=jax.ShapeDtypeStruct((N, C, H * W), x_nchw.dtype),
        grid_spec=pltpu.PrefetchScalarGridSpec(
            num_scalar_prefetch=0,
            grid=(N // bn, n_strips),
            in_specs=in_specs,
            out_specs=out_specs,
            scratch_shapes=scratch),
        compiler_params=pltpu.CompilerParams(
            dimension_semantics=("parallel", "parallel"),
            vmem_limit_bytes=vmem_limit),
        cost_estimate=pl.CostEstimate(flops=flops, transcendentals=0,
                                      bytes_accessed=bytes_accessed),
    )(*tensor_args, *weight_args)

    # lane-dense kernel output -> NCHW by a pure reshape (no transpose pass)
    return out.reshape(N, C, H, W)


# ---------------------------- parameter init ----------------------------------

def _xavier_uniform_hwio(key, kh, kw, cin, cout):
    # torch.nn.init.xavier_uniform_ on Conv2d weight (cout, cin, kh, kw)
    fan_in = cin * kh * kw
    fan_out = cout * kh * kw
    limit = (6.0 / (fan_in + fan_out)) ** 0.5
    return jax.random.uniform(key, (kh, kw, cin, cout), jnp.float32,
                              minval=-limit, maxval=limit)


def init_offset_block_params(key, input_channel=32, offset_channel=32,
                             last_offset=False):
    k1, k2, k3 = jax.random.split(key, 3)
    p = {"w1": _xavier_uniform_hwio(k1, 3, 3, input_channel, offset_channel),
         "b1": jnp.zeros((offset_channel,), jnp.float32),
         "w3": _xavier_uniform_hwio(k3, 3, 3, offset_channel, offset_channel),
         "b3": jnp.zeros((offset_channel,), jnp.float32)}
    if last_offset:
        p["w2"] = _xavier_uniform_hwio(k2, 3, 3, 2 * offset_channel, offset_channel)
        p["b2"] = jnp.zeros((offset_channel,), jnp.float32)
    return p


# ------------------------------ JAX reference ---------------------------------
# Mirrors the kernel's precision (bf16 MXU operands, f32 accumulation, 2x folded
# into the lo-half of w2) so the comparison isolates the conv math.

def offset_block_ref(x_nchw, params, last_offset_nchw=None):
    dn = ("NHWC", "HWIO", "NHWC")

    def conv_lrelu(inp, w, b):
        y = lax.conv_general_dilated(
            inp.astype(jnp.bfloat16), w.astype(jnp.bfloat16), (1, 1), "SAME",
            dimension_numbers=dn, preferred_element_type=jnp.float32)
        y = y + b.reshape(1, 1, 1, -1)
        return jnp.where(y > 0, y, 0.2 * y)

    x = jnp.transpose(x_nchw, (0, 2, 3, 1))
    off = conv_lrelu(x, params["w1"], params["b1"])
    if last_offset_nchw is not None:
        C = off.shape[-1]
        lo = jnp.transpose(last_offset_nchw, (0, 2, 3, 1))
        lo_up = _upsample2x_bilinear_nhwc(lo)
        w2 = jnp.concatenate([params["w2"][:, :, :C, :],
                              2.0 * params["w2"][:, :, C:, :]], axis=2)
        off = conv_lrelu(jnp.concatenate([off, lo_up], axis=-1), w2, params["b2"])
    off = conv_lrelu(off, params["w3"], params["b3"])
    return jnp.transpose(off, (0, 3, 1, 2))


# ----------------------------------- main --------------------------------------

if __name__ == "__main__":
    key = jax.random.PRNGKey(0)
    kx, klo, kp1, kp2 = jax.random.split(key, 4)

    N, C, H, W = 2, 32, 16, 16          # module defaults: 32 channels

    x = jax.random.normal(kx, (N, C, H, W), jnp.float32)

    # Case 1: last_offset=False (no conv2); force 2 row strips to exercise the
    # halo / strip-stitching path.
    p1 = init_offset_block_params(kp1, C, C, last_offset=False)
    out1 = jax.block_until_ready(offset_block_pallas(x, p1, strip_rows=8))
    ref1 = offset_block_ref(x, p1)
    assert out1.shape == (N, C, H, W)
    err1 = float(jnp.max(jnp.abs(out1 - ref1)))
    assert err1 < 5e-3, err1

    # Case 1b: same model, tiling chosen by the VMEM-budget heuristic.
    out1b = jax.block_until_ready(offset_block_pallas(x, p1))
    err1b = float(jnp.max(jnp.abs(out1b - ref1)))
    assert err1b < 5e-3, err1b

    # Case 2: last_offset=True; forward(x, last_offset) with a coarse (H/2, W/2)
    # previous-level offset (upsampled 2x), multi-strip.
    p2 = init_offset_block_params(kp2, C, C, last_offset=True)
    lo = jax.random.normal(klo, (N, C, H // 2, W // 2), jnp.float32)
    out2 = jax.block_until_ready(offset_block_pallas(x, p2, lo, strip_rows=8))
    ref2 = offset_block_ref(x, p2, lo)
    assert out2.shape == (N, C, H, W)
    err2 = float(jnp.max(jnp.abs(out2 - ref2)))
    assert err2 < 5e-3, err2

    print("KERNEL_OK")
</pallas_src>

<mosaic_0001>
module attributes {stable_mosaic.version = 11 : i64} {
  func.func @kernel(%arg0: i32, %arg1: i32, %arg2: memref<2x1x12x18x32xbf16, #tpu.memory_space<vmem>>, %arg3: memref<3x96x32xbf16, #tpu.memory_space<vmem>>, %arg4: memref<1x32xf32, #tpu.memory_space<vmem>>, %arg5: memref<3x96x32xbf16, #tpu.memory_space<vmem>>, %arg6: memref<32x1xf32, #tpu.memory_space<vmem>>, %arg7: memref<2x32x128xf32, #tpu.memory_space<vmem>>, %arg8: memref<2x10x18x32xbf16, #tpu.memory_space<vmem>>) attributes {dimension_semantics = [#tpu.dimension_semantics<parallel>, #tpu.dimension_semantics<parallel>], iteration_bounds = array<i64: 1, 2>, scalar_prefetch = 0 : i64, scratch_operands = 1 : i64, tpu.core_type = #tpu.core_type<tc>, window_params = [{transform_indices = @transform_0, window_bounds = array<i64: 2, 1, 12, 18, 32>}, {pipeline_mode = #tpu.pipeline_mode<synchronous>, transform_indices = @transform_1, window_bounds = array<i64: 3, 96, 32>}, {pipeline_mode = #tpu.pipeline_mode<synchronous>, transform_indices = @transform_2, window_bounds = array<i64: 1, 32>}, {pipeline_mode = #tpu.pipeline_mode<synchronous>, transform_indices = @transform_3, window_bounds = array<i64: 3, 96, 32>}, {pipeline_mode = #tpu.pipeline_mode<synchronous>, transform_indices = @transform_4, window_bounds = array<i64: 32, 1>}, {transform_indices = @transform_5, window_bounds = array<i64: 2, 32, 128>}]} {
    %c8_i32 = arith.constant 8 : i32
    %0 = arith.muli %arg1, %c8_i32 : i32
    %c0 = arith.constant 0 : index
    %c0_0 = arith.constant 0 : index
    %c0_1 = arith.constant 0 : index
    %c0_2 = arith.constant 0 : index
    %c0_3 = arith.constant 0 : index
    %1 = vector.load %arg2[%c0, %c0_0, %c0_1, %c0_2, %c0_3] : memref<2x1x12x18x32xbf16, #tpu.memory_space<vmem>>, vector<2x1x12x18x32xbf16>
    %2 = vector.shape_cast %1 : vector<2x1x12x18x32xbf16> to vector<2x12x18x32xbf16>
    %3 = vector.extract_strided_slice %2 {offsets = [0, 0, 0, 0], sizes = [2, 10, 16, 32], strides = [1, 1, 1, 1]} : vector<2x12x18x32xbf16> to vector<2x10x16x32xbf16>
    %4 = vector.extract_strided_slice %2 {offsets = [0, 0, 1, 0], sizes = [2, 10, 16, 32], strides = [1, 1, 1, 1]} : vector<2x12x18x32xbf16> to vector<2x10x16x32xbf16>
    %5 = vector.extract_strided_slice %2 {offsets = [0, 0, 2, 0], sizes = [2, 10, 16, 32], strides = [1, 1, 1, 1]} : vector<2x12x18x32xbf16> to vector<2x10x16x32xbf16>
    %6 = tpu.concatenate %3, %4, %5 in 3 : vector<2x10x16x32xbf16>, vector<2x10x16x32xbf16>, vector<2x10x16x32xbf16> -> vector<2x10x16x96xbf16>
    %7 = vector.shape_cast %6 : vector<2x10x16x96xbf16> to vector<320x96xbf16>
    %c0_4 = arith.constant 0 : index
    %c0_5 = arith.constant 0 : index
    %c0_6 = arith.constant 0 : index
    %8 = vector.load %arg3[%c0_4, %c0_5, %c0_6] : memref<3x96x32xbf16, #tpu.memory_space<vmem>>, vector<1x96x32xbf16>
    %9 = vector.shape_cast %8 : vector<1x96x32xbf16> to vector<96x32xbf16>
    %cst = arith.constant dense<0.000000e+00> : vector<320x32xf32>
    %10 = tpu.matmul %7, %9, %cst {dimension_numbers = #tpu.dot_dimension_numbers<[1], [0], [0], [1], [0, 0, 1, 1], [], []>} : vector<320x96xbf16>, vector<96x32xbf16>, vector<320x32xf32> -> vector<320x32xf32>
    %11 = vector.extract_strided_slice %2 {offsets = [0, 1, 0, 0], sizes = [2, 10, 16, 32], strides = [1, 1, 1, 1]} : vector<2x12x18x32xbf16> to vector<2x10x16x32xbf16>
    %12 = vector.extract_strided_slice %2 {offsets = [0, 1, 1, 0], sizes = [2, 10, 16, 32], strides = [1, 1, 1, 1]} : vector<2x12x18x32xbf16> to vector<2x10x16x32xbf16>
    %13 = vector.extract_strided_slice %2 {offsets = [0, 1, 2, 0], sizes = [2, 10, 16, 32], strides = [1, 1, 1, 1]} : vector<2x12x18x32xbf16> to vector<2x10x16x32xbf16>
    %14 = tpu.concatenate %11, %12, %13 in 3 : vector<2x10x16x32xbf16>, vector<2x10x16x32xbf16>, vector<2x10x16x32xbf16> -> vector<2x10x16x96xbf16>
    %15 = vector.shape_cast %14 : vector<2x10x16x96xbf16> to vector<320x96xbf16>
    %c1 = arith.constant 1 : index
    %c0_7 = arith.constant 0 : index
    %c0_8 = arith.constant 0 : index
    %16 = vector.load %arg3[%c1, %c0_7, %c0_8] : memref<3x96x32xbf16, #tpu.memory_space<vmem>>, vector<1x96x32xbf16>
    %17 = vector.shape_cast %16 : vector<1x96x32xbf16> to vector<96x32xbf16>
    %cst_9 = arith.constant dense<0.000000e+00> : vector<320x32xf32>
    %18 = tpu.matmul %15, %17, %cst_9 {dimension_numbers = #tpu.dot_dimension_numbers<[1], [0], [0], [1], [0, 0, 1, 1], [], []>} : vector<320x96xbf16>, vector<96x32xbf16>, vector<320x32xf32> -> vector<320x32xf32>
    %19 = arith.addf %10, %18 : vector<320x32xf32>
    %20 = vector.extract_strided_slice %2 {offsets = [0, 2, 0, 0], sizes = [2, 10, 16, 32], strides = [1, 1, 1, 1]} : vector<2x12x18x32xbf16> to vector<2x10x16x32xbf16>
    %21 = vector.extract_strided_slice %2 {offsets = [0, 2, 1, 0], sizes = [2, 10, 16, 32], strides = [1, 1, 1, 1]} : vector<2x12x18x32xbf16> to vector<2x10x16x32xbf16>
    %22 = vector.extract_strided_slice %2 {offsets = [0, 2, 2, 0], sizes = [2, 10, 16, 32], strides = [1, 1, 1, 1]} : vector<2x12x18x32xbf16> to vector<2x10x16x32xbf16>
    %23 = tpu.concatenate %20, %21, %22 in 3 : vector<2x10x16x32xbf16>, vector<2x10x16x32xbf16>, vector<2x10x16x32xbf16> -> vector<2x10x16x96xbf16>
    %24 = vector.shape_cast %23 : vector<2x10x16x96xbf16> to vector<320x96xbf16>
    %c2 = arith.constant 2 : index
    %c0_10 = arith.constant 0 : index
    %c0_11 = arith.constant 0 : index
    %25 = vector.load %arg3[%c2, %c0_10, %c0_11] : memref<3x96x32xbf16, #tpu.memory_space<vmem>>, vector<1x96x32xbf16>
    %26 = vector.shape_cast %25 : vector<1x96x32xbf16> to vector<96x32xbf16>
    %cst_12 = arith.constant dense<0.000000e+00> : vector<320x32xf32>
    %27 = tpu.matmul %24, %26, %cst_12 {dimension_numbers = #tpu.dot_dimension_numbers<[1], [0], [0], [1], [0, 0, 1, 1], [], []>} : vector<320x96xbf16>, vector<96x32xbf16>, vector<320x32xf32> -> vector<320x32xf32>
    %28 = arith.addf %19, %27 : vector<320x32xf32>
    %c0_13 = arith.constant 0 : index
    %c0_14 = arith.constant 0 : index
    %29 = vector.load %arg4[%c0_13, %c0_14] : memref<1x32xf32, #tpu.memory_space<vmem>>, vector<1x32xf32>
    %30 = vector.broadcast %29 : vector<1x32xf32> to vector<320x32xf32>
    %31 = arith.addf %28, %30 : vector<320x32xf32>
    %cst_15 = arith.constant 2.000000e-01 : f32
    %32 = vector.broadcast %cst_15 : f32 to vector<320x32xf32>
    %33 = arith.mulf %32, %31 : vector<320x32xf32>
    %34 = arith.maximumf %31, %33 : vector<320x32xf32>
    %35 = vector.shape_cast %34 : vector<320x32xf32> to vector<2x10x16x32xf32>
    %c1_i32 = arith.constant 1 : i32
    %36 = arith.subi %0, %c1_i32 : i32
    %37 = tpu.iota {dimensions = array<i32: 1>} : vector<1x10x1x1xi32>
    %38 = vector.broadcast %36 : i32 to vector<1x10x1x1xi32>
    %39 = arith.addi %38, %37 : vector<1x10x1x1xi32>
    %c0_i32 = arith.constant 0 : i32
    %40 = vector.broadcast %c0_i32 : i32 to vector<1x10x1x1xi32>
    %41 = arith.cmpi sge, %39, %40 : vector<1x10x1x1xi32>
    %c16_i32 = arith.constant 16 : i32
    %42 = vector.broadcast %c16_i32 : i32 to vector<1x10x1x1xi32>
    %43 = arith.cmpi slt, %39, %42 : vector<1x10x1x1xi32>
    %44 = arith.andi %41, %43 : vector<1x10x1x1xi1>
    %cst_16 = arith.constant 0.000000e+00 : f32
    %45 = vector.shape_cast %44 : vector<1x10x1x1xi1> to vector<1x10x1x1xi1>
    %46 = vector.broadcast %45 : vector<1x10x1x1xi1> to vector<2x10x16x32xi1>
    %47 = vector.broadcast %cst_16 : f32 to vector<2x10x16x32xf32>
    %48 = arith.select %46, %35, %47 : vector<2x10x16x32xi1>, vector<2x10x16x32xf32>
    %cst_17 = arith.constant 0.000000e+00 : bf16
    %49 = vector.broadcast %cst_17 : bf16 to vector<2x10x1x32xbf16>
    %c0_18 = arith.constant 0 : index
    %c0_19 = arith.constant 0 : index
    %c0_20 = arith.constant 0 : index
    %c0_21 = arith.constant 0 : index
    %50 = vector.load %arg8[%c0_18, %c0_19, %c0_20, %c0_21] : memref<2x10x18x32xbf16, #tpu.memory_space<vmem>>, vector<2x10x1x32xbf16>
    tpu.vector_store %arg8[%c0_18, %c0_19, %c0_20, %c0_21], %49 {strides = array<i32>} : memref<2x10x18x32xbf16, #tpu.memory_space<vmem>>, vector<2x10x1x32xbf16>,
    %c0_22 = arith.constant 0 : index
    %c0_23 = arith.constant 0 : index
    %c17 = arith.constant 17 : index
    %c0_24 = arith.constant 0 : index
    %51 = vector.load %arg8[%c0_22, %c0_23, %c17, %c0_24] : memref<2x10x18x32xbf16, #tpu.memory_space<vmem>>, vector<2x10x1x32xbf16>
    tpu.vector_store %arg8[%c0_22, %c0_23, %c17, %c0_24], %49 {strides = array<i32>} : memref<2x10x18x32xbf16, #tpu.memory_space<vmem>>, vector<2x10x1x32xbf16>,
    %52 = arith.truncf %48 : vector<2x10x16x32xf32> to vector<2x10x16x32xbf16>
    %c0_25 = arith.constant 0 : index
    %c0_26 = arith.constant 0 : index
    %c1_27 = arith.constant 1 : index
    %c0_28 = arith.constant 0 : index
    %53 = vector.load %arg8[%c0_25, %c0_26, %c1_27, %c0_28] : memref<2x10x18x32xbf16, #tpu.memory_space<vmem>>, vector<2x10x16x32xbf16>
    tpu.vector_store %arg8[%c0_25, %c0_26, %c1_27, %c0_28], %52 {strides = array<i32>} : memref<2x10x18x32xbf16, #tpu.memory_space<vmem>>, vector<2x10x16x32xbf16>,
    %c0_29 = arith.constant 0 : index
    %c0_30 = arith.constant 0 : index
    %c0_31 = arith.constant 0 : index
    %c0_32 = arith.constant 0 : index
    %54 = vector.load %arg8[%c0_29, %c0_30, %c0_31, %c0_32] : memref<2x10x18x32xbf16, #tpu.memory_space<vmem>>, vector<2x10x18x32xbf16>
    %55 = vector.extract_strided_slice %54 {offsets = [0, 0, 0, 0], sizes = [2, 8, 16, 32], strides = [1, 1, 1, 1]} : vector<2x10x18x32xbf16> to vector<2x8x16x32xbf16>
    %56 = vector.extract_strided_slice %54 {offsets = [0, 0, 1, 0], sizes = [2, 8, 16, 32], strides = [1, 1, 1, 1]} : vector<2x10x18x32xbf16> to vector<2x8x16x32xbf16>
    %57 = vector.extract_strided_slice %54 {offsets = [0, 0, 2, 0], sizes = [2, 8, 16, 32], strides = [1, 1, 1, 1]} : vector<2x10x18x32xbf16> to vector<2x8x16x32xbf16>
    %58 = tpu.concatenate %55, %56, %57 in 3 : vector<2x8x16x32xbf16>, vector<2x8x16x32xbf16>, vector<2x8x16x32xbf16> -> vector<2x8x16x96xbf16>
    %59 = vector.shape_cast %58 : vector<2x8x16x96xbf16> to vector<256x96xbf16>
    %c0_33 = arith.constant 0 : index
    %c0_34 = arith.constant 0 : index
    %c0_35 = arith.constant 0 : index
    %60 = vector.load %arg5[%c0_33, %c0_34, %c0_35] : memref<3x96x32xbf16, #tpu.memory_space<vmem>>, vector<1x96x32xbf16>
    %61 = vector.shape_cast %60 : vector<1x96x32xbf16> to vector<96x32xbf16>
    %cst_36 = arith.constant dense<0.000000e+00> : vector<256x32xf32>
    %62 = tpu.matmul %59, %61, %cst_36 {dimension_numbers = #tpu.dot_dimension_numbers<[1], [0], [0], [1], [0, 0, 1, 1], [], []>} : vector<256x96xbf16>, vector<96x32xbf16>, vector<256x32xf32> -> vector<256x32xf32>
    %63 = vector.extract_strided_slice %54 {offsets = [0, 1, 0, 0], sizes = [2, 8, 16, 32], strides = [1, 1, 1, 1]} : vector<2x10x18x32xbf16> to vector<2x8x16x32xbf16>
    %64 = vector.extract_strided_slice %54 {offsets = [0, 1, 1, 0], sizes = [2, 8, 16, 32], strides = [1, 1, 1, 1]} : vector<2x10x18x32xbf16> to vector<2x8x16x32xbf16>
    %65 = vector.extract_strided_slice %54 {offsets = [0, 1, 2, 0], sizes = [2, 8, 16, 32], strides = [1, 1, 1, 1]} : vector<2x10x18x32xbf16> to vector<2x8x16x32xbf16>
    %66 = tpu.concatenate %63, %64, %65 in 3 : vector<2x8x16x32xbf16>, vector<2x8x16x32xbf16>, vector<2x8x16x32xbf16> -> vector<2x8x16x96xbf16>
    %67 = vector.shape_cast %66 : vector<2x8x16x96xbf16> to vector<256x96xbf16>
    %c1_37 = arith.constant 1 : index
    %c0_38 = arith.constant 0 : index
    %c0_39 = arith.constant 0 : index
    %68 = vector.load %arg5[%c1_37, %c0_38, %c0_39] : memref<3x96x32xbf16, #tpu.memory_space<vmem>>, vector<1x96x32xbf16>
    %69 = vector.shape_cast %68 : vector<1x96x32xbf16> to vector<96x32xbf16>
    %cst_40 = arith.constant dense<0.000000e+00> : vector<256x32xf32>
    %70 = tpu.matmul %67, %69, %cst_40 {dimension_numbers = #tpu.dot_dimension_numbers<[1], [0], [0], [1], [0, 0, 1, 1], [], []>} : vector<256x96xbf16>, vector<96x32xbf16>, vector<256x32xf32> -> vector<256x32xf32>
    %71 = arith.addf %62, %70 : vector<256x32xf32>
    %72 = vector.extract_strided_slice %54 {offsets = [0, 2, 0, 0], sizes = [2, 8, 16, 32], strides = [1, 1, 1, 1]} : vector<2x10x18x32xbf16> to vector<2x8x16x32xbf16>
    %73 = vector.extract_strided_slice %54 {offsets = [0, 2, 1, 0], sizes = [2, 8, 16, 32], strides = [1, 1, 1, 1]} : vector<2x10x18x32xbf16> to vector<2x8x16x32xbf16>
    %74 = vector.extract_strided_slice %54 {offsets = [0, 2, 2, 0], sizes = [2, 8, 16, 32], strides = [1, 1, 1, 1]} : vector<2x10x18x32xbf16> to vector<2x8x16x32xbf16>
    %75 = tpu.concatenate %72, %73, %74 in 3 : vector<2x8x16x32xbf16>, vector<2x8x16x32xbf16>, vector<2x8x16x32xbf16> -> vector<2x8x16x96xbf16>
    %76 = vector.shape_cast %75 : vector<2x8x16x96xbf16> to vector<256x96xbf16>
    %c2_41 = arith.constant 2 : index
    %c0_42 = arith.constant 0 : index
    %c0_43 = arith.constant 0 : index
    %77 = vector.load %arg5[%c2_41, %c0_42, %c0_43] : memref<3x96x32xbf16, #tpu.memory_space<vmem>>, vector<1x96x32xbf16>
    %78 = vector.shape_cast %77 : vector<1x96x32xbf16> to vector<96x32xbf16>
    %cst_44 = arith.constant dense<0.000000e+00> : vector<256x32xf32>
    %79 = tpu.matmul %76, %78, %cst_44 {dimension_numbers = #tpu.dot_dimension_numbers<[1], [0], [0], [1], [0, 0, 1, 1], [], []>} : vector<256x96xbf16>, vector<96x32xbf16>, vector<256x32xf32> -> vector<256x32xf32>
    %80 = arith.addf %71, %79 : vector<256x32xf32>
    %81 = vector.shape_cast %80 : vector<256x32xf32> to vector<2x128x32xf32>
    %82 = tpu.transpose %81, [0, 2, 1] : vector<2x128x32xf32> -> vector<2x32x128xf32>
    %c0_45 = arith.constant 0 : index
    %c0_46 = arith.constant 0 : index
    %83 = vector.load %arg6[%c0_45, %c0_46] : memref<32x1xf32, #tpu.memory_space<vmem>>, vector<32x1xf32>
    %84 = vector.shape_cast %83 : vector<32x1xf32> to vector<1x32x1xf32>
    %85 = vector.broadcast %84 : vector<1x32x1xf32> to vector<2x32x128xf32>
    %86 = arith.addf %82, %85 : vector<2x32x128xf32>
    %cst_47 = arith.constant 2.000000e-01 : f32
    %87 = vector.broadcast %cst_47 : f32 to vector<2x32x128xf32>
    %88 = arith.mulf %87, %86 : vector<2x32x128xf32>
    %89 = arith.maximumf %86, %88 : vector<2x32x128xf32>
    %c0_48 = arith.constant 0 : index
    %c0_49 = arith.constant 0 : index
    %c0_50 = arith.constant 0 : index
    %90 = vector.load %arg7[%c0_48, %c0_49, %c0_50] : memref<2x32x128xf32, #tpu.memory_space<vmem>>, vector<2x32x128xf32>
    tpu.vector_store %arg7[%c0_48, %c0_49, %c0_50], %89 {strides = array<i32>} : memref<2x32x128xf32, #tpu.memory_space<vmem>>, vector<2x32x128xf32>,
    return
  }
  func.func @transform_0(%arg0: i32, %arg1: i32) -> (i32, i32, i32, i32, i32) {
    %c0_i32 = arith.constant 0 : i32
    %c0_i32_0 = arith.constant 0 : i32
    %c0_i32_1 = arith.constant 0 : i32
    %c0_i32_2 = arith.constant 0 : i32
    return %arg0, %arg1, %c0_i32, %c0_i32_0, %c0_i32_1 : i32, i32, i32, i32, i32
  }
  func.func @transform_1(%arg0: i32, %arg1: i32) -> (i32, i32, i32) {
    %c0_i32 = arith.constant 0 : i32
    %c0_i32_0 = arith.constant 0 : i32
    %c0_i32_1 = arith.constant 0 : i32
    %c0_i32_2 = arith.constant 0 : i32
    return %c0_i32, %c0_i32_0, %c0_i32_1 : i32, i32, i32
  }
  func.func @transform_2(%arg0: i32, %arg1: i32) -> (i32, i32) {
    %c0_i32 = arith.constant 0 : i32
    %c0_i32_0 = arith.constant 0 : i32
    %c0_i32_1 = arith.constant 0 : i32
    return %c0_i32, %c0_i32_0 : i32, i32
  }
  func.func @transform_3(%arg0: i32, %arg1: i32) -> (i32, i32, i32) {
    %c0_i32 = arith.constant 0 : i32
    %c0_i32_0 = arith.constant 0 : i32
    %c0_i32_1 = arith.constant 0 : i32
    %c0_i32_2 = arith.constant 0 : i32
    return %c0_i32, %c0_i32_0, %c0_i32_1 : i32, i32, i32
  }
  func.func @transform_4(%arg0: i32, %arg1: i32) -> (i32, i32) {
    %c0_i32 = arith.constant 0 : i32
    %c0_i32_0 = arith.constant 0 : i32
    %c0_i32_1 = arith.constant 0 : i32
    return %c0_i32, %c0_i32_0 : i32, i32
  }
  func.func @transform_5(%arg0: i32, %arg1: i32) -> (i32, i32, i32) {
    %c0_i32 = arith.constant 0 : i32
    %c0_i32_0 = arith.constant 0 : i32
    return %arg0, %c0_i32, %arg1 : i32, i32, i32
  }
}

</mosaic_0001>

<bundles_post_ra>
// kernel: tpu_custom_call.1
= control target key start
LH: loop header
LB: loop body
LE: loop exit
PB: predicated region body
PF: predicated region fallthrough
CT: control target
= control target key end

     0   :  { %10 = vsyncpa [#allocation5], 0  ;;  %s7982_s0 = inlined_call_operand.vmem [shape: bf16[2,2,12,18,32], index: 0, kind: input, shape index: {}]   ;;  %s7983_s1 = inlined_call_operand.vmem [shape: bf16[3,96,32], index: 1, kind: input, shape index: {}]   ;;  %s7984_s2 = inlined_call_operand.vmem [shape: f32[1,32], index: 2, kind: input, shape index: {}]   ;;  %s7985_s3 = inlined_call_operand.vmem [shape: bf16[3,96,32], index: 3, kind: input, shape index: {}]   ;;  %s7986_s4 = inlined_call_operand.vmem [shape: f32[32,1], index: 4, kind: input, shape index: {}]   ;;  %s7987_s5 = inlined_call_operand.hbm [shape: f32[2,32,256], index: 5, kind: output, shape index: {}]  }
   0x1   :  { %12 = vsyncpa [#allocation5 + $0x1], 0  ;;  %s6097_s18 = smov 0   ;;  %s6099_s19 = smov 0  }
   0x2   :  { %s6101_s20 = smov 0   ;;  %s6103_s21 = smov 0  }
   0x3   :  { %s6105_s22 = smov 0   ;;  %s6107_s23 = smov 0  }
   0x4 LB: > { %s4822_s24 = sadd.s32 4294967295, %s6058_s23   ;;  %s4823_s25 = sadd.s32 4294967294, %s6058_s23   ;;  %s6058_s23 = sphi %s6107_s23, %s18_s23   ;;  %s6054_s22 = sphi %s6105_s22, %s8191_s22   ;;  %s6050_s21 = sphi %s6103_s21, %s8190_s21   ;;  %s6046_s20 = sphi %s6101_s20, %s8189_s20   ;;  %s6042_s19 = sphi %s6099_s19, %s8188_s19   ;;  %s6038_s18 = sphi %s6097_s18, %s8187_s18  }
   0x5   : > { %s27_s26 = sadd.s32 1, %s6054_s22  ;;  %s39_s27 = sadd.s32 1, %s6046_s20 }
   0x6   : > { %p28_p0 = scmp.ge.s32.totalorder %s27_s26, 2  ;;  %p46_p1 = scmp.ne.s32.totalorder %s6046_s20, %s6042_s19 }
   0x7   : > { %p47_p2 = scmp.eq.s32.totalorder %s6058_s23, 0  ;;  %p162_p3 = scmp.eq.s32.totalorder %s4822_s24, 1 }
   0x8   : > { %s8193_s26 = smov (%p28_p0, %s27_s26), 0  ;;  %p167_p6 = scmp.ne.s32.totalorder %s6042_s19, %s6038_s18 }
   0x9   : > { %p48_p4 = por %p47_p2, %p46_p1  ;;  %p6136_p5 = por %p162_p3, %p46_p1 }
   0xa   : > { %s35_s29 = ssub.s32 %s6054_s22, %s8193_s26  ;;  %p168_p8 = scmp.eq.s32.totalorder %s4823_s25, 1 }
   0xb   : > { %p37_p7 = scmp.eq.s32.totalorder %s35_s29, 0  ;;  %p4825_p10 = scmp.ge.s32.totalorder %s6058_s23, 2 }
   0xc   : > { %p6147_p9 = por %p168_p8, %p167_p6 }
   0xd   : > { %s6145_s30 = scalar_select %p37_p7, %s6046_s20, %s39_s27  }
   0xe   : > { %196 = sbr.rel (%p4825_p10) target bundleno = 44 (0x2c), region = 32 }
  0x15   : > { %199 = sbr.rel (!%p48_p4) target bundleno = 44 (0x2c), region = 36  ;;  %s201_s7 = sand.u32 (%p48_p4), 1, %s6046_s20  }
  0x16   : > { %s5785_s8 = smul.u32 (%p48_p4), 144, %s6054_s22 }
  0x17   : > { %s5784_s9 = smul.u32 (%p48_p4), 288, %s201_s7 }
  0x18   : > { %s6159_s12 = scalar_lea.vmem (%p48_p4), %s7982_s0, %s5785_s8 }
  0x19   : > { %v225_v0 = vld [vmem:[%s6159_s12] sm:$0xff] (%p48_p4)   ;;  %v229_v1 = vld [vmem:[%s6159_s12 + $0x8] sm:$0xff] (%p48_p4)   ;;  %v233_v2 = vld [vmem:[%s6159_s12 + $0x10] sm:$0xff] (%p48_p4)   ;;  %s6164_s13 = scalar_lea.vmem (%p48_p4), [#allocation3], %s5784_s9 }
  0x1a   : > { %226 = vst [vmem:[%s6164_s13] sm:$0xff] (%p48_p4), %v225_v0   ;;  %230 = vst [vmem:[%s6164_s13 + $0x8] sm:$0xff] (%p48_p4), %v229_v1   ;;  %v237_v3 = vld [vmem:[%s6159_s12 + $0x18] sm:$0xff] (%p48_p4)   ;;  %v241_v4 = vld [vmem:[%s6159_s12 + $0x20] sm:$0xff] (%p48_p4)  }
  0x1b   : > { %234 = vst [vmem:[%s6164_s13 + $0x10] sm:$0xff] (%p48_p4), %v233_v2   ;;  %v245_v5 = vld [vmem:[%s6159_s12 + $0x28] sm:$0xff] (%p48_p4)   ;;  %238 = vst [vmem:[%s6164_s13 + $0x18] sm:$0xff] (%p48_p4), %v237_v3   ;;  %v249_v6 = vld [vmem:[%s6159_s12 + $0x30] sm:$0xff] (%p48_p4)  }
  0x1c   : > { %242 = vst [vmem:[%s6164_s13 + $0x20] sm:$0xff] %v241_v4   ;;  %246 = vst [vmem:[%s6164_s13 + $0x28] sm:$0xff] %v245_v5   ;;  %v253_v7 = vld [vmem:[%s6159_s12 + $0x38] sm:$0xff]   ;;  %v257_v8 = vld [vmem:[%s6159_s12 + $0x40] sm:$0xff]  }
  0x1d   : > { %250 = vst [vmem:[%s6164_s13 + $0x30] sm:$0xff] %v249_v6   ;;  %254 = vst [vmem:[%s6164_s13 + $0x38] sm:$0xff] %v253_v7   ;;  %v261_v9 = vld [vmem:[%s6159_s12 + $0x48] sm:$0xff]   ;;  %v265_v10 = vld [vmem:[%s6159_s12 + $0x50] sm:$0xff]  }
  0x1e   : > { %258 = vst [vmem:[%s6164_s13 + $0x40] sm:$0xff] %v257_v8   ;;  %v269_v11 = vld [vmem:[%s6159_s12 + $0x58] sm:$0xff]   ;;  %262 = vst [vmem:[%s6164_s13 + $0x48] sm:$0xff] %v261_v9   ;;  %v273_v12 = vld [vmem:[%s6159_s12 + $0x60] sm:$0xff]  }
  0x1f   : > { %266 = vst [vmem:[%s6164_s13 + $0x50] sm:$0xff] %v265_v10   ;;  %270 = vst [vmem:[%s6164_s13 + $0x58] sm:$0xff] %v269_v11   ;;  %v277_v13 = vld [vmem:[%s6159_s12 + $0x68] sm:$0xff]   ;;  %v281_v14 = vld [vmem:[%s6159_s12 + $0x70] sm:$0xff]  }
  0x20   : > { %274 = vst [vmem:[%s6164_s13 + $0x60] sm:$0xff] %v273_v12   ;;  %278 = vst [vmem:[%s6164_s13 + $0x68] sm:$0xff] %v277_v13   ;;  %v285_v15 = vld [vmem:[%s6159_s12 + $0x78] sm:$0xff]   ;;  %v289_v16 = vld [vmem:[%s6159_s12 + $0x80] sm:$0xff]  }
  0x21   : > { %282 = vst [vmem:[%s6164_s13 + $0x70] sm:$0xff] %v281_v14   ;;  %v293_v17 = vld [vmem:[%s6159_s12 + $0x88] sm:$0xff]   ;;  %286 = vst [vmem:[%s6164_s13 + $0x78] sm:$0xff] %v285_v15   ;;  %v297_v18 = vld [vmem:[%s6159_s12 + $0x120] sm:$0xff]  }
  0x22   : > { %290 = vst [vmem:[%s6164_s13 + $0x80] sm:$0xff] %v289_v16   ;;  %294 = vst [vmem:[%s6164_s13 + $0x88] sm:$0xff] %v293_v17   ;;  %v301_v19 = vld [vmem:[%s6159_s12 + $0x128] sm:$0xff]   ;;  %v305_v20 = vld [vmem:[%s6159_s12 + $0x130] sm:$0xff]  }
  0x23   : > { %298 = vst [vmem:[%s6164_s13 + $0x90] sm:$0xff] %v297_v18   ;;  %302 = vst [vmem:[%s6164_s13 + $0x98] sm:$0xff] %v301_v19   ;;  %v309_v21 = vld [vmem:[%s6159_s12 + $0x138] sm:$0xff]   ;;  %v313_v22 = vld [vmem:[%s6159_s12 + $0x140] sm:$0xff]  }
  0x24   : > { %306 = vst [vmem:[%s6164_s13 + $0xa0] sm:$0xff] %v305_v20   ;;  %v317_v23 = vld [vmem:[%s6159_s12 + $0x148] sm:$0xff]   ;;  %310 = vst [vmem:[%s6164_s13 + $0xa8] sm:$0xff] %v309_v21   ;;  %v321_v24 = vld [vmem:[%s6159_s12 + $0x150] sm:$0xff]  }
  0x25   : > { %314 = vst [vmem:[%s6164_s13 + $0xb0] sm:$0xff] %v313_v22   ;;  %318 = vst [vmem:[%s6164_s13 + $0xb8] sm:$0xff] %v317_v23   ;;  %v325_v25 = vld [vmem:[%s6159_s12 + $0x158] sm:$0xff]   ;;  %v329_v26 = vld [vmem:[%s6159_s12 + $0x160] sm:$0xff]  }
  0x26   : > { %322 = vst [vmem:[%s6164_s13 + $0xc0] sm:$0xff] %v321_v24   ;;  %326 = vst [vmem:[%s6164_s13 + $0xc8] sm:$0xff] %v325_v25   ;;  %v333_v27 = vld [vmem:[%s6159_s12 + $0x168] sm:$0xff]   ;;  %v337_v28 = vld [vmem:[%s6159_s12 + $0x170] sm:$0xff]  }
  0x27   : > { %330 = vst [vmem:[%s6164_s13 + $0xd0] sm:$0xff] %v329_v26   ;;  %v341_v29 = vld [vmem:[%s6159_s12 + $0x178] sm:$0xff]   ;;  %334 = vst [vmem:[%s6164_s13 + $0xd8] sm:$0xff] %v333_v27   ;;  %v345_v30 = vld [vmem:[%s6159_s12 + $0x180] sm:$0xff]  }
  0x28   : > { %338 = vst [vmem:[%s6164_s13 + $0xe0] sm:$0xff] %v337_v28   ;;  %342 = vst [vmem:[%s6164_s13 + $0xe8] sm:$0xff] %v341_v29   ;;  %v349_v31 = vld [vmem:[%s6159_s12 + $0x188] sm:$0xff]   ;;  %v353_v32 = vld [vmem:[%s6159_s12 + $0x190] sm:$0xff]  }
  0x29   : > { %346 = vst [vmem:[%s6164_s13 + $0xf0] sm:$0xff] %v345_v30   ;;  %350 = vst [vmem:[%s6164_s13 + $0xf8] sm:$0xff] %v349_v31   ;;  %v357_v33 = vld [vmem:[%s6159_s12 + $0x198] sm:$0xff]   ;;  %v361_v34 = vld [vmem:[%s6159_s12 + $0x1a0] sm:$0xff]  }
  0x2a   : > { %354 = vst [vmem:[%s6164_s13 + $0x100] sm:$0xff] %v353_v32   ;;  %v365_v35 = vld [vmem:[%s6159_s12 + $0x1a8] sm:$0xff]   ;;  %358 = vst [vmem:[%s6164_s13 + $0x108] sm:$0xff] %v357_v33  }
  0x2b   : > { %362 = vst [vmem:[%s6164_s13 + $0x110] sm:$0xff] %v361_v34   ;;  %366 = vst [vmem:[%s6164_s13 + $0x118] sm:$0xff] %v365_v35  }
  0x2c PF: > { %p4827_p11 = scmp.ge.s32.totalorder %s6058_s23, 1  ;;  %p534_p12 = scmp.lt.s32.totalorder %s6058_s23, 3 }
  0x2e   : > { %p535_p13 = pnand %p4827_p11, %p534_p12 }
  0x30   : > { %538 = sbr.rel (%p535_p13) target bundleno = 1315 (0x523), region = 77 }
  0x37   : > { %s6238_s14 = sand.u32 1, %s6042_s19   ;;  %v5880_v36 = vld [vmem:[%s7983_s1 + $0x30] sm:$0xff]   ;;  %vm7992_vm0 = vcmask 1046528   ;;  %vm7991_vm1 = vsmask.f32 7424  ;;  %v5883_v37 = vld [vmem:[%s7983_s1 + $0x38] sm:$0xff]  }
  0x38   : > { %s5786_s17 = smul.u32 288, %s6238_s14  ;;  %5340 = vmatprep.subr.bf16.mxu0 %v5880_v36  ;;  %5628 = vmatprep.subr.bf16.mxu1 %v5880_v36  ;;  %v5884_v38 = vld [vmem:[%s7983_s1 + $0x40] sm:$0xff]   ;;  %s6060_s8 = smov 64   ;;  %vm7990_vm2 = vcmask 261120   ;;  %vm7989_vm3 = vcmask 523264   ;;  %vm7988_vm4 = vcmask 785408  }
  0x39   : > { %5341 = vmatpush3.bf16.msra.mxu0 %v5880_v36  ;;  %5634 = vmatpush3.bf16.msra.mxu1 %v5880_v36  ;;  %s6061_s9 = smov 32   ;;  %vm2434_vm5 = vcmask 253952   ;;  %vm2435_vm6 = vsmask.f32 256  ;;  %vm2497_vm8 = vsmask.f32 7938 }
  0x3a   : > { %s6250_s7 = scalar_lea.vmem [#allocation3], %s5786_s17  ;;  %5342 = vmatprep.subr.bf16.mxu0 %v5883_v37  ;;  %5629 = vmatprep.subr.bf16.mxu1 %v5883_v37  ;;  %vm6818_vm7 = vmand %vm2434_vm5, %vm2435_vm6  ;;  %s4829_s17 = sshll.u32 %s6050_s21, 3 }
  0x3b   : > { %v6253_v39 = vld [vmem:[%s6250_s7 + $0xc] sm:$0xff]   ;;  %v5851_v40 = vld [vmem:[%s6250_s7 + $0x14] ss:$0 sps:$4 sm:$0x11]   ;;  %v6257_v41 = vld [vmem:[%s6250_s7 + $0x18] sm:$0xff]   ;;  %s4981_s24 = sadd.s32 4294967295, %s4829_s17 }
  0x3c   : > { %v1089_v42 = vrot.slane %v6253_v39, 1  ;;  %v1090_v43 = vrot.slane %v5851_v40, 1  ;;  %v818_v44 = vshrl.u32 %v6253_v39, 16  ;;  %v820_v45 = vshll.u32 %v6253_v39, 16  ;;  %v6269_v56 = vld [vmem:[%s6250_s7 + $0x30] sm:$0xff]   ;;  %v6276_v0 = vld [vmem:[%s6250_s7 + $0x24] sm:$0xff]   ;;  %vm6827_vm9 = vmand %vm2434_vm5, %vm2497_vm8 }
  0x3d   : > { %5343 = vmatpush3.bf16.msra.mxu0 %v5883_v37  ;;  %5635 = vmatpush3.bf16.msra.mxu1 %v5883_v37  ;;  %v825_v46 = vshll.u32 %v5851_v40, 16  ;;  %v5853_v47 = vld [vmem:[%s6250_s7 + $0x20] ss:$0 sps:$4 sm:$0x11]   ;;  %v1092_v48 = vrot.slane %v6257_v41, 1  ;;  %v830_v49 = vshrl.u32 %v6257_v41, 16 }
  0x3e   : > { %5344 = vmatprep.subr.bf16.mxu0 %v5884_v38  ;;  %5630 = vmatprep.subr.bf16.mxu1 %v5884_v38  ;;  %v1091_v50 = vsel %vm7992_vm0, %v1089_v42, %v1090_v43  ;;  %v822_v51 = vrot.slane %v820_v45, 1  ;;  %v832_v52 = vshll.u32 %v6257_v41, 16  ;;  %v1093_v54 = vrot.slane %v5853_v47, 1  ;;  %v5855_v59 = vld [vmem:[%s6250_s7 + $0x38] ss:$0 sps:$4 sm:$0x11]  }
  0x3f   : > { %1148 = vrot.lane.b32.xlu1 %v1091_v50, %s6060_s8  ;;  %v827_v53 = vrot.slane %v825_v46, 1  ;;  %v837_v55 = vshll.u32 %v5853_v47, 16  ;;  %v854_v62 = vshrl.u32 %v6269_v56, 16  ;;  %v856_v63 = vshll.u32 %v6269_v56, 16  ;;  %v6281_v5 = vld [vmem:[%s6250_s7 + $0x48] sm:$0xff]   ;;  %v6290_v14 = vld [vmem:[%s6250_s7 + $0x3c] sm:$0xff]  }
  0x40   : > { %v823_v57 = vor.u32 %v822_v51, %v818_v44  ;;  %v834_v58 = vrot.slane %v832_v52, 1  ;;  %v1094_v60 = vsel %vm7992_vm0, %v1092_v48, %v1093_v54  ;;  %v861_v3 = vshll.u32 %v5855_v59, 16  ;;  %v5857_v4 = vld [vmem:[%s6250_s7 + $0x2c] ss:$0 sps:$4 sm:$0x11]   ;;  %v6305_v32 = vld [vmem:[%s6250_s7 + $0x60] sm:$0xff]  }
  0x41   : > { %5345 = vmatpush3.bf16.msra.mxu0 %v5884_v38  ;;  %5636 = vmatpush3.bf16.msra.mxu1 %v5884_v38  ;;  %v839_v61 = vrot.slane %v837_v55, 1  ;;  %v858_v6 = vrot.slane %v856_v63, 1  ;;  %v842_v7 = vshrl.u32 %v6276_v0, 16  ;;  %v844_v8 = vshll.u32 %v6276_v0, 16  ;;  %v6308_v37 = vld [vmem:[%s6250_s7 + $0x54] sm:$0xff]   ;;  %v6323_v55 = vld [vmem:[%s6250_s7 + $0x6c] sm:$0xff]  }
  0x42   : > { %v828_v1 = vsel %vm7991_vm1, %v823_v57, %v827_v53  ;;  %v835_v2 = vor.u32 %v834_v58, %v830_v49  ;;  %v1098_v9 = vrot.slane %v6269_v56, 1  ;;  %v863_v11 = vrot.slane %v861_v3, 1  ;;  %v5859_v19 = vld [vmem:[%s6250_s7 + $0x50] ss:$0 sps:$4 sm:$0x11]   ;;  %s5153_s16 = sshll.u32 %s6050_s21, 7 }
  0x43   : > { %1047 = vrot.lane.b32.xlu0 %v828_v1, %s6061_s9  ;;  %1150 = vrot.lane.b32.xlu1 %v1094_v60, %s6060_s8  ;;  %v849_v12 = vshll.u32 %v5857_v4, 16  ;;  %v1099_v13 = vrot.slane %v5855_v59, 1  ;;  %v859_v15 = vor.u32 %v858_v6, %v854_v62  ;;  %v846_v16 = vrot.slane %v844_v8, 1  ;;  %v5861_v28 = vld [vmem:[%s6250_s7 + $0x44] ss:$0 sps:$4 sm:$0x11]   ;;  %s7932_s25 = scalar_lea.hbm %s7987_s5, %s5153_s16 }
  0x44   : > { %v840_v10 = vsel %vm7991_vm1, %v835_v2, %v839_v61  ;;  %v1095_v17 = vrot.slane %v6276_v0, 1  ;;  %v878_v20 = vshrl.u32 %v6281_v5, 16  ;;  %v880_v21 = vshll.u32 %v6281_v5, 16  ;;  %v5863_v40 = vld [vmem:[%s6250_s7 + $0x68] ss:$0 sps:$4 sm:$0x11]  }
  0x45   : > { %v851_v18 = vrot.slane %v849_v12, 1  ;;  %v864_v22 = vsel %vm7991_vm1, %v859_v15, %v863_v11  ;;  %v847_v23 = vor.u32 %v846_v16, %v842_v7  ;;  %v1096_v24 = vrot.slane %v5857_v4, 1  ;;  %v5865_v50 = vld [vmem:[%s6250_s7 + $0x5c] ss:$0 sps:$4 sm:$0x11]   ;;  %v6340_v11 = vld [vmem:[%s6250_s7 + $0xa8] sm:$0xff]  }
  0x46   : > { %v866_v25 = vshrl.u32 %v6290_v14, 16  ;;  %v882_v26 = vrot.slane %v880_v21, 1  ;;  %v885_v27 = vshll.u32 %v5859_v19, 16  ;;  %v868_v29 = vshll.u32 %v6290_v14, 16  ;;  %v6331_v2 = vld [vmem:[%s6250_s7 + $0x78] sm:$0xff]   ;;  %s4726_s27 = scalar_lea.sflag [#allocation5], %s6238_s14 }
  0x47   : > { %1049 = vrot.lane.b32.xlu0 %v840_v10, %s6061_s9  ;;  %1053 = vrot.lane.b32.xlu1 %v864_v22, %s6061_s9  ;;  %v852_v30 = vsel %vm7991_vm1, %v847_v23, %v851_v18  ;;  %v1100_v31 = vsel %vm7992_vm0, %v1098_v9, %v1099_v13  ;;  %v873_v36 = vshll.u32 %v5861_v28, 16  ;;  %v1104_v38 = vrot.slane %v6281_v5, 1  ;;  %v5867_v1 = vld [vmem:[%s6250_s7 + $0x74] ss:$0 sps:$4 sm:$0x11]   ;;  %v6350_v21 = vld [vmem:[%s6250_s7 + $0x9c] sm:$0xff]  }
  0x48   : > { %v883_v33 = vor.u32 %v882_v26, %v878_v20  ;;  %v887_v34 = vrot.slane %v885_v27, 1  ;;  %v870_v35 = vrot.slane %v868_v29, 1  ;;  %v1097_v42 = vsel %vm7992_vm0, %v1095_v17, %v1096_v24  ;;  %v5869_v18 = vld [vmem:[%s6250_s7 + $0x80] ss:$0 sps:$4 sm:$0x11]   ;;  %s6063_s21 = smov [#allocation4]  }
  0x49   : > { %v875_v44 = vrot.slane %v873_v36, 1  ;;  %v1105_v45 = vrot.slane %v5859_v19, 1  ;;  %v902_v47 = vshrl.u32 %v6305_v32, 16  ;;  %v904_v48 = vshll.u32 %v6305_v32, 16 }
  0x4a   : > { %v871_v43 = vor.u32 %v870_v35, %v866_v25  ;;  %v888_v46 = vsel %vm7991_vm1, %v883_v33, %v887_v34  ;;  %v909_v49 = vshll.u32 %v5863_v40, 16  ;;  %v892_v51 = vshll.u32 %v6308_v37, 16  ;;  %v6355_v25 = vld [vmem:[%s6250_s7 + $0xb0] ss:$0 sps:$4 sm:$0x11]  }
  0x4b   : > { %1051 = vrot.lane.b32.xlu0 %v852_v30, %s6061_s9  ;;  %1154 = vrot.lane.b32.xlu1 %v1100_v31, %s6060_s8  ;;  %v1101_v52 = vrot.slane %v6290_v14, 1  ;;  %v1102_v53 = vrot.slane %v5861_v28, 1  ;;  %v906_v54 = vrot.slane %v904_v48, 1  ;;  %v890_v58 = vshrl.u32 %v6308_v37, 16 }
  0x4c   : > { %v876_v57 = vsel %vm7991_vm1, %v871_v43, %v875_v44  ;;  %v894_v59 = vrot.slane %v892_v51, 1  ;;  %v897_v60 = vshll.u32 %v5865_v50, 16  ;;  %v1106_v61 = vsel %vm7992_vm0, %v1104_v38, %v1105_v45  ;;  %v6362_v34 = vld [vmem:[%s6250_s7 + $0xa4] ss:$0 sps:$4 sm:$0x11]   ;;  %v6382_v51 = vld [vmem:[%s6250_s7 + $0xb4] sm:$0xff]  }
  0x4d   : > { %v907_v62 = vor.u32 %v906_v54, %v902_v47  ;;  %v911_v63 = vrot.slane %v909_v49, 1  ;;  %v916_v3 = vshll.u32 %v6323_v55, 16  ;;  %v1103_v4 = vsel %vm7992_vm0, %v1101_v52, %v1102_v53  ;;  %v6377_v47 = vld [vmem:[%s6250_s7 + $0xc8] ss:$0 sps:$4 sm:$0x11]  }
  0x4e   : > { %v895_v6 = vor.u32 %v894_v59, %v890_v58  ;;  %v899_v7 = vrot.slane %v897_v60, 1  ;;  %v1110_v8 = vrot.slane %v6305_v32, 1  ;;  %v1111_v10 = vrot.slane %v5863_v40, 1  ;;  %v6369_v40 = vld [vmem:[%s6250_s7 + $0xc0] sm:$0xff]  }
  0x4f   : > { %1152 = vrot.lane.b32.xlu0 %v1097_v42, %s6060_s8  ;;  %1057 = vrot.lane.b32.xlu1 %v888_v46, %s6061_s9  ;;  %v912_v9 = vsel %vm7991_vm1, %v907_v62, %v911_v63  ;;  %v1107_v12 = vrot.slane %v6308_v37, 1  ;;  %v914_v13 = vshrl.u32 %v6323_v55, 16  ;;  %v921_v15 = vshll.u32 %v5867_v1, 16  ;;  %v5885_v42 = vld [vmem:[%s7983_s1 + $0x48] sm:$0xff]   ;;  %v5888_v62 = vld [vmem:[%s7983_s1 + $0x50] sm:$0xff]  }
  0x50   : > { %v1299_v16 = vshll.u32 %v6331_v2, 16  ;;  %v918_v17 = vrot.slane %v916_v3, 1  ;;  %v900_v19 = vsel %vm7991_vm1, %v895_v6, %v899_v7  ;;  %v1108_v20 = vrot.slane %v5865_v50, 1  ;;  %5346 = vmatprep.subr.bf16.mxu0 %v5885_v42  ;;  %5631 = vmatprep.subr.bf16.mxu1 %v5885_v42  ;;  %v6385_v52 = vld [vmem:[%s6250_s7 + $0xbc] ss:$0 sps:$4 sm:$0x11]  }
  0x51   : > { %v1112_v22 = vsel %vm7992_vm0, %v1110_v8, %v1111_v10  ;;  %v1113_v23 = vrot.slane %v6323_v55, 1  ;;  %v1114_v24 = vrot.slane %v5867_v1, 1  ;;  %v952_v26 = vshll.u32 %v6340_v11, 16  ;;  %5347 = vmatpush3.bf16.msra.mxu0 %v5885_v42  ;;  %5637 = vmatpush3.bf16.msra.mxu1 %v5885_v42  ;;  %v6435_v42 = vld [vmem:[%s6250_s7 + $0xcc] sm:$0xff]  }
  0x52   : > { %v923_v27 = vrot.slane %v921_v15, 1  ;;  %v1324_v28 = vrot.slane %v6331_v2, 1  ;;  %v1297_v29 = vshrl.u32 %v6331_v2, 16  ;;  %v1301_v30 = vrot.slane %v1299_v16, 1  ;;  %5348 = vmatprep.subr.bf16.mxu0 %v5888_v62  ;;  %v6406_v15 = vld [vmem:[%s6250_s7] sm:$0xff]   ;;  %5632 = vmatprep.subr.bf16.mxu1 %v5888_v62 }
  0x53   : > { %1055 = vrot.lane.b32.xlu0 %v876_v57, %s6061_s9  ;;  %1158 = vrot.lane.b32.xlu1 %v1106_v61, %s6060_s8  ;;  %v919_v31 = vor.u32 %v918_v17, %v914_v13  ;;  %v1304_v33 = vshll.u32 %v5869_v18, 16  ;;  %v1109_v35 = vsel %vm7992_vm0, %v1107_v12, %v1108_v20  ;;  %v950_v36 = vshrl.u32 %v6340_v11, 16  ;;  %v6415_v20 = vld [vmem:[%s6250_s7 + $0x90] sm:$0xff]  }
  0x54   : > { %v940_v38 = vshll.u32 %v6350_v21, 16  ;;  %v1115_v43 = vsel %vm7992_vm0, %v1113_v23, %v1114_v24  ;;  %v1325_v44 = vrot.slane %v5869_v18, 1  ;;  %v954_v45 = vrot.slane %v952_v26, 1 }
  0x55   : > { %v957_v46 = vshll.u32 %v6355_v25, 16  ;;  %v924_v48 = vsel %vm7991_vm1, %v919_v31, %v923_v27  ;;  %v1302_v49 = vor.u32 %v1301_v30, %v1297_v29  ;;  %v1306_v50 = vrot.slane %v1304_v33, 1  ;;  %5349 = vmatpush3.bf16.msra.mxu0 %v5888_v62  ;;  %5638 = vmatpush3.bf16.msra.mxu1 %v5888_v62  ;;  %v5891_v29 = vld [vmem:[%s7983_s1 + $0x58] sm:$0xff]  }
  0x56   : > { %v938_v53 = vshrl.u32 %v6350_v21, 16  ;;  %v942_v54 = vrot.slane %v940_v38, 1  ;;  %v945_v57 = vshll.u32 %v6362_v34, 16  ;;  %v976_v58 = vshll.u32 %v6369_v40, 16  ;;  %5350 = vmatprep.subr.bf16.mxu0 %v5891_v29  ;;  %5633 = vmatprep.subr.bf16.mxu1 %v5891_v29 }
  0x57   : > { %1156 = vrot.lane.b32.xlu0 %v1103_v4, %s6060_s8  ;;  %1061 = vrot.lane.b32.xlu1 %v912_v9, %s6061_s9  ;;  %v1326_v59 = vsel %vm7992_vm0, %v1324_v28, %v1325_v44  ;;  %v955_v60 = vor.u32 %v954_v45, %v950_v36  ;;  %v959_v61 = vrot.slane %v957_v46, 1  ;;  %v1122_v63 = vrot.slane %v6340_v11, 1  ;;  %v6432_v38 = vld [vmem:[%s6250_s7 + $0x98] ss:$0 sps:$4 sm:$0x11]  }
  0x58   : > { %v1123_v1 = vrot.slane %v6355_v25, 1  ;;  %v1119_v3 = vrot.slane %v6350_v21, 1  ;;  %v981_v4 = vshll.u32 %v6377_v47, 16  ;;  %v1307_v6 = vsel %vm7991_vm1, %v1302_v49, %v1306_v50  ;;  %v6442_v46 = vld [vmem:[%s6250_s7 + $0xd4] ss:$0 sps:$4 sm:$0x11]  }
  0x59   : > { %v964_v7 = vshll.u32 %v6382_v51, 16  ;;  %v969_v8 = vshll.u32 %v6385_v52, 16  ;;  %v943_v9 = vor.u32 %v942_v54, %v938_v53  ;;  %v947_v10 = vrot.slane %v945_v57, 1  ;;  %5351 = vmatpush3.bf16.msra.mxu0 %v5891_v29  ;;  %5639 = vmatpush3.bf16.msra.mxu1 %v5891_v29 }
  0x5a   : > { %v974_v12 = vshrl.u32 %v6369_v40, 16  ;;  %v978_v13 = vrot.slane %v976_v58, 1  ;;  %v960_v16 = vsel %vm7991_vm1, %v955_v60, %v959_v61  ;;  %v1120_v17 = vrot.slane %v6362_v34, 1 }
  0x5b   : > { %1059 = vrot.lane.b32.xlu0 %v900_v19, %s6061_s9  ;;  %1162 = vrot.lane.b32.xlu1 %v1112_v22, %s6060_s8  ;;  %v962_v18 = vshrl.u32 %v6382_v51, 16  ;;  %v6412_v19 = vld [vmem:[%s6250_s7 + $0x8] ss:$0 sps:$4 sm:$0x11]   ;;  %v983_v22 = vrot.slane %v981_v4, 1  ;;  %v1128_v23 = vrot.slane %v6369_v40, 1  ;;  %v948_v30 = vsel %vm7991_vm1, %v943_v9, %v947_v10 }
  0x5c   : > { %v1129_v24 = vrot.slane %v6377_v47, 1  ;;  %v1125_v25 = vrot.slane %v6382_v51, 1  ;;  %v966_v26 = vrot.slane %v964_v7, 1  ;;  %v971_v27 = vrot.slane %v969_v8, 1  ;;  %v6445_v47 = vld [vmem:[%s6250_s7 + $0xd8] sm:$0xff]   ;;  %v6474_v8 = vld [vmem:[%s6250_s7 + $0xe4] sm:$0xff]  }
  0x5d   : > { %v1126_v28 = vrot.slane %v6385_v52, 1  ;;  %v979_v31 = vor.u32 %v978_v13, %v974_v12  ;;  %v1124_v33 = vsel %vm7992_vm0, %v1122_v63, %v1123_v1  ;;  %v806_v34 = vshrl.u32 %v6406_v15, 16  ;;  %v6469_v4 = vld [vmem:[%s6250_s7 + $0xec] ss:$0 sps:$4 sm:$0x11]  }
  0x5e   : > { %v813_v36 = vshll.u32 %v6412_v19, 16  ;;  %v928_v44 = vshll.u32 %v6415_v20, 16  ;;  %v1121_v45 = vsel %vm7992_vm0, %v1119_v3, %v1120_v17  ;;  %v967_v50 = vor.u32 %v966_v26, %v962_v18  ;;  %v6466_v3 = vld [vmem:[%s6250_s7 + $0xe0] ss:$0 sps:$4 sm:$0x11]  }
  0x5f   : > { %1160 = vrot.lane.b32.xlu0 %v1109_v35, %s6060_s8  ;;  %1164 = vrot.lane.b32.xlu1 %v1115_v43, %s6060_s8  ;;  %v808_v35 = vshll.u32 %v6406_v15, 16  ;;  %v1086_v43 = vrot.slane %v6406_v15, 1  ;;  %v984_v49 = vsel %vm7991_vm1, %v979_v31, %v983_v22  ;;  %v1087_v52 = vrot.slane %v6412_v19, 1  ;;  %v6491_v31 = vld [vmem:[%s6250_s7 + $0xf0] sm:$0xff]  }
  0x60   : > { %v926_v53 = vshrl.u32 %v6415_v20, 16  ;;  %v815_v57 = vrot.slane %v813_v36, 1  ;;  %v1116_v58 = vrot.slane %v6415_v20, 1  ;;  %v930_v60 = vrot.slane %v928_v44, 1 }
  0x61   : > { %v810_v54 = vrot.slane %v808_v35, 1  ;;  %v933_v61 = vshll.u32 %v6432_v38, 16  ;;  %v988_v62 = vshll.u32 %v6435_v42, 16  ;;  %v993_v63 = vshll.u32 %v6442_v46, 16  ;;  %v6499_v35 = vld [vmem:[%s6250_s7 + $0xfc] sm:$0xff]  }
  0x62   : > { %v972_v1 = vsel %vm7991_vm1, %v967_v50, %v971_v27  ;;  %v1000_v7 = vshll.u32 %v6445_v47, 16  ;;  %v1127_v9 = vsel %vm7992_vm0, %v1125_v25, %v1126_v28  ;;  %v1117_v12 = vrot.slane %v6432_v38, 1  ;;  %v5898_v44 = vld [vmem:[%s6250_s7 + $0x104] ss:$0 sps:$4 sm:$0x11]  }
  0x63   : > { %1063 = vrot.lane.b32.xlu0 %v924_v48, %s6061_s9  ;;  %1330 = vrot.lane.b32.xlu1 %v1326_v59, %s6060_s8  ;;  %v6450_v48 = vld [vmem:[%s7983_s1] sm:$0xff]   ;;  %v986_v59 = vshrl.u32 %v6435_v42, 16  ;;  %v935_v10 = vrot.slane %v933_v61, 1  ;;  %v990_v13 = vrot.slane %v988_v62, 1  ;;  %v1132_v17 = vrot.slane %v6442_v46, 1 }
  0x64   : > { %5392 = vmatprep.subr.bf16.mxu0 %v6450_v48  ;;  %v998_v18 = vshrl.u32 %v6445_v47, 16  ;;  %v811_v19 = vor.u32 %v810_v54, %v806_v34  ;;  %v1088_v22 = vsel %vm7992_vm0, %v1086_v43, %v1087_v52  ;;  %v1002_v25 = vrot.slane %v1000_v7, 1 }
  0x65   : > { %v1010_v26 = vshrl.u32 %v6474_v8, 16  ;;  %v1012_v27 = vshll.u32 %v6474_v8, 16  ;;  %v1134_v28 = vrot.slane %v6445_v47, 1  ;;  %v1017_v29 = vshll.u32 %v6469_v4, 16 }
  0x66   : > { %v1137_v34 = vrot.slane %v6474_v8, 1  ;;  %v816_v36 = vsel %vm7991_vm1, %v811_v19, %v815_v57  ;;  %v931_v38 = vor.u32 %v930_v60, %v926_v53  ;;  %v1024_v52 = vshll.u32 %v6491_v31, 16 }
  0x67   : > { %1320 = vrot.lane.b32.xlu0 %v1307_v6, %s6061_s9  ;;  %1069 = vrot.lane.b32.xlu1 %v960_v16, %s6061_s9  ;;  %v1130_v6 = vsel %vm7992_vm0, %v1128_v23, %v1129_v24  ;;  %v1131_v16 = vrot.slane %v6435_v42, 1  ;;  %v995_v23 = vrot.slane %v993_v63, 1  ;;  %v1005_v24 = vshll.u32 %v6466_v3, 16 }
  0x68   : > { %v1014_v46 = vrot.slane %v1012_v27, 1  ;;  %v1019_v50 = vrot.slane %v1017_v29, 1  ;;  %v1036_v57 = vshll.u32 %v6499_v35, 16  ;;  %v936_v53 = vsel %vm7991_vm1, %v931_v38, %v935_v10 }
  0x69   : > { %v1007_v43 = vrot.slane %v1005_v24, 1  ;;  %v991_v60 = vor.u32 %v990_v13, %v986_v59  ;;  %v1140_v61 = vrot.slane %v6491_v31, 1  ;;  %v1133_v62 = vsel %vm7992_vm0, %v1131_v16, %v1132_v17 }
  0x6a   : > { %v1015_v63 = vor.u32 %v1014_v46, %v1010_v26  ;;  %v1026_v7 = vrot.slane %v1024_v52, 1  ;;  %v1038_v10 = vrot.slane %v1036_v57, 1  ;;  %v1003_v13 = vor.u32 %v1002_v25, %v998_v18  ;;  %v6549_v57 = vld [vmem:[%s6250_s7 + $0x114] sm:$0xff]  }
  0x6b   : > { %1067 = vrot.lane.b32.xlu0 %v948_v30, %s6061_s9  ;;  %1170 = vrot.lane.b32.xlu1 %v1124_v33, %s6060_s8  ;;  %v1135_v30 = vrot.slane %v6466_v3, 1  ;;  %v6494_v33 = vld [vmem:[%s6250_s7 + $0xf8] ss:$0 sps:$4 sm:$0x11]   ;;  %v1041_v3 = vshll.u32 %v5898_v44, 16  ;;  %v1143_v16 = vrot.slane %v6499_v35, 1 }
  0x6c   : > { %v1029_v54 = vshll.u32 %v6494_v33, 16  ;;  %v1141_v59 = vrot.slane %v6494_v33, 1  ;;  %v1144_v17 = vrot.slane %v5898_v44, 1  ;;  %v1020_v19 = vsel %vm7991_vm1, %v1015_v63, %v1019_v50  ;;  %v6537_v44 = vld [vmem:[%s6250_s7 + $0x108] sm:$0xff]  }
  0x6d   : > { %v1136_v29 = vsel %vm7992_vm0, %v1134_v28, %v1135_v30  ;;  %v1309_v50 = vshrl.u32 %v6537_v44, 16  ;;  %v5912_v63 = vld [vmem:[%s6250_s7 + $0x11c] ss:$0 sps:$4 sm:$0x11]  }
  0x6e   : > { %v1145_v28 = vsel %vm7992_vm0, %v1143_v16, %v1144_v17  ;;  %v1906_v16 = vrot.slane %v5912_v63, 1 }
  0x6f   : > { %1168 = vrot.lane.b32.xlu0 %v1121_v45, %s6060_s8  ;;  %1073 = vrot.lane.b32.xlu1 %v984_v49, %s6061_s9  ;;  %v1118_v45 = vsel %vm7992_vm0, %v1116_v58, %v1117_v12  ;;  %v1138_v49 = vrot.slane %v6469_v4, 1  ;;  %v1022_v58 = vshrl.u32 %v6491_v31, 16  ;;  %v6517_v4 = vld [vmem:[%s6250_s7 + $0x84] sm:$0xff]   ;;  %v996_v12 = vsel %vm7991_vm1, %v991_v60, %v995_v23 }
  0x70   : > { %v1875_v24 = vshrl.u32 %v6517_v4, 16  ;;  %v1877_v26 = vshll.u32 %v6517_v4, 16  ;;  %v1008_v23 = vsel %vm7991_vm1, %v1003_v13, %v1007_v43  ;;  %v1902_v46 = vrot.slane %v6517_v4, 1 }
  0x71   : > { %v1139_v18 = vsel %vm7992_vm0, %v1137_v34, %v1138_v49  ;;  %v1027_v33 = vor.u32 %v1026_v7, %v1022_v58  ;;  %v5910_v34 = vld [vmem:[%s6250_s7 + $0x110] ss:$0 sps:$4 sm:$0x11]   ;;  %v1142_v60 = vsel %vm7992_vm0, %v1140_v61, %v1141_v59  ;;  %v1894_v59 = vshll.u32 %v5912_v63, 16 }
  0x72   : > { %v1879_v38 = vrot.slane %v1877_v26, 1  ;;  %v1316_v58 = vshll.u32 %v5910_v34, 16  ;;  %v1905_v13 = vrot.slane %v6549_v57, 1 }
  0x73   : > { %1071 = vrot.lane.b32.xlu0 %v972_v1, %s6061_s9  ;;  %1174 = vrot.lane.b32.xlu1 %v1130_v6, %s6060_s8  ;;  %v1034_v1 = vshrl.u32 %v6499_v35, 16  ;;  %v5905_v6 = vld [vmem:[%s6250_s7 + $0x8c] ss:$0 sps:$4 sm:$0x11]   ;;  %s5984_s7 = sshll.u32 %s6063_s21, 4  ;;  %s5985_s7 = int_to_ptr.vmem [resolvable:$false] %s5984_s7 }
  0x74   : > { %v1882_v27 = vshll.u32 %v5905_v6, 16  ;;  %v1903_v49 = vrot.slane %v5905_v6, 1  ;;  %s5986_s10 = scalar_lea.vmem %s5985_s7, 2048 }
  0x75   : > { %v1039_v25 = vor.u32 %v1038_v10, %v1034_v1  ;;  %v1889_v1 = vshll.u32 %v6549_v57, 16  ;;  %v1887_v10 = vshrl.u32 %v6549_v57, 16 }
  0x76   : > { %v1884_v30 = vrot.slane %v1882_v27, 1 }
  0x77   : > { %1172 = vrot.lane.b32.xlu0 %v1127_v9, %s6060_s8  ;;  %1146 = vrot.lane.b32.xlu1 %v1088_v22, %s6060_s8  ;;  %v1031_v9 = vrot.slane %v1029_v54, 1  ;;  %v1043_v22 = vrot.slane %v1041_v3, 1  ;;  %v1327_v54 = vrot.slane %v6537_v44, 1  ;;  %v1904_v3 = vsel %vm7992_vm0, %v1902_v46, %v1903_v49 }
  0x78   : > { %v1891_v61 = vrot.slane %v1889_v1, 1  ;;  %v5903_v1 = vld [vmem:[%s7983_s1 + $0x28] sm:$0xff]  }
  0x79   : > { %v1032_v43 = vsel %vm7991_vm1, %v1027_v33, %v1031_v9  ;;  %v1318_v9 = vrot.slane %v1316_v58, 1 }
  0x7b   : > { %1045 = vrot.lane.b32.xlu0 %v816_v36, %s6061_s9  ;;  %1166 = vrot.lane.b32.xlu1 %v1118_v45, %s6060_s8  ;;  %v1044_v36 = vsel %vm7991_vm1, %v1039_v25, %v1043_v22  ;;  %v1311_v45 = vshll.u32 %v6537_v44, 16  ;;  %v1896_v22 = vrot.slane %v1894_v59, 1 }
  0x7d   : > { %v1313_v52 = vrot.slane %v1311_v45, 1 }
  0x7f   : > { %1065 = vrot.lane.b32.xlu0 %v936_v53, %s6061_s9  ;;  %1176 = vrot.lane.b32.xlu1 %v1133_v62, %s6060_s8  ;;  %v1880_v53 = vor.u32 %v1879_v38, %v1875_v24  ;;  %v1328_v62 = vrot.slane %v5910_v34, 1  ;;  %v1314_v7 = vor.u32 %v1313_v52, %v1309_v50  ;;  %v1907_v24 = vsel %vm7992_vm0, %v1905_v13, %v1906_v16 }
  0x81   : > { %v1885_v6 = vsel %vm7991_vm1, %v1880_v53, %v1884_v30  ;;  %v1319_v17 = vsel %vm7991_vm1, %v1314_v7, %v1318_v9 }
  0x83   : > { %1075 = vrot.lane.b32.xlu0 %v996_v12, %s6061_s9  ;;  %1079 = vrot.lane.b32.xlu1 %v1020_v19, %s6061_s9  ;;  %v1329_v12 = vsel %vm7992_vm0, %v1327_v54, %v1328_v62  ;;  %v1892_v19 = vor.u32 %v1891_v61, %v1887_v10  ;;  %v5902_v54 = vld [vmem:[%s7983_s1 + $0x20] sm:$0xff]  }
  0x85   : > { %v1897_v26 = vsel %vm7991_vm1, %v1892_v19, %v1896_v22 }
  0x87   : > { %1077 = vrot.lane.b32.xlu0 %v1008_v23, %s6061_s9  ;;  %1180 = vrot.lane.b32.xlu1 %v1139_v18, %s6060_s8 }
  0x8b   : > { %1178 = vrot.lane.b32.xlu0 %v1136_v29, %s6060_s8  ;;  %1083 = vrot.lane.b32.xlu1 %v1044_v36, %s6061_s9 }
  0x8f   : > { %1081 = vrot.lane.b32.xlu0 %v1032_v43, %s6061_s9  ;;  %1184 = vrot.lane.b32.xlu1 %v1145_v28, %s6060_s8  ;;  %v5899_v43 = vld [vmem:[%s7983_s1 + $0x8] sm:$0xff]  }
  0x93   : > { %1182 = vrot.lane.b32.xlu0 %v1142_v60, %s6060_s8  ;;  %1908 = vrot.lane.b32.xlu1 %v1904_v3, %s6060_s8 }
  0x97   : > { %1898 = vrot.lane.b32.xlu0 %v1885_v6, %s6061_s9  ;;  %1332 = vrot.lane.b32.xlu1 %v1329_v12, %s6060_s8  ;;  %v5906_v6 = vld [vmem:[%s7983_s1 + $0x60] sm:$0xff]  }
  0x9b   : > { %1322 = vrot.lane.b32.xlu0 %v1319_v17, %s6061_s9  ;;  %1910 = vrot.lane.b32.xlu1 %v1907_v24, %s6060_s8 }
  0x9f   : > { %1900 = vrot.lane.b32.xlu0 %v1897_v26, %s6061_s9 }
  0xb1   : > { %v1149_v27 = vpop.permute.xlu1 %1148 }
  0xb5   : > { %v1048_v23 = vpop.permute.xlu0 %1047  ;;  %v1151_v18 = vpop.permute.xlu1 %1150 }
  0xb6   : > { %v1190_v25 = vsel %vm7990_vm2, %v6253_v39, %v1048_v23 }
  0xb7   : > { %v6574_v29 = vsel %vm7989_vm3, %v1190_v25, %v1149_v27 }
  0xb8   : > { %5352 = vmatprep.mubr.msk.bf16.mxu0 %vm7988_vm4, %v6574_v29 }
  0xb9   : > { %v1050_v33 = vpop.permute.xlu0 %1049  ;;  %v1054_v38 = vpop.permute.xlu1 %1053 }
  0xba   : > { %v1192_v36 = vsel %vm7990_vm2, %v6257_v41, %v1050_v33  ;;  %v5900_v41 = vld [vmem:[%s7983_s1 + $0x10] sm:$0xff]   ;;  %v1196_v28 = vsel %vm7990_vm2, %v6269_v56, %v1054_v38 }
  0xbb   : > { %v6584_v34 = vsel %vm7989_vm3, %v1192_v36, %v1151_v18 }
  0xbc   : > { %5353 = vmatmul.mubr.msk.bf16.vlgmr.msra.gmra.mrb[0].mxu0 %vm7988_vm4, %v6584_v34 }
  0xbd   : > { %5393 = vmatpush3.bf16.msra.mxu0 %v6450_v48  ;;  %v1052_v39 = vpop.permute.xlu0 %1051  ;;  %v1155_v45 = vpop.permute.xlu1 %1154  ;;  %v5901_v48 = vld [vmem:[%s7983_s1 + $0x18] sm:$0xff]  }
  0xbe   : > { %5394 = vmatprep.subr.bf16.mxu0 %v5899_v43  ;;  %v1194_v30 = vsel %vm7990_vm2, %v6276_v0, %v1052_v39  ;;  %v6603_v52 = vsel %vm7989_vm3, %v1196_v28, %v1155_v45 }
  0xc1   : > { %v1153_v46 = vpop.permute.xlu0 %1152  ;;  %5395 = vmatpush3.bf16.msra.mxu0 %v5899_v43  ;;  %v1058_v50 = vpop.permute.xlu1 %1057 }
  0xc2   : > { %v6597_v49 = vsel %vm7989_vm3, %v1194_v30, %v1153_v46  ;;  %5396 = vmatprep.subr.bf16.mxu0 %v5900_v41  ;;  %v1200_v53 = vsel %vm7990_vm2, %v6281_v5, %v1058_v50  ;;  %v5907_v50 = vld [vmem:[%s7983_s1 + $0x68] sm:$0xff]  }
  0xc3   : > { %5356 = vmatprep.mubr.msk.bf16.mxu0 %vm7988_vm4, %v6597_v49 }
  0xc4   : > { %5357 = vmatmul.mubr.msk.bf16.gmra.mrb[4].mxu0 %vm7988_vm4, %v6603_v52 }
  0xc5   : > { %v1056_v56 = vpop.permute.xlu0 %1055  ;;  %5397 = vmatpush3.bf16.msra.mxu0 %v5900_v41  ;;  %v1159_v0 = vpop.permute.xlu1 %1158 }
  0xc6   : > { %5398 = vmatprep.subr.bf16.mxu0 %v5901_v48  ;;  %v1198_v60 = vsel %vm7990_vm2, %v6290_v14, %v1056_v56  ;;  %v6623_v3 = vsel %vm7989_vm3, %v1200_v53, %v1159_v0  ;;  %v5908_v56 = vld [vmem:[%s7983_s1 + $0x70] sm:$0xff]  }
  0xc9   : > { %v1157_v58 = vpop.permute.xlu0 %1156  ;;  %5399 = vmatpush3.bf16.msra.mxu0 %v5901_v48  ;;  %v1062_v63 = vpop.permute.xlu1 %1061 }
  0xca   : > { %v6617_v62 = vsel %vm7989_vm3, %v1198_v60, %v1157_v58  ;;  %5400 = vmatprep.subr.bf16.mxu0 %v5902_v54  ;;  %v1204_v7 = vsel %vm7990_vm2, %v6305_v32, %v1062_v63  ;;  %v5913_v60 = vld [vmem:[%s7983_s1 + $0x78] sm:$0xff]  }
  0xcb   : > { %5360 = vmatprep.mubr.msk.bf16.mxu0 %vm7988_vm4, %v6617_v62 }
  0xcc   : > { %5361 = vmatmul.mubr.msk.bf16.gmra.mrb[8].mxu0 %vm7988_vm4, %v6623_v3 }
  0xcd   : > { %v1060_v5 = vpop.permute.xlu0 %1059  ;;  %5401 = vmatpush3.bf16.msra.mxu0 %v5902_v54  ;;  %v1163_v14 = vpop.permute.xlu1 %1162 }
  0xce   : > { %5402 = vmatprep.subr.bf16.mxu0 %v5903_v1  ;;  %v1202_v9 = vsel %vm7990_vm2, %v6308_v37, %v1060_v5  ;;  %v6640_v12 = vsel %vm7989_vm3, %v1204_v7, %v1163_v14 }
  0xd1   : > { %v1161_v10 = vpop.permute.xlu0 %1160  ;;  %5403 = vmatpush3.bf16.msra.mxu0 %v5903_v1  ;;  %v1165_v59 = vpop.permute.xlu1 %1164 }
  0xd2   : > { %v6637_v61 = vsel %vm7989_vm3, %v1202_v9, %v1161_v10  ;;  %5444 = vmatprep.subr.bf16.mxu0 %v5906_v6  ;;  %v5915_v9 = vld [vmem:[%s7983_s1 + $0x88] sm:$0xff]  }
  0xd3   : > { %5364 = vmatprep.mubr.msk.bf16.mxu0 %vm7988_vm4, %v6637_v61 }
  0xd4   : > { %5365 = vmatmul.mubr.msk.bf16.gmra.mrb[12].mxu0 %vm7988_vm4, %v6640_v12 }
  0xd5   : > { %v1064_v32 = vpop.permute.xlu0 %1063  ;;  %v1331_v13 = vpop.permute.xlu1 %1330 }
  0xd6   : > { %v1206_v37 = vsel %vm7990_vm2, %v6323_v55, %v1064_v32 }
  0xd7   : > { %v6649_v16 = vsel %vm7989_vm3, %v1206_v37, %v1165_v59 }
  0xd8   : > { %5368 = vmatprep.mubr.msk.bf16.mxu0 %vm7988_vm4, %v6649_v16 }
  0xd9   : > { %v1321_v17 = vpop.permute.xlu0 %1320  ;;  %v1070_v22 = vpop.permute.xlu1 %1069 }
  0xda   : > { %v1335_v19 = vsel %vm7990_vm2, %v6331_v2, %v1321_v17  ;;  %v1212_v27 = vsel %vm7990_vm2, %v6340_v11, %v1070_v22 }
  0xdb   : > { %v6656_v24 = vsel %vm7989_vm3, %v1335_v19, %v1331_v13 }
  0xdc   : > { %5369 = vmatmul.mubr.msk.bf16.gmra.mrb[16].mxu0 %vm7988_vm4, %v6656_v24 }
  0xdd   : > { %v1068_v26 = vpop.permute.xlu0 %1067  ;;  %v1171_v55 = vpop.permute.xlu1 %1170 }
  0xde   : > { %v1210_v23 = vsel %vm7990_vm2, %v6350_v21, %v1068_v26  ;;  %v6668_v33 = vsel %vm7989_vm3, %v1212_v27, %v1171_v55 }
  0xe1   : > { %v1169_v18 = vpop.permute.xlu0 %1168  ;;  %v1074_v2 = vpop.permute.xlu1 %1073 }
  0xe2   : > { %v6665_v25 = vsel %vm7989_vm3, %v1210_v23, %v1169_v18  ;;  %v1216_v11 = vsel %vm7990_vm2, %v6369_v40, %v1074_v2  ;;  %v2446_v2 = vld [vmem:[#allocation2 + $0x24] sm:$0x1] }
  0xe3   : > { %5372 = vmatprep.mubr.msk.bf16.mxu0 %vm7988_vm4, %v6665_v25 }
  0xe4   : > { %5373 = vmatmul.mubr.msk.bf16.gmra.mrb[20].mxu0 %vm7988_vm4, %v6668_v33 }
  0xe5   : > { %v1072_v36 = vpop.permute.xlu0 %1071  ;;  %v1175_v38 = vpop.permute.xlu1 %1174 }
  0xe6   : > { %v1214_v21 = vsel %vm7990_vm2, %v6382_v51, %v1072_v36  ;;  %v6682_v41 = vsel %vm7989_vm3, %v1216_v11, %v1175_v38  ;;  %v2443_v36 = vld [vmem:[#allocation2 + $0x18] sm:$0x1]  ;;  %v2508_v11 = vld [vmem:[#allocation2 + $0x2c] sm:$0x1] }
  0xe7   : > { %v2444_v38 = vsel %vm6818_vm7, 0, %v2443_v36  ;;  %v2488_v36 = vld [vmem:[#allocation2 + $0xcc] sm:$0x1] }
  0xe8   : > { %2445 = vst [vmem:[#allocation2 + $0x18] sm:$0x1] %v2444_v38  ;;  %v2489_v38 = vsel %vm6818_vm7, 0, %v2488_v36 }
  0xe9   : > { %v1173_v43 = vpop.permute.xlu0 %1172  ;;  %v1147_v45 = vpop.permute.xlu1 %1146  ;;  %2490 = vst [vmem:[#allocation2 + $0xcc] sm:$0x1] %v2489_v38 }
  0xea   : > { %v6679_v39 = vsel %vm7989_vm3, %v1214_v21, %v1173_v43  ;;  %v2509_v21 = vsel %vm6827_vm9, 0, %v2508_v11  ;;  %v2505_v43 = vld [vmem:[#allocation2 + $0x20] sm:$0x1]  ;;  %v2334_v11 = vstv %s4981_s24 }
  0xeb   : > { %5376 = vmatprep.mubr.msk.bf16.mxu0 %vm7988_vm4, %v6679_v39  ;;  %2510 = vst [vmem:[#allocation2 + $0x2c] sm:$0x1] %v2509_v21  ;;  %v2335_v21 = vadd.s32 1, %v2334_v11  ;;  %vm2344_vm12 = vcmp.ge.s32.totalorder %v2334_v11, 0  ;;  %vm2354_vm13 = vcmp.lt.s32.totalorder %v2334_v11, 16 }
  0xec   : > { %5377 = vmatmul.mubr.msk.bf16.gmra.mrb[24].mxu0 %vm7988_vm4, %v6682_v41 }
  0xed   : > { %v1046_v28 = vpop.permute.xlu0 %1045  ;;  %v6690_v30 = vpop.permute.xlu1 %1166  ;;  %vm2345_vm10 = vcmp.ge.s32.totalorder %v2335_v21, 0  ;;  %vm2355_vm11 = vcmp.lt.s32.totalorder %v2335_v21, 16 }
  0xee   : > { %v1188_v40 = vsel %vm7990_vm2, %v6406_v15, %v1046_v28  ;;  %v2449_v28 = vld [vmem:[#allocation2 + $0x30] sm:$0x1]  ;;  %vm6931_vm5 = vmand %vm2345_vm10, %vm2355_vm11 }
  0xef   : > { %v1229_v51 = vsel %vm7989_vm3, %v1188_v40, %v1147_v45  ;;  %v2452_v45 = vld [vmem:[#allocation2 + $0x3c] sm:$0x1]  ;;  %v2450_v40 = vsel %vm6818_vm7, 0, %v2449_v28 }
  0xf0   : > { %5404 = vmatprep.mubr.msk.bf16.mxu0 %vm7988_vm4, %v1229_v51  ;;  %2451 = vst [vmem:[#allocation2 + $0x30] sm:$0x1] %v2450_v40 }
  0xf1   : > { %v1066_v46 = vpop.permute.xlu0 %1065  ;;  %v1177_v48 = vpop.permute.xlu1 %1176 }
  0xf2   : > { %v1208_v27 = vsel %vm7990_vm2, %v6415_v20, %v1066_v46  ;;  %v2511_v46 = vld [vmem:[#allocation2 + $0x38] sm:$0x1] }
  0xf4   : > { %5405 = vmatmul.mubr.msk.bf16.vlgmr.msra.gmra.mrb[0].mxu0 %vm7988_vm4, %v6574_v29 }
  0xf5   : > { %5445 = vmatpush3.bf16.msra.mxu0 %v5906_v6  ;;  %5408 = vmatprep.mubr.msk.bf16.mxu0 %vm7988_vm4, %v6584_v34  ;;  %v1076_v15 = vpop.permute.xlu0 %1075  ;;  %v1080_v54 = vpop.permute.xlu1 %1079 }
  0xf6   : > { %5446 = vmatprep.subr.bf16.mxu0 %v5907_v50  ;;  %v1218_v0 = vsel %vm7990_vm2, %v6435_v42, %v1076_v15  ;;  %v1222_v58 = vsel %vm7990_vm2, %v6474_v8, %v1080_v54  ;;  %v5914_v8 = vld [vmem:[%s7983_s1 + $0x80] sm:$0xff]   ;;  %v2520_v54 = vld [vmem:[#allocation2 + $0x5c] sm:$0x1] }
  0xf7   : > { %v6707_v53 = vsel %vm7989_vm3, %v1218_v0, %v1177_v48  ;;  %v2458_v48 = vld [vmem:[#allocation2 + $0x54] sm:$0x1] }
  0xf8   : > { %5380 = vmatprep.mubr.msk.bf16.mxu1 %vm7988_vm4, %v6707_v53  ;;  %v2459_v15 = vsel %vm6818_vm7, 0, %v2458_v48 }
  0xf9   : > { %5447 = vmatpush3.bf16.msra.mxu0 %v5907_v50  ;;  %v1078_v29 = vpop.permute.xlu0 %1077  ;;  %v1181_v63 = vpop.permute.xlu1 %1180  ;;  %v2512_v50 = vsel %vm6827_vm9, 0, %v2511_v46  ;;  %2460 = vst [vmem:[#allocation2 + $0x54] sm:$0x1] %v2459_v15  ;;  %v6922_v46 = vadd.s32 2, %v2334_v11  ;;  %v2550_v15 = vld [vmem:[#allocation2 + $0xd4] sm:$0x1] }
  0xfa   : > { %5448 = vmatprep.subr.bf16.mxu0 %v5908_v56  ;;  %v1220_v42 = vsel %vm7990_vm2, %v6445_v47, %v1078_v29  ;;  %v6723_v5 = vsel %vm7989_vm3, %v1222_v58, %v1181_v63  ;;  %2513 = vst [vmem:[#allocation2 + $0x38] sm:$0x1] %v2512_v50  ;;  %v2517_v29 = vld [vmem:[#allocation2 + $0x50] sm:$0x1]  ;;  %v2464_v58 = vld [vmem:[#allocation2 + $0x6c] sm:$0x1] }
  0xfb   : > { %v2465_v63 = vsel %vm6818_vm7, 0, %v2464_v58  ;;  %vm2346_vm1 = vcmp.ge.s32.totalorder %v6922_v46, 0  ;;  %vm2356_vm10 = vcmp.lt.s32.totalorder %v6922_v46, 16 }
  0xfc   : > { %5409 = vmatmul.mubr.msk.bf16.gmra.mrb[4].mxu0 %vm7988_vm4, %v6597_v49  ;;  %2466 = vst [vmem:[#allocation2 + $0x6c] sm:$0x1] %v2465_v63 }
  0xfd   : > { %5412 = vmatprep.mubr.msk.bf16.mxu0 %vm7988_vm4, %v6603_v52  ;;  %5449 = vmatpush3.bf16.msra.mxu0 %v5908_v56  ;;  %v1179_v1 = vpop.permute.xlu0 %1178  ;;  %v1084_v6 = vpop.permute.xlu1 %1083  ;;  %v2455_v56 = vld [vmem:[#allocation2 + $0x48] sm:$0x1] }
  0xfe   : > { %5450 = vmatprep.subr.bf16.mxu0 %v5913_v60  ;;  %v1261_v14 = vsel %vm7989_vm3, %v1220_v42, %v1179_v1  ;;  %v1226_v7 = vsel %vm7990_vm2, %v6499_v35, %v1084_v6  ;;  %v2456_v0 = vsel %vm6818_vm7, 0, %v2455_v56  ;;  %v2461_v42 = vld [vmem:[#allocation2 + $0x60] sm:$0x1] }
  0xff   : > { %5381 = vmatmul.mubr.msk.bf16.vlgmr.msra.gmra.mrb[0].mxu1 %vm7988_vm4, %v1261_v14  ;;  %2457 = vst [vmem:[#allocation2 + $0x48] sm:$0x1] %v2456_v0  ;;  %v2462_v1 = vsel %vm6818_vm7, 0, %v2461_v42 }
 0x100   : > { %5384 = vmatprep.mubr.msk.bf16.mxu1 %vm7988_vm4, %v6723_v5  ;;  %2463 = vst [vmem:[#allocation2 + $0x60] sm:$0x1] %v2462_v1 }
 0x101   : > { %5451 = vmatpush3.bf16.msra.mxu0 %v5913_v60  ;;  %v1082_v47 = vpop.permute.xlu0 %1081  ;;  %v1185_v10 = vpop.permute.xlu1 %1184  ;;  %v2518_v60 = vsel %vm6827_vm9, 0, %v2517_v29 }
 0x102   : > { %5452 = vmatprep.subr.bf16.mxu0 %v5914_v8  ;;  %v1224_v59 = vsel %vm7990_vm2, %v6491_v31, %v1082_v47  ;;  %v1267_v37 = vsel %vm7989_vm3, %v1226_v7, %v1185_v10  ;;  %2519 = vst [vmem:[#allocation2 + $0x50] sm:$0x1] %v2518_v60  ;;  %v2523_v47 = vld [vmem:[#allocation2 + $0x68] sm:$0x1] }
 0x104   : > { %5413 = vmatmul.mubr.msk.bf16.gmra.mrb[8].mxu0 %vm7988_vm4, %v6617_v62 }
 0x105   : > { %5416 = vmatprep.mubr.msk.bf16.mxu0 %vm7988_vm4, %v6623_v3  ;;  %5453 = vmatpush3.bf16.msra.mxu0 %v5914_v8  ;;  %v1183_v32 = vpop.permute.xlu0 %1182  ;;  %v1909_v13 = vpop.permute.xlu1 %1908 }
 0x106   : > { %v1265_v35 = vsel %vm7989_vm3, %v1224_v59, %v1183_v32  ;;  %5454 = vmatprep.subr.bf16.mxu0 %v5915_v9 }
 0x107   : > { %5385 = vmatmul.mubr.msk.bf16.gmra.mrb[4].mxu1 %vm7988_vm4, %v1265_v35 }
 0x108   : > { %5388 = vmatprep.mubr.msk.bf16.mxu1 %vm7988_vm4, %v1267_v37 }
 0x109   : > { %5455 = vmatpush3.bf16.msra.mxu0 %v5915_v9  ;;  %v1899_v31 = vpop.permute.xlu0 %1898  ;;  %v1333_v22 = vpop.permute.xlu1 %1332  ;;  %v2524_v9 = vsel %vm6827_vm9, 0, %v2523_v47 }
 0x10a   : > { %v1913_v17 = vsel %vm7990_vm2, %v6517_v4, %v1899_v31  ;;  %v1249_v4 = vsel %vm7989_vm3, %v1208_v27, %v6690_v30  ;;  %v2514_v30 = vld [vmem:[#allocation2 + $0x44] sm:$0x1]  ;;  %2525 = vst [vmem:[#allocation2 + $0x68] sm:$0x1] %v2524_v9 }
 0x10b   : > { %v1917_v19 = vsel %vm7989_vm3, %v1913_v17, %v1909_v13  ;;  %v2515_v51 = vsel %vm6827_vm9, 0, %v2514_v30  ;;  %v2470_v13 = vld [vmem:[#allocation2 + $0x84] sm:$0x1]  ;;  %v2467_v17 = vld [vmem:[#allocation2 + $0x78] sm:$0x1] }
 0x10c   : > { %5417 = vmatmul.mubr.msk.bf16.gmra.mrb[12].mxu0 %vm7988_vm4, %v6637_v61  ;;  %2516 = vst [vmem:[#allocation2 + $0x44] sm:$0x1] %v2515_v51  ;;  %v2471_v31 = vsel %vm6818_vm7, 0, %v2470_v13  ;;  %v6948_v13 = vadd.s32 7, %v2334_v11 }
 0x10d   : > { %5420 = vmatprep.mubr.msk.bf16.mxu0 %vm7988_vm4, %v6640_v12  ;;  %v1323_v26 = vpop.permute.xlu0 %1322  ;;  %2472 = vst [vmem:[#allocation2 + $0x84] sm:$0x1] %v2471_v31  ;;  %v6950_v31 = vadd.s32 6, %v2334_v11 }
 0x10e   : > { %v1337_v55 = vsel %vm7990_vm2, %v6537_v44, %v1323_v26 }
 0x10f   : > { %v1341_v23 = vsel %vm7989_vm3, %v1337_v55, %v1333_v22  ;;  %v2532_v22 = vld [vmem:[#allocation2 + $0x8c] sm:$0x1]  ;;  %v2529_v55 = vld [vmem:[#allocation2 + $0x80] sm:$0x1] }
 0x110   : > { %5389 = vmatmul.mubr.msk.bf16.gmra.mrb[8].mxu1 %vm7988_vm4, %v1341_v23  ;;  %v2533_v26 = vsel %vm6827_vm9, 0, %v2532_v22  ;;  %v2530_v27 = vsel %vm6827_vm9, 0, %v2529_v55 }
 0x111   : > { %v1901_v20 = vpop.permute.xlu0 %1900  ;;  %2534 = vst [vmem:[#allocation2 + $0x8c] sm:$0x1] %v2533_v26  ;;  %2531 = vst [vmem:[#allocation2 + $0x80] sm:$0x1] %v2530_v27  ;;  %v6954_v26 = vadd.s32 9, %v2334_v11 }
 0x112   : > { %v1915_v44 = vsel %vm7990_vm2, %v6549_v57, %v1901_v20  ;;  %v2473_v20 = vld [vmem:[#allocation2 + $0x90] sm:$0x1]  ;;  %vm6938_vm2 = vmand %vm2344_vm12, %vm2354_vm13 }
 0x114   : > { %5421 = vmatmul.mubr.msk.bf16.gmra.mrb[16].mxu0 %vm7988_vm4, %v6649_v16  ;;  %v3161_v29 = vld [vmem:[#allocation2 + $0x84] sm:$0xf] }
 0x115   : > { %5424 = vmatprep.mubr.msk.bf16.mxu0 %vm7988_vm4, %v1249_v4 }
 0x11c   : > { %5425 = vmatmul.mubr.msk.bf16.gmra.mrb[20].mxu0 %vm7988_vm4, %v6665_v25 }
 0x11d   : > { %5428 = vmatprep.mubr.msk.bf16.mxu0 %vm7988_vm4, %v6668_v33 }
 0x124   : > { %5429 = vmatmul.mubr.msk.bf16.gmra.mrb[24].mxu0 %vm7988_vm4, %v6679_v39 }
 0x125   : > { %5432 = vmatprep.mubr.msk.bf16.mxu0 %vm7988_vm4, %v6682_v41 }
 0x12c   : > { %5433 = vmatmul.mubr.msk.bf16.gmra.mrb[28].mxu0 %vm7988_vm4, %v6707_v53 }
 0x12d   : > { %5436 = vmatprep.mubr.msk.bf16.mxu0 %vm7988_vm4, %v1261_v14 }
 0x134   : > { %5437 = vmatmul.mubr.msk.bf16.gmra.mrb[32].mxu0 %vm7988_vm4, %v6723_v5 }
 0x135   : > { %5440 = vmatprep.mubr.msk.bf16.mxu0 %vm7988_vm4, %v1265_v35 }
 0x13c   : > { %5441 = vmatmul.mubr.msk.bf16.gmra.mrb[36].mxu0 %vm7988_vm4, %v1267_v37 }
 0x13d   : > { %5456 = vmatprep.mubr.msk.bf16.mxu0 %vm7988_vm4, %v6584_v34  ;;  %v1911_v34 = vpop.permute.xlu1 %1910 }
 0x144   : > { %5457 = vmatmul.mubr.msk.bf16.vlgmr.msra.gmra.mrb[0].mxu0 %vm7988_vm4, %v6597_v49  ;;  %v1919_v49 = vsel %vm7989_vm3, %v1915_v44, %v1911_v34  ;;  %v2474_v44 = vsel %vm6818_vm7, 0, %v2473_v20  ;;  %v2538_v34 = vld [vmem:[#allocation2 + $0xa4] sm:$0x1]  ;;  %vm2679_vm3 = vsmask.f32 4368 }
 0x145   : > { %5460 = vmatprep.mubr.msk.bf16.mxu0 %vm7988_vm4, %v6603_v52  ;;  %v2440_v52 = vld [vmem:[#allocation2 + $0xc] sm:$0x1]  ;;  %2475 = vst [vmem:[#allocation2 + $0x90] sm:$0x1] %v2474_v44 }
 0x14c   : > { %5461 = vmatmul.mubr.msk.bf16.gmra.mrb[4].mxu0 %vm7988_vm4, %v6617_v62 }
 0x14d   : > { %5464 = vmatprep.mubr.msk.bf16.mxu0 %vm7988_vm4, %v6623_v3  ;;  %v2437_v3 = vld [vmem:[#allocation2] sm:$0x1] }
 0x14e   : > { %v2438_v57 = vsel %vm6818_vm7, 0, %v2437_v3 }
 0x14f   : > { %2439 = vst [vmem:[#allocation2] sm:$0x1] %v2438_v57 }
 0x154   : > { %5465 = vmatmul.mubr.msk.bf16.gmra.mrb[8].mxu0 %vm7988_vm4, %v6637_v61  ;;  %v2441_v61 = vsel %vm6818_vm7, 0, %v2440_v52  ;;  %v2535_v52 = vld [vmem:[#allocation2 + $0x98] sm:$0x1] }
 0x155   : > { %5468 = vmatprep.mubr.msk.bf16.mxu0 %vm7988_vm4, %v6640_v12  ;;  %v2502_v12 = vld [vmem:[#allocation2 + $0x14] sm:$0x1]  ;;  %2442 = vst [vmem:[#allocation2 + $0xc] sm:$0x1] %v2441_v61  ;;  %v2536_v3 = vsel %vm6827_vm9, 0, %v2535_v52 }
 0x156   : > { %v2503_v18 = vsel %vm6827_vm9, 0, %v2502_v12  ;;  %2537 = vst [vmem:[#allocation2 + $0x98] sm:$0x1] %v2536_v3  ;;  %v2482_v61 = vld [vmem:[#allocation2 + $0xb4] sm:$0x1] }
 0x157   : > { %2504 = vst [vmem:[#allocation2 + $0x14] sm:$0x1] %v2503_v18  ;;  %v2483_v57 = vsel %vm6818_vm7, 0, %v2482_v61  ;;  %v2479_v12 = vld [vmem:[#allocation2 + $0xa8] sm:$0x1] }
 0x158   : > { %2484 = vst [vmem:[#allocation2 + $0xb4] sm:$0x1] %v2483_v57  ;;  %v2544_v18 = vld [vmem:[#allocation2 + $0xbc] sm:$0x1] }
 0x15c   : > { %5469 = vmatmul.mubr.msk.bf16.gmra.mrb[12].mxu0 %vm7988_vm4, %v6649_v16  ;;  %v8004_v16 = vmov 0 }
 0x15d   : > { %5472 = vmatprep.mubr.msk.bf16.mxu0 %vm7988_vm4, %v6656_v24  ;;  %v8005_v16 = vsel %vm6827_vm9, 4294967295, %v8004_v16  ;;  %v2499_v24 = vld [vmem:[#allocation2 + $0x8] sm:$0x1] }
 0x15e   : > { %8006 = vst [vmem:[#allocation7_spill] sm:$0xff] %v8005_v16  ;;  %v2500_v25 = vsel %vm6827_vm9, 0, %v2499_v24  ;;  %v2480_v24 = vsel %vm6818_vm7, 0, %v2479_v12 }
 0x15f   : > { %2501 = vst [vmem:[#allocation2 + $0x8] sm:$0x1] %v2500_v25  ;;  %2481 = vst [vmem:[#allocation2 + $0xa8] sm:$0x1] %v2480_v24  ;;  %v2545_v25 = vsel %vm6827_vm9, 0, %v2544_v18  ;;  %v6969_v24 = vadd.s32 8, %v2334_v11 }
 0x160   : > { %2546 = vst [vmem:[#allocation2 + $0xbc] sm:$0x1] %v2545_v25 }
 0x164   : > { %5473 = vmatmul.mubr.msk.bf16.gmra.mrb[16].mxu0 %vm7988_vm4, %v1917_v19  ;;  %v2468_v19 = vsel %vm6818_vm7, 0, %v2467_v17  ;;  %v2547_v17 = vld [vmem:[#allocation2 + $0xc8] sm:$0x1] }
 0x165   : > { %5476 = vmatprep.mubr.msk.bf16.mxu0 %vm7988_vm4, %v6668_v33  ;;  %v2447_v33 = vsel %vm6818_vm7, 0, %v2446_v2  ;;  %2469 = vst [vmem:[#allocation2 + $0x78] sm:$0x1] %v2468_v19  ;;  %v2541_v2 = vld [vmem:[#allocation2 + $0xb0] sm:$0x1]  ;;  %v2548_v55 = vsel %vm6827_vm9, 0, %v2547_v17 }
 0x166   : > { %2448 = vst [vmem:[#allocation2 + $0x24] sm:$0x1] %v2447_v33  ;;  %v2542_v33 = vsel %vm6827_vm9, 0, %v2541_v2  ;;  %2549 = vst [vmem:[#allocation2 + $0xc8] sm:$0x1] %v2548_v55 }
 0x167   : > { %2543 = vst [vmem:[#allocation2 + $0xb0] sm:$0x1] %v2542_v33  ;;  %v3095_v55 = vld [vmem:[#allocation2 + $0x14] sm:$0x1] }
 0x16c   : > { %5477 = vmatmul.mubr.msk.bf16.gmra.mrb[20].mxu0 %vm7988_vm4, %v6679_v39  ;;  %v2506_v39 = vsel %vm6827_vm9, 0, %v2505_v43  ;;  %v2485_v43 = vld [vmem:[#allocation2 + $0xc0] sm:$0x1] }
 0x16d   : > { %5480 = vmatprep.mubr.msk.bf16.mxu0 %vm7988_vm4, %v6682_v41  ;;  %2507 = vst [vmem:[#allocation2 + $0x20] sm:$0x1] %v2506_v39  ;;  %v2453_v41 = vsel %vm6818_vm7, 0, %v2452_v45  ;;  %v6913_v39 = vld [vmem:[%s7984_s2] ss:$0 sm:$0xff]  ;;  %v6915_v45 = vadd.s32 3, %v2334_v11 }
 0x16e   : > { %2454 = vst [vmem:[#allocation2 + $0x3c] sm:$0x1] %v2453_v41  ;;  %v2486_v41 = vsel %vm6818_vm7, 0, %v2485_v43 }
 0x16f   : > { %2487 = vst [vmem:[#allocation2 + $0xc0] sm:$0x1] %v2486_v41  ;;  %vm2347_vm14 = vcmp.ge.s32.totalorder %v6915_v45, 0  ;;  %vm2357_vm15 = vcmp.lt.s32.totalorder %v6915_v45, 16 }
 0x170   : > { %vm6979_vm11 = vmand %vm2347_vm14, %vm2357_vm15 }
 0x174   : > { %5481 = vmatmul.mubr.msk.bf16.gmra.mrb[24].mxu0 %vm7988_vm4, %v6707_v53  ;;  %v2521_v53 = vsel %vm6827_vm9, 0, %v2520_v54 }
 0x175   : > { %5484 = vmatprep.mubr.msk.bf16.mxu0 %vm7988_vm4, %v1261_v14  ;;  %2522 = vst [vmem:[#allocation2 + $0x5c] sm:$0x1] %v2521_v53  ;;  %v2551_v53 = vsel %vm6827_vm9, 0, %v2550_v15 }
 0x176   : > { %2552 = vst [vmem:[#allocation2 + $0xd4] sm:$0x1] %v2551_v53 }
 0x17c   : > { %5485 = vmatmul.mubr.msk.bf16.gmra.mrb[28].mxu0 %vm7988_vm4, %v6723_v5  ;;  %v2526_v5 = vld [vmem:[#allocation2 + $0x74] sm:$0x1] }
 0x17d   : > { %5488 = vmatprep.mubr.msk.bf16.mxu0 %vm7988_vm4, %v1265_v35  ;;  %v2527_v8 = vsel %vm6827_vm9, 0, %v2526_v5  ;;  %v6944_v5 = vadd.s32 5, %v2334_v11 }
 0x17e   : > { %2528 = vst [vmem:[#allocation2 + $0x74] sm:$0x1] %v2527_v8  ;;  %v6946_v8 = vadd.s32 4, %v2334_v11  ;;  %v7375_v11 = vld [vmem:[%s7985_s3] sm:$0xff]  }
 0x17f   : > { %vm2349_vm12 = vcmp.ge.s32.totalorder %v6944_v5, 0  ;;  %vm2359_vm13 = vcmp.lt.s32.totalorder %v6944_v5, 16 }
 0x180   : > { %vm2348_vm14 = vcmp.ge.s32.totalorder %v6946_v8, 0  ;;  %vm2358_vm15 = vcmp.lt.s32.totalorder %v6946_v8, 16 }
 0x184   : > { %5489 = vmatmul.mubr.msk.bf16.gmra.mrb[32].mxu0 %vm7988_vm4, %v1267_v37 }
 0x185   : > { %5492 = vmatprep.mubr.msk.bf16.mxu0 %vm7988_vm4, %v1341_v23  ;;  %v2476_v23 = vld [vmem:[#allocation2 + $0x9c] sm:$0x1] }
 0x186   : > { %v2477_v4 = vsel %vm6818_vm7, 0, %v2476_v23  ;;  %v2494_v23 = vld [vmem:[#allocation2 + $0xe4] sm:$0x1] }
 0x187   : > { %2478 = vst [vmem:[#allocation2 + $0x9c] sm:$0x1] %v2477_v4  ;;  %v2495_v52 = vsel %vm6818_vm7, 0, %v2494_v23 }
 0x188   : > { %2496 = vst [vmem:[#allocation2 + $0xe4] sm:$0x1] %v2495_v52  ;;  %v3088_v52 = vld [vmem:[#allocation2 + $0x8] sm:$0x1] }
 0x18c   : > { %5493 = vmatmul.mubr.msk.bf16.gmra.mrb[36].mxu0 %vm7988_vm4, %v1919_v49  ;;  %v2539_v49 = vsel %vm6827_vm9, 0, %v2538_v34  ;;  %vm7993_vm4 = vcmask 257024  }
 0x18d   : > { %2540 = vst [vmem:[#allocation2 + $0xa4] sm:$0x1] %v2539_v49  ;;  %vm6988_vm0 = vmand %vm7993_vm4, %vm2497_vm8 }
 0x18e   : > { %vm6996_vm8 = vmor %vm2435_vm6, %vm2679_vm3 }
 0x18f   : > { %vm7008_vm3 = vmand %vm2346_vm1, %vm2356_vm10 }
 0x190   : > { %vm7040_vm1 = vmand %vm2349_vm12, %vm2359_vm13  ;;  %vm2361_vm12 = vcmp.lt.s32.totalorder %v6948_v13, 16  ;;  %vm2350_vm13 = vcmp.ge.s32.totalorder %v6950_v31, 0 }
 0x191   : > { %vm7052_vm6 = vmand %vm2348_vm14, %vm2358_vm15  ;;  %vm2360_vm14 = vcmp.lt.s32.totalorder %v6950_v31, 16  ;;  %vm8025_vm15 = vcmp.ge.s32.totalorder %v6948_v13, 0  ;;  %v2556_v13 = vld [vmem:[#allocation2 + $0xec] sm:$0x1] }
 0x192   : > { %vm7121_vm10 = vmand %vm8025_vm15, %vm2361_vm12 }
 0x193   : > { %vm7136_vm12 = vmand %vm2350_vm13, %vm2360_vm14  ;;  %vm8030_vm13 = vcmp.lt.s32.totalorder %v6954_v26, 16  ;;  %vm8031_vm14 = vcmp.ge.s32.totalorder %v6954_v26, 0 }
 0x194   : > { %vm7152_vm15 = vmand %vm8031_vm14, %vm8030_vm13  ;;  %vm8035_vm13 = vcmp.lt.s32.totalorder %v6969_v24, 16  ;;  %vm8036_vm14 = vcmp.ge.s32.totalorder %v6969_v24, 0 }
 0x1d2   : > { %v6865_v14 = vpop.f32.mrb[0].mxu1 }
 0x1d3   : > { %v6867_v6 = vpop.f32.mrb[1].mxu1 }
 0x1d4   : > { %v6869_v7 = vpop.f32.mrb[2].mxu1 }
 0x1d5   : > { %v6873_v10 = vpop.f32.mrb[3].mxu1 }
 0x1da   : > { %v6875_v59 = vpop.f32.mrb[4].mxu1 }
 0x1db   : > { %v6877_v32 = vpop.f32.mrb[5].mxu1 }
 0x1dc   : > { %v6879_v37 = vpop.f32.mrb[6].mxu1 }
 0x1dd   : > { %v6881_v35 = vpop.f32.mrb[7].mxu1 }
 0x1e3   : > { %v6919_v28 = vpop.f32.mrb[8].mxu1 }
 0x1e4   : > { %v6958_v27 = vpop.f32.mrb[9].mxu1 }
 0x1e5   : > { %v6962_v49 = vpop.f32.mrb[10].mxu1 }
 0x1e6   : > { %8011 = vst [vmem:[#allocation8_spill] sm:$0xff] %v6962_v49  ;;  %v6971_v18 = vpop.f32.mrb[11].mxu1 }
 0x1e7   : > { %8012 = vst [vmem:[#allocation9_spill] sm:$0xff] %v6971_v18 }
 0x217   : > { %v5458_v40 = vpop.f32.mrb[0].mxu0 }
 0x218   : > { %v2215_v30 = vadd.f32 %v5458_v40, %v6913_v39  ;;  %v2007_v51 = vpop.f32.mrb[1].mxu0 }
 0x219   : > { %v2213_v50 = vadd.f32 %v6913_v39, %v2007_v51  ;;  %v5459_v48 = vpop.f32.mrb[2].mxu0 }
 0x21a   : > { %v2255_v56 = vmul.f32 0.2, %v2215_v30  ;;  %v2216_v0 = vadd.f32 %v5459_v48, %v6913_v39  ;;  %v2010_v54 = vpop.f32.mrb[3].mxu0 }
 0x21b   : > { %v2253_v60 = vmul.f32 0.2, %v2213_v50  ;;  %v2214_v58 = vadd.f32 %v6913_v39, %v2010_v54 }
 0x21c   : > { %v2295_v63 = vmax.f32 %v2215_v30, %v2255_v56  ;;  %v2256_v1 = vmul.f32 0.2, %v2216_v0 }
 0x21d   : > { %v2293_v47 = vmax.f32 %v2213_v50, %v2253_v60  ;;  %v2254_v9 = vmul.f32 0.2, %v2214_v58 }
 0x21e   : > { %v2396_v19 = vsel %vm6931_vm5, %v2295_v63, 0.0  ;;  %v2296_v22 = vmax.f32 %v2216_v0, %v2256_v1  ;;  %v3091_v0 = vld [vmem:[#allocation2 + $0xc] sm:$0xf]  ;;  %v3083_v1 = vld [vmem:[#allocation2] sm:$0xf] }
 0x21f   : > { %v5158_v4 = vpack.c.bf16 %v2396_v19, %v2396_v19  ;;  %v2394_v20 = vsel %vm6938_vm2, %v2293_v47, 0.0  ;;  %v2294_v44 = vmax.f32 %v2214_v58, %v2254_v9  ;;  %v5462_v34 = vpop.f32.mrb[4].mxu0 }
 0x220   : > { %v5156_v3 = vpack.c.bf16 %v2394_v20, %v2394_v20  ;;  %v2397_v61 = vsel %vm6931_vm5, %v2296_v22, 0.0  ;;  %v2219_v57 = vadd.f32 %v5462_v34, %v6913_v39  ;;  %v2023_v12 = vpop.f32.mrb[5].mxu0 }
 0x221   : > { %v2699_v25 = vshrl.u32 %v5158_v4, 16  ;;  %v2702_v2 = vshll.u32 %v5158_v4, 16  ;;  %v5159_v33 = vpack.c.bf16 %v2397_v61, %v2397_v61  ;;  %v2395_v36 = vsel %vm6938_vm2, %v2294_v44, 0.0  ;;  %v5463_v38 = vpop.f32.mrb[6].mxu0 }
 0x222   : > { %v2682_v21 = vshrl.u32 %v5156_v3, 16  ;;  %v2685_v43 = vshll.u32 %v5156_v3, 16  ;;  %v5157_v41 = vpack.c.bf16 %v2395_v36, %v2395_v36  ;;  %v2259_v40 = vmul.f32 0.2, %v2219_v57  ;;  %v2026_v30 = vpop.f32.mrb[7].mxu0 }
 0x223   : > { %v2701_v51 = vrot.slane %v2699_v25, 7  ;;  %v2707_v50 = vshrl.u32 %v5159_v33, 16  ;;  %v2710_v48 = vshll.u32 %v5159_v33, 16  ;;  %v2217_v15 = vadd.f32 %v6913_v39, %v2023_v12 }
 0x224   : > { %v2684_v54 = vrot.slane %v2682_v21, 7  ;;  %v2690_v53 = vshrl.u32 %v5157_v41, 16  ;;  %v2693_v45 = vshll.u32 %v5157_v41, 16  ;;  %v2299_v60 = vmax.f32 %v2219_v57, %v2259_v40 }
 0x225   : > { %v2704_v58 = vor.u32 %v2702_v2, %v2701_v51  ;;  %v2705_v63 = vrot.slane %v2701_v51, 4  ;;  %v2709_v47 = vrot.slane %v2707_v50, 7  ;;  %v2257_v9 = vmul.f32 0.2, %v2217_v15 }
 0x226   : > { %v2687_v17 = vor.u32 %v2685_v43, %v2684_v54  ;;  %v2688_v19 = vrot.slane %v2684_v54, 4  ;;  %v2692_v23 = vrot.slane %v2690_v53, 7  ;;  %v2400_v4 = vsel %vm6979_vm11, %v2299_v60, 0.0 }
 0x227   : > { %v3092_v20 = vsel %vm6988_vm0, %v2704_v58, %v3091_v0  ;;  %v2712_v44 = vor.u32 %v2710_v48, %v2709_v47  ;;  %v2714_v34 = vrot.slane %v2709_v47, 4  ;;  %v5162_v3 = vpack.c.bf16 %v2400_v4, %v2400_v4  ;;  %v5466_v57 = vpop.f32.mrb[8].mxu0  ;;  %v3105_v58 = vld [vmem:[#allocation2 + $0x24] sm:$0xf] }
 0x228   : > { %3093 = vst [vmem:[#allocation2 + $0xc] sm:$0xf] %v3092_v20  ;;  %v3084_v12 = vsel %vm6988_vm0, %v2687_v17, %v3083_v1  ;;  %v2695_v25 = vor.u32 %v2693_v45, %v2692_v23  ;;  %v2697_v2 = vrot.slane %v2692_v23, 4  ;;  %v2297_v33 = vmax.f32 %v2217_v15, %v2257_v9  ;;  %v2039_v36 = vpop.f32.mrb[9].mxu0  ;;  %v3098_v23 = vld [vmem:[#allocation2 + $0x18] sm:$0xf] }
 0x229   : > { %3085 = vst [vmem:[#allocation2] sm:$0xf] %v3084_v12  ;;  %v2713_v21 = vsel %vm6996_vm8, %v2705_v63, %v2712_v44  ;;  %v3096_v46 = vsel %vm6818_vm7, %v2714_v34, %v3095_v55  ;;  %v2733_v43 = vshrl.u32 %v5162_v3, 16  ;;  %v2736_v41 = vshll.u32 %v5162_v3, 16  ;;  %v5467_v40 = vpop.f32.mrb[10].mxu0 }
 0x22a   : > { %3094 = vst.msk [vmem:[#allocation2 + $0x10] sm:$0xf] %vm7993_vm4, %v2713_v21  ;;  %3097 = vst [vmem:[#allocation2 + $0x14] sm:$0x1] %v3096_v46  ;;  %v2696_v51 = vsel %vm6996_vm8, %v2688_v19, %v2695_v25  ;;  %v3089_v50 = vsel %vm6818_vm7, %v2697_v2, %v3088_v52  ;;  %v2398_v48 = vsel %vm7008_vm3, %v2297_v33, 0.0  ;;  %v2220_v15 = vadd.f32 %v5463_v38, %v6913_v39  ;;  %v2042_v0 = vpop.f32.mrb[11].mxu0 }
 0x22b   : > { %3087 = vst.msk [vmem:[#allocation2 + $0x4] sm:$0xf] %vm7993_vm4, %v2696_v51  ;;  %3090 = vst [vmem:[#allocation2 + $0x8] sm:$0x1] %v3089_v50  ;;  %v7027_v54 = vrot.slane %v2733_v43, 7  ;;  %v5160_v53 = vpack.c.bf16 %v2398_v48, %v2398_v48  ;;  %v2218_v45 = vadd.f32 %v6913_v39, %v2026_v30  ;;  %v2223_v60 = vadd.f32 %v5466_v57, %v6913_v39 }
 0x22c   : > { %v2260_v63 = vmul.f32 0.2, %v2220_v15  ;;  %v2221_v1 = vadd.f32 %v6913_v39, %v2039_v36  ;;  %v2224_v47 = vadd.f32 %v5467_v40, %v6913_v39  ;;  %v2222_v9 = vadd.f32 %v6913_v39, %v2042_v0 }
 0x22d   : > { %v2738_v38 = vor.u32 %v2736_v41, %v7027_v54  ;;  %v2739_v17 = vrot.slane %v7027_v54, 4  ;;  %v2716_v19 = vshrl.u32 %v5160_v53, 16  ;;  %v2719_v55 = vshll.u32 %v5160_v53, 16 }
 0x22e   : > { %v2300_v4 = vmax.f32 %v2220_v15, %v2260_v63  ;;  %v2258_v20 = vmul.f32 0.2, %v2218_v45  ;;  %v2263_v30 = vmul.f32 0.2, %v2223_v60  ;;  %v2261_v34 = vmul.f32 0.2, %v2221_v1 }
 0x22f   : > { %v3106_v52 = vsel %vm6988_vm0, %v2738_v38, %v3105_v58  ;;  %v7046_v3 = vrot.slane %v2716_v19, 7  ;;  %v2264_v12 = vmul.f32 0.2, %v2224_v47  ;;  %v2262_v5 = vmul.f32 0.2, %v2222_v9  ;;  %v7056_v25 = vpop.f32.mrb[12].mxu0 }
 0x230   : > { %3107 = vst [vmem:[#allocation2 + $0x24] sm:$0xf] %v3106_v52  ;;  %v2401_v2 = vsel %vm6979_vm11, %v2300_v4, 0.0  ;;  %v2298_v33 = vmax.f32 %v2218_v45, %v2258_v20  ;;  %v2303_v36 = vmax.f32 %v2223_v60, %v2263_v30  ;;  %v2301_v21 = vmax.f32 %v2221_v1, %v2261_v34  ;;  %v7060_v46 = vpop.f32.mrb[13].mxu0  ;;  %v3109_v20 = vld [vmem:[#allocation2 + $0x2c] sm:$0x1] }
 0x231   : > { %v2721_v43 = vor.u32 %v2719_v55, %v7046_v3  ;;  %v2722_v8 = vrot.slane %v7046_v3, 4  ;;  %v5163_v41 = vpack.c.bf16 %v2401_v2, %v2401_v2  ;;  %v2304_v40 = vmax.f32 %v2224_v47, %v2264_v12  ;;  %v7064_v51 = vpop.f32.mrb[14].mxu0 }
 0x232   : > { %v2399_v50 = vsel %vm7008_vm3, %v2298_v33, 0.0  ;;  %v2404_v48 = vsel %vm7040_vm1, %v2303_v36, 0.0  ;;  %v2402_v15 = vsel %vm7052_vm6, %v2301_v21, 0.0  ;;  %v2302_v0 = vmax.f32 %v2222_v9, %v2262_v5  ;;  %v7072_v53 = vpop.f32.mrb[15].mxu0  ;;  %v3102_v21 = vld [vmem:[#allocation2 + $0x20] sm:$0x1] }
 0x233   : > { %v3099_v45 = vsel %vm6988_vm0, %v2721_v43, %v3098_v23  ;;  %v2741_v60 = vshrl.u32 %v5163_v41, 16  ;;  %v2744_v58 = vshll.u32 %v5163_v41, 16  ;;  %v5161_v63 = vpack.c.bf16 %v2399_v50, %v2399_v50 }
 0x234   : > { %3100 = vst [vmem:[#allocation2 + $0x18] sm:$0xf] %v3099_v45  ;;  %v5166_v1 = vpack.c.bf16 %v2404_v48, %v2404_v48  ;;  %v5164_v47 = vpack.c.bf16 %v2402_v15, %v2402_v15  ;;  %v2405_v38 = vsel %vm7040_vm1, %v2304_v40, 0.0  ;;  %v2403_v19 = vsel %vm7052_vm6, %v2302_v0, 0.0 }
 0x235   : > { %v2743_v9 = vrot.slane %v2741_v60, 7  ;;  %v2724_v55 = vshrl.u32 %v5161_v63, 16  ;;  %v2727_v4 = vshll.u32 %v5161_v63, 16  ;;  %v5167_v23 = vpack.c.bf16 %v2405_v38, %v2405_v38  ;;  %v3112_v63 = vld [vmem:[#allocation2 + $0x30] sm:$0xf] }
 0x236   : > { %v2767_v30 = vshrl.u32 %v5166_v1, 16  ;;  %v2770_v34 = vshll.u32 %v5166_v1, 16  ;;  %v2750_v52 = vshrl.u32 %v5164_v47, 16  ;;  %v2753_v3 = vshll.u32 %v5164_v47, 16 }
 0x237   : > { %v2746_v12 = vor.u32 %v2744_v58, %v2743_v9  ;;  %v2748_v5 = vrot.slane %v2743_v9, 4  ;;  %v2726_v2 = vrot.slane %v2724_v55, 7  ;;  %v2775_v33 = vshrl.u32 %v5167_v23, 16  ;;  %v5474_v36 = vpop.f32.mrb[16].mxu0  ;;  %v3119_v58 = vld [vmem:[#allocation2 + $0x3c] sm:$0xf] }
 0x238   : > { %v2769_v43 = vrot.slane %v2767_v30, 7  ;;  %v2752_v41 = vrot.slane %v2750_v52, 7  ;;  %v2778_v40 = vshll.u32 %v5167_v23, 16  ;;  %v5165_v50 = vpack.c.bf16 %v2403_v19, %v2403_v19  ;;  %v2071_v48 = vpop.f32.mrb[17].mxu0 }
 0x239   : > { %v2747_v15 = vsel %vm6996_vm8, %v2739_v17, %v2746_v12  ;;  %v3110_v0 = vsel %vm6818_vm7, %v2748_v5, %v3109_v20  ;;  %v2729_v45 = vor.u32 %v2727_v4, %v2726_v2  ;;  %v2731_v60 = vrot.slane %v2726_v2, 4  ;;  %v5475_v1 = vpop.f32.mrb[18].mxu0 }
 0x23a   : > { %3108 = vst.msk [vmem:[#allocation2 + $0x28] sm:$0xf] %vm7993_vm4, %v2747_v15  ;;  %3111 = vst [vmem:[#allocation2 + $0x2c] sm:$0x1] %v3110_v0  ;;  %v2772_v47 = vor.u32 %v2770_v34, %v2769_v43  ;;  %v2773_v38 = vrot.slane %v2769_v43, 4  ;;  %v2755_v19 = vor.u32 %v2753_v3, %v2752_v41  ;;  %v2756_v9 = vrot.slane %v2752_v41, 4 }
 0x23b   : > { %v2074_v55 = vpop.f32.mrb[19].mxu0  ;;  %v2730_v54 = vsel %vm6996_vm8, %v2722_v8, %v2729_v45  ;;  %v3103_v17 = vsel %vm6818_vm7, %v2731_v60, %v3102_v21  ;;  %v2777_v23 = vrot.slane %v2775_v33, 7  ;;  %v2758_v4 = vshrl.u32 %v5165_v50, 16  ;;  %v3123_v34 = vld [vmem:[#allocation2 + $0x44] sm:$0x1] }
 0x23c   : > { %3101 = vst.msk [vmem:[#allocation2 + $0x1c] sm:$0xf] %vm7993_vm4, %v2730_v54  ;;  %3104 = vst [vmem:[#allocation2 + $0x20] sm:$0x1] %v3103_v17  ;;  %v3120_v20 = vsel %vm6988_vm0, %v2772_v47, %v3119_v58  ;;  %v3113_v30 = vsel %vm6988_vm0, %v2755_v19, %v3112_v63  ;;  %v2761_v52 = vshll.u32 %v5165_v50, 16  ;;  %v2227_v3 = vadd.f32 %v7056_v25, %v6913_v39 }
 0x23d   : > { %3121 = vst [vmem:[#allocation2 + $0x3c] sm:$0xf] %v3120_v20  ;;  %3114 = vst [vmem:[#allocation2 + $0x30] sm:$0xf] %v3113_v30  ;;  %v2780_v8 = vor.u32 %v2778_v40, %v2777_v23  ;;  %v2782_v12 = vrot.slane %v2777_v23, 4  ;;  %v2760_v5 = vrot.slane %v2758_v4, 7  ;;  %v2225_v2 = vadd.f32 %v6913_v39, %v7060_v46 }
 0x23e   : > { %v3116_v33 = vld [vmem:[#allocation2 + $0x38] sm:$0x1]  ;;  %v2267_v21 = vmul.f32 0.2, %v2227_v3  ;;  %v2228_v43 = vadd.f32 %v7064_v51, %v6913_v39  ;;  %v2226_v25 = vadd.f32 %v6913_v39, %v7072_v53  ;;  %v2231_v41 = vadd.f32 %v5474_v36, %v6913_v39 }
 0x23f   : > { %v2781_v50 = vsel %vm6996_vm8, %v2773_v38, %v2780_v8  ;;  %v3124_v40 = vsel %vm6818_vm7, %v2782_v12, %v3123_v34  ;;  %v2763_v15 = vor.u32 %v2761_v52, %v2760_v5  ;;  %v2765_v0 = vrot.slane %v2760_v5, 4  ;;  %v7125_v51 = vpop.f32.mrb[20].mxu0 }
 0x240   : > { %3122 = vst.msk [vmem:[#allocation2 + $0x40] sm:$0xf] %vm7993_vm4, %v2781_v50  ;;  %3125 = vst [vmem:[#allocation2 + $0x44] sm:$0x1] %v3124_v40  ;;  %v2307_v53 = vmax.f32 %v2227_v3, %v2267_v21  ;;  %v2265_v36 = vmul.f32 0.2, %v2225_v2  ;;  %v2229_v38 = vadd.f32 %v6913_v39, %v2071_v48  ;;  %v7157_v34 = vadd.f32 %v5475_v1, %v6913_v39 }
 0x241   : > { %v2268_v45 = vmul.f32 0.2, %v2228_v43  ;;  %v2266_v60 = vmul.f32 0.2, %v2226_v25  ;;  %v2764_v58 = vsel %vm6996_vm8, %v2756_v9, %v2763_v15  ;;  %v3117_v63 = vsel %vm6818_vm7, %v2765_v0, %v3116_v33  ;;  %v7141_v19 = vpop.f32.mrb[21].mxu0 }
 0x242   : > { %v2271_v47 = vmul.f32 0.2, %v2231_v41  ;;  %3115 = vst.msk [vmem:[#allocation2 + $0x34] sm:$0xf] %vm7993_vm4, %v2764_v58  ;;  %3118 = vst [vmem:[#allocation2 + $0x38] sm:$0x1] %v3117_v63  ;;  %v2305_v54 = vmax.f32 %v2225_v2, %v2265_v36  ;;  %v7168_v26 = vadd.f32 %v6913_v39, %v2074_v55 }
 0x243   : > { %v2408_v9 = vsel %vm7121_vm10, %v2307_v53, 0.0  ;;  %v2308_v17 = vmax.f32 %v2228_v43, %v2268_v45  ;;  %v2306_v23 = vmax.f32 %v2226_v25, %v2266_v60  ;;  %v7146_v4 = vpop.f32.mrb[22].mxu0  ;;  %v8032_v48 = vmov 0  ;;  %v3133_v1 = vld [vmem:[#allocation2 + $0x54] sm:$0xf]  ;;  %vm7177_vm4 = vmand %vm8036_vm14, %vm8035_vm13 }
 0x244   : > { %v5170_v31 = vpack.c.bf16 %v2408_v9, %v2408_v9  ;;  %v2311_v20 = vmax.f32 %v2231_v41, %v2271_v47  ;;  %v8033_v48 = vsel %vm7152_vm15, 4294967295, %v8032_v48  ;;  %v2269_v30 = vmul.f32 0.2, %v2229_v38  ;;  %v7159_v52 = vpop.f32.mrb[23].mxu0  ;;  %v3126_v45 = vld [vmem:[#allocation2 + $0x48] sm:$0xf] }
 0x245   : > { %8034 = vst [vmem:[#allocation10_spill] sm:$0xff] %v8033_v48  ;;  %v2406_v3 = vsel %vm7136_vm12, %v2305_v54, 0.0  ;;  %v2409_v8 = vsel %vm7121_vm10, %v2308_v17, 0.0  ;;  %v2407_v12 = vsel %vm7136_vm12, %v2306_v23, 0.0  ;;  %v2272_v50 = vmul.f32 0.2, %v7157_v34 }
 0x246   : > { %v2801_v5 = vshrl.u32 %v5170_v31, 16  ;;  %v2804_v2 = vshll.u32 %v5170_v31, 16  ;;  %v5168_v33 = vpack.c.bf16 %v2406_v3, %v2406_v3  ;;  %v5171_v21 = vpack.c.bf16 %v2409_v8, %v2409_v8  ;;  %v3137_v31 = vld [vmem:[#allocation2 + $0x5c] sm:$0x1] }
 0x247   : > { %v5169_v43 = vpack.c.bf16 %v2407_v12, %v2407_v12  ;;  %v2412_v25 = vsel %vm7152_vm15, %v2311_v20, 0.0  ;;  %v2309_v41 = vmax.f32 %v2229_v38, %v2269_v30  ;;  %v8037_v55 = vmov 0  ;;  %v7181_v36 = vpop.f32.mrb[24].mxu0  ;;  %v3130_v20 = vld [vmem:[#allocation2 + $0x50] sm:$0x1] }
 0x248   : > { %v2803_v40 = vrot.slane %v2801_v5, 7  ;;  %v2784_v15 = vshrl.u32 %v5168_v33, 16  ;;  %v2787_v0 = vshll.u32 %v5168_v33, 16  ;;  %v2809_v53 = vshrl.u32 %v5171_v21, 16  ;;  %v7183_v38 = vpop.f32.mrb[25].mxu0 }
 0x249   : > { %v8038_v55 = vsel %vm7177_vm4, 4294967295, %v8037_v55  ;;  %v2812_v60 = vshll.u32 %v5171_v21, 16  ;;  %v2792_v58 = vshrl.u32 %v5169_v43, 16  ;;  %v2795_v63 = vshll.u32 %v5169_v43, 16  ;;  %v7185_v24 = vpop.f32.mrb[26].mxu0 }
 0x24a   : > { %8039 = vst [vmem:[#allocation11_spill] sm:$0xff] %v8038_v55  ;;  %v5174_v47 = vpack.c.bf16 %v2412_v25, %v2412_v25  ;;  %v2806_v9 = vor.u32 %v2804_v2, %v2803_v40  ;;  %v2807_v54 = vrot.slane %v2803_v40, 4  ;;  %v2786_v17 = vrot.slane %v2784_v15, 7  ;;  %v7189_v5 = vpop.f32.mrb[27].mxu0  ;;  %v3147_v25 = vld [vmem:[#allocation2 + $0x6c] sm:$0xf] }
 0x24b   : > { %v2811_v23 = vrot.slane %v2809_v53, 7  ;;  %v2794_v30 = vrot.slane %v2792_v58, 7  ;;  %v2410_v12 = vsel %vm7177_vm4, %v2309_v41, 0.0  ;;  %v5916_v58 = vld [vmem:[#allocation2 + $0xc] sm:$0xff]   ;;  %vm8040_vm13 = vcmask 257024  }
 0x24c   : > { %v2835_v3 = vshrl.u32 %v5174_v47, 16  ;;  %v2838_v8 = vshll.u32 %v5174_v47, 16  ;;  %v3134_v33 = vsel %vm6988_vm0, %v2806_v9, %v3133_v1  ;;  %v2789_v21 = vor.u32 %v2787_v0, %v2786_v17  ;;  %v5917_v0 = vld [vmem:[#allocation2 + $0x14] ss:$0 sps:$4 sm:$0x11]   ;;  %vm8041_vm14 = vmmov %vm8040_vm13 }
 0x24d   : > { %v2790_v2 = vrot.slane %v2786_v17, 4  ;;  %v2814_v43 = vor.u32 %v2812_v60, %v2811_v23  ;;  %3135 = vst [vmem:[#allocation2 + $0x54] sm:$0xf] %v3134_v33  ;;  %v2816_v40 = vrot.slane %v2811_v23, 4  ;;  %v2797_v15 = vor.u32 %v2795_v63, %v2794_v30  ;;  %v3154_v55 = vld [vmem:[#allocation2 + $0x78] sm:$0xf] }
 0x24e   : > { %v2799_v53 = vrot.slane %v2794_v30, 4  ;;  %v7193_v18 = vrot.slane %v2835_v3, 7  ;;  %v3127_v47 = vsel %vm6988_vm0, %v2789_v21, %v3126_v45  ;;  %v5172_v16 = vpack.c.bf16 %v2410_v12, %v2410_v12 }
 0x24f   : > { %v2815_v41 = vsel %vm6996_vm8, %v2807_v54, %v2814_v43  ;;  %v2312_v1 = vmax.f32 %v7157_v34, %v2272_v50  ;;  %3128 = vst [vmem:[#allocation2 + $0x48] sm:$0xf] %v3127_v47  ;;  %v3138_v60 = vsel %vm6818_vm7, %v2816_v40, %v3137_v31  ;;  %v2798_v63 = vsel %vm6996_vm8, %v2790_v2, %v2797_v15  ;;  %v7212_v23 = vpop.f32.mrb[28].mxu0  ;;  %v3140_v2 = vld [vmem:[#allocation2 + $0x60] sm:$0xf] }
 0x250   : > { %3136 = vst.msk [vmem:[#allocation2 + $0x58] sm:$0xf] %vm8040_vm13, %v2815_v41  ;;  %v3131_v9 = vsel %vm6818_vm7, %v2799_v53, %v3130_v20  ;;  %v2840_v45 = vor.u32 %v2838_v8, %v7193_v18  ;;  %3139 = vst [vmem:[#allocation2 + $0x5c] sm:$0x1] %v3138_v60  ;;  %v2841_v34 = vrot.slane %v7193_v18, 4  ;;  %v2818_v50 = vshrl.u32 %v5172_v16, 16 }
 0x251   : > { %3129 = vst.msk [vmem:[#allocation2 + $0x4c] sm:$0xf] %vm8041_vm14, %v2798_v63  ;;  %3132 = vst [vmem:[#allocation2 + $0x50] sm:$0x1] %v3131_v9  ;;  %v2821_v54 = vshll.u32 %v5172_v16, 16  ;;  %v2413_v17 = vsel %vm7152_vm15, %v2312_v1, 0.0 }
 0x252   : > { %v3148_v31 = vsel %vm6988_vm0, %v2840_v45, %v3147_v25  ;;  %v5175_v30 = vpack.c.bf16 %v2413_v17, %v2413_v17  ;;  %v2270_v20 = vmul.f32 0.2, %v7168_v26  ;;  %v3425_v3 = vshrl.u32 %v5916_v58, 16  ;;  %v7217_v8 = vpop.f32.mrb[29].mxu0  ;;  %v3151_v1 = vld [vmem:[#allocation2 + $0x74] sm:$0x1] }
 0x253   : > { %3149 = vst [vmem:[#allocation2 + $0x6c] sm:$0xf] %v3148_v31  ;;  %v7219_v12 = vrot.slane %v2818_v50, 7  ;;  %v3427_v18 = vshll.u32 %v5916_v58, 16  ;;  %v3432_v33 = vshll.u32 %v5917_v0, 16  ;;  %v3639_v16 = vrot.slane %v5916_v58, 1 }
 0x254   : > { %v7221_v21 = vpop.f32.mrb[30].mxu0  ;;  %v2843_v43 = vshrl.u32 %v5175_v30, 16  ;;  %v2846_v40 = vshll.u32 %v5175_v30, 16  ;;  %v2310_v15 = vmax.f32 %v7168_v26, %v2270_v20  ;;  %v3640_v25 = vrot.slane %v5917_v0, 1  ;;  %v7239_v30 = vld [vmem:[#allocation2 + $0x24] sm:$0xff]  }
 0x255   : > { %v7224_v53 = vpop.f32.mrb[31].mxu0  ;;  %v2823_v47 = vor.u32 %v2821_v54, %v7219_v12  ;;  %v2824_v41 = vrot.slane %v7219_v12, 4  ;;  %v3429_v60 = vrot.slane %v3427_v18, 1  ;;  %v3434_v63 = vrot.slane %v3432_v33, 1 }
 0x256   : > { %v2845_v9 = vrot.slane %v2843_v43, 7  ;;  %v2411_v58 = vsel %vm7177_vm4, %v2310_v15, 0.0  ;;  %vm8042_vm13 = vcmask 1046528   ;;  %v2235_v50 = vadd.f32 %v7125_v51, %v6913_v39  ;;  %v7233_v26 = vld [vmem:[#allocation2 + $0x2c] ss:$0 sps:$4 sm:$0x11]  }
 0x257   : > { %v3641_v45 = vsel %vm8042_vm13, %v3639_v16, %v3640_v25  ;;  %v3141_v0 = vsel %vm6988_vm0, %v2823_v47, %v3140_v2  ;;  %v5173_v54 = vpack.c.bf16 %v2411_v58, %v2411_v58  ;;  %v3430_v17 = vor.u32 %v3429_v60, %v3425_v3  ;;  %v7249_v25 = vpop.f32.mrb[32].mxu0 }
 0x258   : > { %v2233_v31 = vadd.f32 %v6913_v39, %v7141_v19  ;;  %3142 = vst [vmem:[#allocation2 + $0x60] sm:$0xf] %v3141_v0  ;;  %v2848_v20 = vor.u32 %v2846_v40, %v2845_v9  ;;  %v2850_v12 = vrot.slane %v2845_v9, 4  ;;  %v2275_v18 = vmul.f32 0.2, %v2235_v50 }
 0x259   : > { %v2236_v33 = vadd.f32 %v7146_v4, %v6913_v39  ;;  %v2826_v51 = vshrl.u32 %v5173_v54, 16  ;;  %v2829_v16 = vshll.u32 %v5173_v54, 16  ;;  %vm8043_vm14 = vsmask.f32 7424  ;;  %v3144_v9 = vld [vmem:[#allocation2 + $0x68] sm:$0x1] }
 0x25a   : > { %v3435_v43 = vsel %vm8043_vm14, %v3430_v17, %v3434_v63  ;;  %v2273_v15 = vmul.f32 0.2, %v2233_v31  ;;  %v2849_v3 = vsel %vm6996_vm8, %v2841_v34, %v2848_v20  ;;  %v3152_v19 = vsel %vm6818_vm7, %v2850_v12, %v3151_v1  ;;  %v7255_v34 = vpop.f32.mrb[33].mxu0  ;;  %v7261_v54 = vld [vmem:[#allocation2 + $0x18] sm:$0xff]  }
 0x25b   : > { %3606 = vrot.lane.b32.xlu0 %v3435_v43, %s6061_s9  ;;  %v2315_v2 = vmax.f32 %v2235_v50, %v2275_v18  ;;  %v2276_v40 = vmul.f32 0.2, %v2236_v33  ;;  %vm8044_vm13 = vcmask 257024   ;;  %3153 = vst [vmem:[#allocation2 + $0x74] sm:$0x1] %v3152_v19  ;;  %v2828_v4 = vrot.slane %v2826_v51, 7 }
 0x25c   : > { %3150 = vst.msk [vmem:[#allocation2 + $0x70] sm:$0xf] %vm8044_vm13, %v2849_v3  ;;  %v2313_v47 = vmax.f32 %v2233_v31, %v2273_v15  ;;  %v2234_v60 = vadd.f32 %v6913_v39, %v7159_v52  ;;  %v3449_v63 = vshrl.u32 %v7239_v30, 16  ;;  %v3451_v50 = vshll.u32 %v7239_v30, 16  ;;  %v7265_v12 = vpop.f32.mrb[34].mxu0  ;;  %v5956_v18 = vld [vmem:[%s7985_s3 + $0x30] sm:$0xff]   ;;  %vm8045_vm14 = vmmov %vm8044_vm13 }
 0x25d   : > { %v2416_v1 = vsel %vm6931_vm5, %v2315_v2, 0.0  ;;  %v2316_v58 = vmax.f32 %v2236_v33, %v2276_v40  ;;  %v3456_v0 = vshll.u32 %v7233_v26, 16  ;;  %v2831_v17 = vor.u32 %v2829_v16, %v2828_v4  ;;  %v7273_v16 = vpop.f32.mrb[35].mxu0  ;;  %v5957_v3 = vld [vmem:[%s7985_s3 + $0x38] sm:$0xff]   ;;  %5496 = vmatprep.subr.bf16.mxu1 %v5956_v18 }
 0x25e   : > { %v2833_v31 = vrot.slane %v2828_v4, 4  ;;  %v5178_v20 = vpack.c.bf16 %v2416_v1, %v2416_v1  ;;  %v2414_v52 = vsel %vm6938_vm2, %v2313_v47, 0.0  ;;  %v2274_v43 = vmul.f32 0.2, %v2234_v60  ;;  %5497 = vmatpush3.bf16.msra.mxu1 %v5956_v18 }
 0x25f   : > { %3686 = vrot.lane.b32.xlu0 %v3641_v45, %s6060_s8  ;;  %v5176_v33 = vpack.c.bf16 %v2414_v52, %v2414_v52  ;;  %v2417_v51 = vsel %vm6931_vm5, %v2316_v58, 0.0  ;;  %v3453_v15 = vrot.slane %v3451_v50, 1  ;;  %v2832_v19 = vsel %vm6996_vm8, %v2824_v41, %v2831_v17  ;;  %v7283_v50 = vld [vmem:[#allocation2 + $0x20] ss:$0 sps:$4 sm:$0x11]   ;;  %5498 = vmatprep.subr.bf16.mxu1 %v5957_v3 }
 0x260   : > { %v3145_v2 = vsel %vm6818_vm7, %v2833_v31, %v3144_v9  ;;  %v2869_v40 = vshrl.u32 %v5178_v20, 16  ;;  %v2872_v45 = vshll.u32 %v5178_v20, 16  ;;  %3143 = vst.msk [vmem:[#allocation2 + $0x64] sm:$0xf] %vm8045_vm14, %v2832_v19  ;;  %v5179_v1 = vpack.c.bf16 %v2417_v51, %v2417_v51  ;;  %v7286_v31 = vpop.f32.mrb[36].mxu0  ;;  %v5958_v20 = vld [vmem:[%s7985_s3 + $0x40] sm:$0xff]  }
 0x261   : > { %3146 = vst [vmem:[#allocation2 + $0x68] sm:$0x1] %v3145_v2  ;;  %v2852_v4 = vshrl.u32 %v5176_v33, 16  ;;  %v2855_v47 = vshll.u32 %v5176_v33, 16  ;;  %v2314_v58 = vmax.f32 %v2234_v60, %v2274_v43  ;;  %v3454_v41 = vor.u32 %v3453_v15, %v3449_v63  ;;  %v7293_v18 = vpop.f32.mrb[37].mxu0 }
 0x262   : > { %v2871_v52 = vrot.slane %v2869_v40, 7  ;;  %v3458_v17 = vrot.slane %v3456_v0, 1  ;;  %v3437_v9 = vshrl.u32 %v7261_v54, 16  ;;  %v2877_v33 = vshrl.u32 %v5179_v1, 16  ;;  %v7296_v2 = vpop.f32.mrb[38].mxu0  ;;  %5499 = vmatpush3.bf16.msra.mxu1 %v5957_v3 }
 0x263   : > { %v2854_v19 = vrot.slane %v2852_v4, 7  ;;  %v2880_v51 = vshll.u32 %v5179_v1, 16  ;;  %v2415_v60 = vsel %vm6938_vm2, %v2314_v58, 0.0  ;;  %vm8046_vm5 = vsmask.f32 7424  ;;  %8047 = vst [vmem:[#allocation12_spill] sm:$0xff] %v7296_v2  ;;  %5500 = vmatprep.subr.bf16.mxu1 %v5958_v20  ;;  %vm8049_vm2 = vmmov %vm8044_vm13 }
 0x264   : > { %v2874_v43 = vor.u32 %v2872_v45, %v2871_v52  ;;  %v2875_v63 = vrot.slane %v2871_v52, 4  ;;  %v5177_v0 = vpack.c.bf16 %v2415_v60, %v2415_v60  ;;  %v3459_v15 = vsel %vm8046_vm5, %v3454_v41, %v3458_v17  ;;  %v7300_v1 = vpop.f32.mrb[39].mxu0  ;;  %v3165_v45 = vld [vmem:[#allocation2 + $0x8c] sm:$0x1]  ;;  %vm8051_vm14 = vmmov %vm8046_vm5 }
 0x265   : > { %v2857_v40 = vor.u32 %v2855_v47, %v2854_v19  ;;  %v2858_v48 = vrot.slane %v2854_v19, 4  ;;  %v2879_v49 = vrot.slane %v2877_v33, 7  ;;  %3610 = vrot.lane.b32.xlu0 %v3459_v15, %s6061_s9  ;;  %v3439_v4 = vshll.u32 %v7261_v54, 16  ;;  %8048 = vst [vmem:[#allocation13_spill] sm:$0xff] %v7300_v1  ;;  %v5959_v47 = vld [vmem:[%s7985_s3 + $0x48] sm:$0xff]   ;;  %vm8052_vm5 = vmmov %vm8049_vm2 }
 0x266   : > { %v3162_v42 = vsel %vm6988_vm0, %v2874_v43, %v3161_v29  ;;  %v2860_v58 = vshrl.u32 %v5177_v0, 16  ;;  %v2863_v52 = vshll.u32 %v5177_v0, 16  ;;  %v3444_v41 = vshll.u32 %v7283_v50, 16  ;;  %5501 = vmatpush3.bf16.msra.mxu1 %v5958_v20 }
 0x267   : > { %3163 = vst [vmem:[#allocation2 + $0x84] sm:$0xf] %v3162_v42  ;;  %v3155_v17 = vsel %vm6988_vm0, %v2857_v40, %v3154_v55  ;;  %v2882_v19 = vor.u32 %v2880_v51, %v2879_v49  ;;  %v2884_v33 = vrot.slane %v2879_v49, 4  ;;  %v3441_v3 = vrot.slane %v3439_v4, 1  ;;  %v3158_v42 = vld [vmem:[#allocation2 + $0x80] sm:$0x1]  ;;  %5502 = vmatprep.subr.bf16.mxu1 %v5959_v47 }
 0x268   : > { %3156 = vst [vmem:[#allocation2 + $0x78] sm:$0xf] %v3155_v17  ;;  %v2862_v60 = vrot.slane %v2860_v58, 7  ;;  %v3446_v29 = vrot.slane %v3444_v41, 1  ;;  %v3645_v43 = vrot.slane %v7239_v30, 1  ;;  %v3646_v0 = vrot.slane %v7233_v26, 1 }
 0x269   : > { %v2883_v15 = vsel %vm6996_vm8, %v2875_v63, %v2882_v19  ;;  %v3166_v1 = vsel %vm6818_vm7, %v2884_v33, %v3165_v45  ;;  %v3442_v2 = vor.u32 %v3441_v3, %v3437_v9  ;;  %v2239_v55 = vadd.f32 %v7181_v36, %v6913_v39  ;;  %v7318_v49 = vld [vmem:[#allocation2 + $0x3c] sm:$0xff]   ;;  %v7323_v40 = vld [vmem:[#allocation2 + $0x44] ss:$0 sps:$4 sm:$0x11]   ;;  %v5960_v9 = vld [vmem:[%s7985_s3 + $0x50] sm:$0xff]  }
 0x26a   : > { %3164 = vst.msk [vmem:[#allocation2 + $0x88] sm:$0xf] %vm8049_vm2, %v2883_v15  ;;  %3167 = vst [vmem:[#allocation2 + $0x8c] sm:$0x1] %v3166_v1  ;;  %v2865_v30 = vor.u32 %v2863_v52, %v2862_v60  ;;  %v2867_v51 = vrot.slane %v2862_v60, 4  ;;  %vm8050_vm13 = vcmask 1046528   ;;  %5503 = vmatpush3.bf16.msra.mxu1 %v5959_v47  ;;  %v5649_v46 = vadd.f32 %v7293_v18, %v6958_v27 }
 0x26b   : > { %v3647_v26 = vsel %vm8050_vm13, %v3645_v43, %v3646_v0  ;;  %v3642_v63 = vrot.slane %v7261_v54, 1  ;;  %v3447_v39 = vsel %vm8051_vm14, %v3442_v2, %v3446_v29  ;;  %v2279_v36 = vmul.f32 0.2, %v2239_v55  ;;  %v7334_v4 = vld [vmem:[%s7984_s2] ss:$0 sm:$0xff]  ;;  %v7338_v1 = vld [vmem:[#allocation2 + $0x30] sm:$0xff]   ;;  %vm8053_vm2 = vmmov %vm8050_vm13  ;;  %5504 = vmatprep.subr.bf16.mxu1 %v5960_v9 }
 0x26c   : > { %3690 = vrot.lane.b32.xlu0 %v3647_v26, %s6060_s8  ;;  %v3643_v20 = vrot.slane %v7283_v50, 1  ;;  %v2237_v54 = vadd.f32 %v7334_v4, %v7183_v38  ;;  %v2866_v45 = vsel %vm6996_vm8, %v2858_v48, %v2865_v30  ;;  %v3159_v2 = vsel %vm6818_vm7, %v2867_v51, %v3158_v42  ;;  %3608 = vrot.lane.b32.xlu1 %v3447_v39, %s6061_s9  ;;  %v7349_v52 = vld [vmem:[#allocation2 + $0x38] ss:$0 sps:$4 sm:$0x11]   ;;  %vm8054_vm13 = vmmov %vm8051_vm14 }
 0x26d   : > { %v2240_v50 = vadd.f32 %v7334_v4, %v7185_v24  ;;  %v2238_v58 = vadd.f32 %v7334_v4, %v7189_v5  ;;  %3157 = vst.msk [vmem:[#allocation2 + $0x7c] sm:$0xf] %vm8052_vm5, %v2866_v45  ;;  %3160 = vst [vmem:[#allocation2 + $0x80] sm:$0x1] %v3159_v2  ;;  %v2319_v38 = vmax.f32 %v2239_v55, %v2279_v36  ;;  %v3473_v17 = vshrl.u32 %v7318_v49, 16  ;;  %v5961_v19 = vld [vmem:[%s7985_s3 + $0x58] sm:$0xff]  }
 0x26e   : > { %v3644_v41 = vsel %vm8053_vm2, %v3642_v63, %v3643_v20  ;;  %v2277_v48 = vmul.f32 0.2, %v2237_v54  ;;  %v3475_v5 = vshll.u32 %v7318_v49, 16  ;;  %v3480_v3 = vshll.u32 %v7323_v40, 16  ;;  %5505 = vmatpush3.bf16.msra.mxu1 %v5960_v9  ;;  %v3175_v45 = vld [vmem:[#allocation2 + $0x9c] sm:$0xf]  ;;  %vm8057_vm14 = vmmov %vm8052_vm5 }
 0x26f   : > { %v2280_v24 = vmul.f32 0.2, %v2240_v50  ;;  %v2278_v33 = vmul.f32 0.2, %v2238_v58  ;;  %v2420_v60 = vsel %vm6979_vm11, %v2319_v38, 0.0  ;;  %v3461_v43 = vshrl.u32 %v7338_v1, 16  ;;  %5506 = vmatprep.subr.bf16.mxu1 %v5961_v19 }
 0x270   : > { %v2317_v29 = vmax.f32 %v2237_v54, %v2277_v48  ;;  %v3463_v0 = vshll.u32 %v7338_v1, 16  ;;  %v5182_v47 = vpack.c.bf16 %v2420_v60, %v2420_v60  ;;  %3688 = vrot.lane.b32.xlu1 %v3644_v41, %s6060_s8  ;;  %v3477_v55 = vrot.slane %v3475_v5, 1 }
 0x271   : > { %v2320_v15 = vmax.f32 %v2240_v50, %v2280_v24  ;;  %v2318_v42 = vmax.f32 %v2238_v58, %v2278_v33  ;;  %v3482_v51 = vrot.slane %v3480_v3, 1  ;;  %v3468_v63 = vshll.u32 %v7349_v52, 16 }
 0x272   : > { %v2418_v30 = vsel %vm7008_vm3, %v2317_v29, 0.0  ;;  %v3465_v26 = vrot.slane %v3463_v0, 1  ;;  %v2903_v39 = vshrl.u32 %v5182_v47, 16  ;;  %v2906_v36 = vshll.u32 %v5182_v47, 16  ;;  %5507 = vmatpush3.bf16.msra.mxu1 %v5961_v19 }
 0x273   : > { %v5180_v20 = vpack.c.bf16 %v2418_v30, %v2418_v30  ;;  %v2421_v54 = vsel %vm6979_vm11, %v2320_v15, 0.0  ;;  %v2419_v50 = vsel %vm7008_vm3, %v2318_v42, 0.0  ;;  %v3478_v58 = vor.u32 %v3477_v55, %v3473_v17  ;;  %vm8055_vm11 = vmmov %vm8054_vm13  ;;  %5540 = vmatprep.subr.bf16.mxu1 %v7375_v11 }
 0x274   : > { %v5183_v2 = vpack.c.bf16 %v2421_v54, %v2421_v54  ;;  %v3466_v38 = vor.u32 %v3465_v26, %v3461_v43  ;;  %v2905_v41 = vrot.slane %v2903_v39, 7  ;;  %v5181_v33 = vpack.c.bf16 %v2419_v50, %v2419_v50  ;;  %v3168_v43 = vld [vmem:[#allocation2 + $0x90] sm:$0xf]  ;;  %v3179_v26 = vld [vmem:[#allocation2 + $0xa4] sm:$0x1]  ;;  %vm8056_vm3 = vmmov %vm8053_vm2 }
 0x275   : > { %v2886_v48 = vshrl.u32 %v5180_v20, 16  ;;  %v2889_v24 = vshll.u32 %v5180_v20, 16  ;;  %v3483_v3 = vsel %vm8054_vm13, %v3478_v58, %v3482_v51  ;;  %v3470_v60 = vrot.slane %v3468_v63, 1  ;;  %v3172_v20 = vld [vmem:[#allocation2 + $0x98] sm:$0x1]  ;;  %vm8058_vm13 = vmmov %vm8055_vm11 }
 0x276   : > { %v2911_v5 = vshrl.u32 %v5183_v2, 16  ;;  %v2914_v9 = vshll.u32 %v5183_v2, 16  ;;  %v2908_v29 = vor.u32 %v2906_v36, %v2905_v41  ;;  %v2909_v61 = vrot.slane %v2905_v41, 4  ;;  %3614 = vrot.lane.b32.xlu0 %v3483_v3, %s6061_s9  ;;  %v7387_v2 = vld [vmem:[#allocation2 + $0x54] sm:$0xff]  }
 0x277   : > { %v2888_v0 = vrot.slane %v2886_v48, 7  ;;  %v2894_v17 = vshrl.u32 %v5181_v33, 16  ;;  %v2897_v15 = vshll.u32 %v5181_v33, 16  ;;  %v3471_v42 = vsel %vm8055_vm11, %v3466_v38, %v3470_v60  ;;  %v7392_v41 = vld [vmem:[#allocation2 + $0x5c] ss:$0 sps:$4 sm:$0x11]  }
 0x278   : > { %v2913_v47 = vrot.slane %v2911_v5, 7  ;;  %v3651_v55 = vrot.slane %v7318_v49, 1  ;;  %v3176_v19 = vsel %vm6988_vm0, %v2908_v29, %v3175_v45  ;;  %3612 = vrot.lane.b32.xlu1 %v3471_v42, %s6061_s9  ;;  %v3652_v54 = vrot.slane %v7323_v40, 1 }
 0x279   : > { %v2891_v30 = vor.u32 %v2889_v24, %v2888_v0  ;;  %v2892_v51 = vrot.slane %v2888_v0, 4  ;;  %v2896_v63 = vrot.slane %v2894_v17, 7  ;;  %3177 = vst [vmem:[#allocation2 + $0x9c] sm:$0xf] %v3176_v19  ;;  %v5640_v49 = vadd.f32 %v7212_v23, %v6865_v14  ;;  %v7400_v24 = vld [vmem:[#allocation2 + $0x48] sm:$0xff]  }
 0x27a   : > { %v2916_v39 = vor.u32 %v2914_v9, %v2913_v47  ;;  %v2918_v36 = vrot.slane %v2913_v47, 4  ;;  %v3648_v38 = vrot.slane %v7338_v1, 1  ;;  %v3653_v14 = vsel %vm8056_vm3, %v3651_v55, %v3652_v54  ;;  %v7417_v0 = vld [vmem:[#allocation2 + $0x50] ss:$0 sps:$4 sm:$0x11]   ;;  %vm8061_vm3 = vmmov %vm8052_vm5 }
 0x27b   : > { %v3169_v45 = vsel %vm6988_vm0, %v2891_v30, %v3168_v43  ;;  %v2899_v50 = vor.u32 %v2897_v15, %v2896_v63  ;;  %v2901_v58 = vrot.slane %v2896_v63, 4  ;;  %v2243_v23 = vadd.f32 %v7334_v4, %v5640_v49  ;;  %3694 = vrot.lane.b32.xlu0 %v3653_v14, %s6060_s8 }
 0x27c   : > { %3170 = vst [vmem:[#allocation2 + $0x90] sm:$0xf] %v3169_v45  ;;  %v2917_v48 = vsel %vm6996_vm8, %v2909_v61, %v2916_v39  ;;  %v3180_v40 = vsel %vm6818_vm7, %v2918_v36, %v3179_v26  ;;  %v3649_v5 = vrot.slane %v7349_v52, 1  ;;  %v5641_v9 = vadd.f32 %v7217_v8, %v6867_v6 }
 0x27d   : > { %3178 = vst.msk [vmem:[#allocation2 + $0xa0] sm:$0xf] %vm8057_vm14, %v2917_v48  ;;  %3181 = vst [vmem:[#allocation2 + $0xa4] sm:$0x1] %v3180_v40  ;;  %v2900_v1 = vsel %vm6996_vm8, %v2892_v51, %v2899_v50  ;;  %v3173_v33 = vsel %vm6818_vm7, %v2901_v58, %v3172_v20  ;;  %v2283_v3 = vmul.f32 0.2, %v2243_v23  ;;  %v5642_v60 = vadd.f32 %v7221_v21, %v6869_v7 }
 0x27e   : > { %3171 = vst.msk [vmem:[#allocation2 + $0x94] sm:$0xf] %vm8052_vm5, %v2900_v1  ;;  %3174 = vst [vmem:[#allocation2 + $0x98] sm:$0x1] %v3173_v33  ;;  %v5643_v29 = vadd.f32 %v7224_v53, %v6873_v10  ;;  %v3497_v61 = vshrl.u32 %v7387_v2, 16  ;;  %v3650_v17 = vsel %vm8053_vm2, %v3648_v38, %v3649_v5  ;;  %v2241_v52 = vadd.f32 %v7334_v4, %v5641_v9 }
 0x27f   : > { %v3499_v6 = vshll.u32 %v7387_v2, 16  ;;  %v3504_v8 = vshll.u32 %v7392_v41, 16  ;;  %v2323_v43 = vmax.f32 %v2243_v23, %v2283_v3  ;;  %3692 = vrot.lane.b32.xlu1 %v3650_v17, %s6060_s8  ;;  %v2244_v7 = vadd.f32 %v7334_v4, %v5642_v60  ;;  %v3189_v9 = vld [vmem:[#allocation2 + $0xb4] sm:$0xf] }
 0x280   : > { %v2242_v21 = vadd.f32 %v7334_v4, %v5643_v29  ;;  %v3485_v10 = vshrl.u32 %v7400_v24, 16  ;;  %v2281_v53 = vmul.f32 0.2, %v2241_v52  ;;  %v3487_v42 = vshll.u32 %v7400_v24, 16 }
 0x281   : > { %v3501_v47 = vrot.slane %v3499_v6, 1  ;;  %v3506_v15 = vrot.slane %v3504_v8, 1  ;;  %v2424_v55 = vsel %vm7040_vm1, %v2323_v43, 0.0  ;;  %v2284_v19 = vmul.f32 0.2, %v2244_v7 }
 0x282   : > { %v2282_v30 = vmul.f32 0.2, %v2242_v21  ;;  %v3492_v51 = vshll.u32 %v7417_v0, 16  ;;  %v5186_v26 = vpack.c.bf16 %v2424_v55, %v2424_v55  ;;  %v2321_v63 = vmax.f32 %v2241_v52, %v2281_v53 }
 0x283   : > { %v3502_v39 = vor.u32 %v3501_v47, %v3497_v61  ;;  %v3489_v36 = vrot.slane %v3487_v42, 1  ;;  %v2324_v20 = vmax.f32 %v2244_v7, %v2284_v19  ;;  %v5644_v45 = vadd.f32 %v7249_v25, %v6875_v59  ;;  %v3193_v19 = vld [vmem:[#allocation2 + $0xbc] sm:$0x1] }
 0x284   : > { %v2322_v54 = vmax.f32 %v2242_v21, %v2282_v30  ;;  %v3494_v49 = vrot.slane %v3492_v51, 1  ;;  %v2937_v50 = vshrl.u32 %v5186_v26, 16  ;;  %v2940_v58 = vshll.u32 %v5186_v26, 16 }
 0x285   : > { %v2422_v38 = vsel %vm7052_vm6, %v2321_v63, 0.0  ;;  %v3507_v48 = vsel %vm8058_vm13, %v3502_v39, %v3506_v15  ;;  %v2425_v14 = vsel %vm7040_vm1, %v2324_v20, 0.0  ;;  %v3490_v1 = vor.u32 %v3489_v36, %v3485_v10  ;;  %v3182_v10 = vld [vmem:[#allocation2 + $0xa8] sm:$0xf]  ;;  %v3186_v39 = vld [vmem:[#allocation2 + $0xb0] sm:$0x1]  ;;  %vm8059_vm1 = vmmov %vm8053_vm2 }
 0x286   : > { %v5184_v40 = vpack.c.bf16 %v2422_v38, %v2422_v38  ;;  %v2423_v23 = vsel %vm7052_vm6, %v2322_v54, 0.0  ;;  %3618 = vrot.lane.b32.xlu0 %v3507_v48, %s6061_s9  ;;  %v2939_v33 = vrot.slane %v2937_v50, 7  ;;  %v5187_v5 = vpack.c.bf16 %v2425_v14, %v2425_v14  ;;  %v5931_v48 = vld [vmem:[#allocation2 + $0x68] ss:$0 sps:$4 sm:$0x11]   ;;  %vm8060_vm6 = vmmov %vm8052_vm5 }
 0x287   : > { %v5185_v59 = vpack.c.bf16 %v2423_v23, %v2423_v23  ;;  %v2247_v25 = vadd.f32 %v7334_v4, %v5644_v45  ;;  %v3495_v29 = vsel %vm8055_vm11, %v3490_v1, %v3494_v49  ;;  %v3654_v61 = vrot.slane %v7400_v24, 1  ;;  %vm8062_vm14 = vmmov %vm8059_vm1 }
 0x288   : > { %v2920_v3 = vshrl.u32 %v5184_v40, 16  ;;  %v2923_v60 = vshll.u32 %v5184_v40, 16  ;;  %v2942_v44 = vor.u32 %v2940_v58, %v2939_v33  ;;  %v2943_v17 = vrot.slane %v2939_v33, 4  ;;  %3616 = vrot.lane.b32.xlu1 %v3495_v29, %s6061_s9  ;;  %vm8063_vm5 = vmmov %vm8055_vm11 }
 0x289   : > { %v2945_v52 = vshrl.u32 %v5187_v5, 16  ;;  %v2948_v57 = vshll.u32 %v5187_v5, 16  ;;  %v2928_v8 = vshrl.u32 %v5185_v59, 16  ;;  %v2931_v43 = vshll.u32 %v5185_v59, 16  ;;  %vm8064_vm2 = vmmov %vm8059_vm1 }
 0x28a   : > { %v2922_v6 = vrot.slane %v2920_v3, 7  ;;  %v2287_v7 = vmul.f32 0.2, %v2247_v25  ;;  %v3190_v21 = vsel %vm6988_vm0, %v2942_v44, %v3189_v9  ;;  %v3655_v47 = vrot.slane %v7417_v0, 1 }
 0x28b   : > { %v2947_v53 = vrot.slane %v2945_v52, 7  ;;  %v5645_v15 = vadd.f32 %v7255_v34, %v6877_v32  ;;  %3191 = vst [vmem:[#allocation2 + $0xb4] sm:$0xf] %v3190_v21  ;;  %v2930_v30 = vrot.slane %v2928_v8, 7  ;;  %v7457_v34 = vld [vmem:[#allocation2 + $0x60] sm:$0xff]   ;;  %v5646_v23 = vadd.f32 %v7265_v12, %v6879_v37 }
 0x28c   : > { %v2925_v42 = vor.u32 %v2923_v60, %v2922_v6  ;;  %v2926_v55 = vrot.slane %v2922_v6, 4  ;;  %v2327_v51 = vmax.f32 %v2247_v25, %v2287_v7  ;;  %v3656_v36 = vsel %vm8059_vm1, %v3654_v61, %v3655_v47  ;;  %v3203_v61 = vld [vmem:[#allocation2 + $0xcc] sm:$0xf] }
 0x28d   : > { %v2950_v26 = vor.u32 %v2948_v57, %v2947_v53  ;;  %v2952_v63 = vrot.slane %v2947_v53, 4  ;;  %v2245_v20 = vadd.f32 %v7334_v4, %v5645_v15  ;;  %v2933_v0 = vor.u32 %v2931_v43, %v2930_v30  ;;  %3696 = vrot.lane.b32.xlu1 %v3656_v36, %s6060_s8 }
 0x28e   : > { %v3183_v54 = vsel %vm6988_vm0, %v2925_v42, %v3182_v10  ;;  %v2935_v49 = vrot.slane %v2930_v30, 4  ;;  %v2428_v32 = vsel %vm7121_vm10, %v2327_v51, 0.0  ;;  %v5647_v1 = vadd.f32 %v7273_v16, %v6881_v35 }
 0x28f   : > { %3184 = vst [vmem:[#allocation2 + $0xa8] sm:$0xf] %v3183_v54  ;;  %v2951_v45 = vsel %vm6996_vm8, %v2943_v17, %v2950_v26  ;;  %v3194_v50 = vsel %vm6818_vm7, %v2952_v63, %v3193_v19  ;;  %v5190_v58 = vpack.c.bf16 %v2428_v32, %v2428_v32  ;;  %v2285_v38 = vmul.f32 0.2, %v2245_v20  ;;  %v3196_v63 = vld [vmem:[#allocation2 + $0xc0] sm:$0xf] }
 0x290   : > { %3192 = vst.msk [vmem:[#allocation2 + $0xb8] sm:$0xf] %vm8060_vm6, %v2951_v45  ;;  %3195 = vst [vmem:[#allocation2 + $0xbc] sm:$0x1] %v3194_v50  ;;  %v2934_v40 = vsel %vm6996_vm8, %v2926_v55, %v2933_v0  ;;  %v3187_v14 = vsel %vm6818_vm7, %v2935_v49, %v3186_v39  ;;  %v3657_v25 = vrot.slane %v7387_v2, 1  ;;  %v2248_v9 = vadd.f32 %v7334_v4, %v5646_v23 }
 0x291   : > { %3185 = vst.msk [vmem:[#allocation2 + $0xac] sm:$0xf] %vm8061_vm3, %v2934_v40  ;;  %3188 = vst [vmem:[#allocation2 + $0xb0] sm:$0x1] %v3187_v14  ;;  %v2971_v33 = vshrl.u32 %v5190_v58, 16  ;;  %v2974_v5 = vshll.u32 %v5190_v58, 16  ;;  %v2325_v59 = vmax.f32 %v2245_v20, %v2285_v38  ;;  %v2246_v3 = vadd.f32 %v7334_v4, %v5647_v1 }
 0x292   : > { %v3658_v60 = vrot.slane %v7392_v41, 1  ;;  %v3809_v29 = vshrl.u32 %v7457_v34, 16  ;;  %v3811_v12 = vshll.u32 %v7457_v34, 16  ;;  %v3816_v16 = vshll.u32 %v5931_v48, 16  ;;  %v2491_v0 = vld [vmem:[#allocation2 + $0xd8] sm:$0x1] }
 0x293   : > { %v7478_v37 = vrot.slane %v2971_v33, 7  ;;  %v2426_v35 = vsel %vm7136_vm12, %v2325_v59, 0.0  ;;  %v2288_v17 = vmul.f32 0.2, %v2248_v9  ;;  %v2286_v52 = vmul.f32 0.2, %v2246_v3 }
 0x294   : > { %v5188_v44 = vpack.c.bf16 %v2426_v35, %v2426_v35  ;;  %v3659_v57 = vsel %vm8062_vm14, %v3657_v25, %v3658_v60  ;;  %v3813_v8 = vrot.slane %v3811_v12, 1  ;;  %v3818_v43 = vrot.slane %v3816_v16, 1  ;;  %v2553_v38 = vld [vmem:[#allocation2 + $0xe0] sm:$0x1]  ;;  %v3207_v40 = vld [vmem:[#allocation2 + $0xd4] sm:$0x1]  ;;  %vm8085_vm14 = vmmov %vm8064_vm2 }
 0x295   : > { %v2976_v6 = vor.u32 %v2974_v5, %v7478_v37  ;;  %v2977_v41 = vrot.slane %v7478_v37, 4  ;;  %3698 = vrot.lane.b32.xlu1 %v3659_v57, %s6060_s8  ;;  %v2328_v10 = vmax.f32 %v2248_v9, %v2288_v17  ;;  %v2326_v53 = vmax.f32 %v2246_v3, %v2286_v52  ;;  %v3200_v33 = vld [vmem:[#allocation2 + $0xc8] sm:$0x1]  ;;  %v8065_v5 = vld [vmem:[#allocation8_spill] sm:$0xff]  ;;  %v8068_v35 = vld [vmem:[#allocation9_spill] sm:$0xff] }
 0x296   : > { %v2954_v7 = vshrl.u32 %v5188_v44, 16  ;;  %v2957_v21 = vshll.u32 %v5188_v44, 16  ;;  %v3814_v15 = vor.u32 %v3813_v8, %v3809_v29  ;;  %v5648_v42 = vadd.f32 %v7286_v31, %v6919_v28  ;;  %v8066_v59 = vld [vmem:[#allocation12_spill] sm:$0xff]  ;;  %v8069_v12 = vld [vmem:[#allocation13_spill] sm:$0xff]  ;;  %v7554_v9 = vld [vmem:[#allocation2 + $0x90] sm:$0xff]  }
 0x297   : > { %v3204_v47 = vsel %vm6988_vm0, %v2976_v6, %v3203_v61  ;;  %v3836_v55 = vrot.slane %v7457_v34, 1  ;;  %v2429_v30 = vsel %vm7121_vm10, %v2328_v10, 0.0  ;;  %v2427_v51 = vsel %vm7136_vm12, %v2326_v53, 0.0  ;;  %v7516_v44 = vld [vmem:[#allocation2 + $0x8c] ss:$0 sps:$4 sm:$0x11]   ;;  %vm8072_vm10 = vmmov %vm8061_vm3 }
 0x298   : > { %3205 = vst [vmem:[#allocation2 + $0xcc] sm:$0xf] %v3204_v47  ;;  %v2956_v19 = vrot.slane %v2954_v7, 7  ;;  %v3837_v26 = vrot.slane %v5931_v48, 1  ;;  %v5191_v39 = vpack.c.bf16 %v2429_v30, %v2429_v30  ;;  %v5189_v36 = vpack.c.bf16 %v2427_v51, %v2427_v51  ;;  %v7518_v8 = vld [vmem:[#allocation2 + $0x84] sm:$0xff]   ;;  %vm8075_vm12 = vmmov %vm8059_vm1 }
 0x299   : > { %v3819_v20 = vsel %vm8063_vm5, %v3814_v15, %v3818_v43  ;;  %v2251_v54 = vadd.f32 %v7334_v4, %v5648_v42  ;;  %v2249_v23 = vadd.f32 %v7334_v4, %v5649_v46  ;;  %v2492_v1 = vsel %vm6818_vm7, 0, %v2491_v0 }
 0x29a   : > { %v2959_v28 = vor.u32 %v2957_v21, %v2956_v19  ;;  %v2960_v31 = vrot.slane %v2956_v19, 4  ;;  %3832 = vrot.lane.b32.xlu0 %v3819_v20, %s6061_s9  ;;  %v3838_v49 = vsel %vm8064_vm2, %v3836_v55, %v3837_v26  ;;  %v2979_v32 = vshrl.u32 %v5191_v39, 16  ;;  %2493 = vst [vmem:[#allocation2 + $0xd8] sm:$0x1] %v2492_v1 }
 0x29b   : > { %v2982_v45 = vshll.u32 %v5191_v39, 16  ;;  %v2962_v50 = vshrl.u32 %v5189_v36, 16  ;;  %v2965_v58 = vshll.u32 %v5189_v36, 16  ;;  %3842 = vrot.lane.b32.xlu1 %v3838_v49, %s6060_s8  ;;  %v2291_v14 = vmul.f32 0.2, %v2251_v54 }
 0x29c   : > { %v3197_v48 = vsel %vm6988_vm0, %v2959_v28, %v3196_v63  ;;  %v2981_v27 = vrot.slane %v2979_v32, 7  ;;  %v5650_v25 = vadd.f32 %v8066_v59, %v8065_v5  ;;  %v2557_v3 = vsel %vm6827_vm9, 0, %v2556_v13  ;;  %v7541_v28 = vld [vmem:[#allocation2 + $0x9c] sm:$0xff]  }
 0x29d   : > { %3198 = vst [vmem:[#allocation2 + $0xc0] sm:$0xf] %v3197_v48  ;;  %v2964_v18 = vrot.slane %v2962_v50, 7  ;;  %v2331_v60 = vmax.f32 %v2251_v54, %v2291_v14  ;;  %v2289_v29 = vmul.f32 0.2, %v2249_v23  ;;  %v5651_v16 = vadd.f32 %v8069_v12, %v8068_v35 }
 0x29e   : > { %2558 = vst [vmem:[#allocation2 + $0xec] sm:$0x1] %v2557_v3  ;;  %v2554_v61 = vsel %vm6827_vm9, 0, %v2553_v38  ;;  %v2984_v17 = vor.u32 %v2982_v45, %v2981_v27  ;;  %v2986_v52 = vrot.slane %v2981_v27, 4  ;;  %v2252_v10 = vadd.f32 %v7334_v4, %v5650_v25  ;;  %vm8071_vm9 = vmmov %vm8061_vm3  ;;  %v3217_v48 = vld [vmem:[#allocation2 + $0xe4] sm:$0xf] }
 0x29f   : > { %v2967_v57 = vor.u32 %v2965_v58, %v2964_v18  ;;  %v2969_v6 = vrot.slane %v2964_v18, 4  ;;  %2555 = vst [vmem:[#allocation2 + $0xe0] sm:$0x1] %v2554_v61  ;;  %v2432_v7 = vsel %vm7152_vm15, %v2331_v60, 0.0  ;;  %v2329_v21 = vmax.f32 %v2249_v23, %v2289_v29 }
 0x2a0   : > { %v2250_v53 = vadd.f32 %v7334_v4, %v5651_v16  ;;  %v2985_v47 = vsel %vm6996_vm8, %v2977_v41, %v2984_v17  ;;  %v3208_v15 = vsel %vm6818_vm7, %v2986_v52, %v3207_v40  ;;  %v5194_v4 = vpack.c.bf16 %v2432_v7, %v2432_v7  ;;  %v7548_v38 = vld [vmem:[#allocation2 + $0xa4] ss:$0 sps:$4 sm:$0x11]   ;;  %v7550_v27 = vld [vmem:[#allocation2 + $0x98] ss:$0 sps:$4 sm:$0x11]  }
 0x2a1   : > { %v2968_v42 = vsel %vm6996_vm8, %v2960_v31, %v2967_v57  ;;  %v3201_v55 = vsel %vm6818_vm7, %v2969_v6, %v3200_v33  ;;  %3206 = vst.msk [vmem:[#allocation2 + $0xd0] sm:$0xf] %vm8071_vm9, %v2985_v47  ;;  %3209 = vst [vmem:[#allocation2 + $0xd4] sm:$0x1] %v3208_v15  ;;  %v2430_v19 = vsel %vm7177_vm4, %v2329_v21, 0.0  ;;  %v3521_v26 = vshrl.u32 %v7518_v8, 16 }
 0x2a2   : > { %3199 = vst.msk [vmem:[#allocation2 + $0xc4] sm:$0xf] %vm8072_vm10, %v2968_v42  ;;  %3202 = vst [vmem:[#allocation2 + $0xc8] sm:$0x1] %v3201_v55  ;;  %v2292_v41 = vmul.f32 0.2, %v2252_v10  ;;  %v5192_v51 = vpack.c.bf16 %v2430_v19, %v2430_v19 }
 0x2a3   : > { %v2290_v30 = vmul.f32 0.2, %v2250_v53  ;;  %v3523_v63 = vshll.u32 %v7518_v8, 16  ;;  %v3528_v39 = vshll.u32 %v7516_v44, 16  ;;  %v3005_v36 = vshrl.u32 %v5194_v4, 16 }
 0x2a4   : > { %v3008_v20 = vshll.u32 %v5194_v4, 16  ;;  %v2332_v54 = vmax.f32 %v2252_v10, %v2292_v41  ;;  %v2988_v31 = vshrl.u32 %v5192_v51, 16  ;;  %v2991_v49 = vshll.u32 %v5192_v51, 16  ;;  %v3210_v5 = vld [vmem:[#allocation2 + $0xd8] sm:$0xf] }
 0x2a5   : > { %v2330_v0 = vmax.f32 %v2250_v53, %v2290_v30  ;;  %v3525_v46 = vrot.slane %v3523_v63, 1  ;;  %v3530_v13 = vrot.slane %v3528_v39, 1  ;;  %v3007_v32 = vrot.slane %v3005_v36, 7  ;;  %v3221_v57 = vld [vmem:[#allocation2 + $0xec] sm:$0x1]  ;;  %v7568_v4 = vld [vmem:[#allocation2 + $0xb4] sm:$0xff]  }
 0x2a6   : > { %v2433_v45 = vsel %vm7152_vm15, %v2332_v54, 0.0  ;;  %v3663_v58 = vrot.slane %v7518_v8, 1  ;;  %v2990_v40 = vrot.slane %v2988_v31, 7  ;;  %v3664_v59 = vrot.slane %v7516_v44, 1  ;;  %v3214_v56 = vld [vmem:[#allocation2 + $0xe0] sm:$0x1] }
 0x2a7   : > { %v2431_v50 = vsel %vm7177_vm4, %v2330_v0, 0.0  ;;  %v5195_v14 = vpack.c.bf16 %v2433_v45, %v2433_v45  ;;  %v3526_v1 = vor.u32 %v3525_v46, %v3521_v26  ;;  %v3010_v18 = vor.u32 %v3008_v20, %v3007_v32  ;;  %vm8074_vm4 = vmmov %vm8063_vm5  ;;  %v7570_v51 = vld [vmem:[#allocation2 + $0xbc] ss:$0 sps:$4 sm:$0x11]   ;;  %v7577_v20 = vld [vmem:[#allocation2 + $0xa8] sm:$0xff]  }
 0x2a8   : > { %v5193_v23 = vpack.c.bf16 %v2431_v50, %v2431_v50  ;;  %v3011_v33 = vrot.slane %v3007_v32, 4  ;;  %v3545_v25 = vshrl.u32 %v7541_v28, 16  ;;  %v2993_v3 = vor.u32 %v2991_v49, %v2990_v40  ;;  %v5941_v46 = vld [vmem:[#allocation2 + $0xb0] ss:$0 sps:$4 sm:$0x11]   ;;  %vm8078_vm13 = vmmov %vm8074_vm4 }
 0x2a9   : > { %v2994_v60 = vrot.slane %v2990_v40, 4  ;;  %v3013_v29 = vshrl.u32 %v5195_v14, 16  ;;  %v3016_v35 = vshll.u32 %v5195_v14, 16  ;;  %v3218_v12 = vsel %vm6988_vm0, %v3010_v18, %v3217_v48  ;;  %vm8079_vm11 = vmmov %vm8074_vm4  ;;  %v7593_v48 = vld [vmem:[#allocation2 + $0xcc] sm:$0xff]  }
 0x2aa   : > { %v2996_v16 = vshrl.u32 %v5193_v23, 16  ;;  %v2999_v61 = vshll.u32 %v5193_v23, 16  ;;  %v3531_v17 = vsel %vm8074_vm4, %v3526_v1, %v3530_v13  ;;  %3219 = vst [vmem:[#allocation2 + $0xe4] sm:$0xf] %v3218_v12  ;;  %v3211_v52 = vsel %vm6988_vm0, %v2993_v3, %v3210_v5  ;;  %vm8076_vm0 = vmmov %vm8061_vm3  ;;  %v7599_v1 = vld [vmem:[#allocation2 + $0xc0] sm:$0xff]  }
 0x2ab   : > { %v3015_v44 = vrot.slane %v3013_v29, 7  ;;  %3622 = vrot.lane.b32.xlu0 %v3531_v17, %s6061_s9  ;;  %v3665_v6 = vsel %vm8075_vm12, %v3663_v58, %v3664_v59  ;;  %v3547_v43 = vshll.u32 %v7541_v28, 16  ;;  %3212 = vst [vmem:[#allocation2 + $0xd8] sm:$0xf] %v3211_v52  ;;  %v3552_v21 = vshll.u32 %v7548_v38, 16  ;;  %vm8077_vm15 = vmmov %vm8076_vm0 }
 0x2ac   : > { %v2998_v7 = vrot.slane %v2996_v16, 7  ;;  %v3533_v10 = vshrl.u32 %v7554_v9, 16  ;;  %v3535_v53 = vshll.u32 %v7554_v9, 16  ;;  %v3540_v55 = vshll.u32 %v7550_v27, 16  ;;  %vm8084_vm3 = vmmov %vm8064_vm2 }
 0x2ad   : > { %v3018_v47 = vor.u32 %v3016_v35, %v3015_v44  ;;  %v3020_v15 = vrot.slane %v3015_v44, 4  ;;  %v3549_v42 = vrot.slane %v3547_v43, 1  ;;  %v3554_v41 = vrot.slane %v3552_v21, 1  ;;  %v7604_v59 = vld [vmem:[#allocation2 + $0xd4] ss:$0 sps:$4 sm:$0x11]   ;;  %vm8089_vm10 = vmmov %vm8084_vm3 }
 0x2ae   : > { %v3001_v37 = vor.u32 %v2999_v61, %v2998_v7  ;;  %v3003_v19 = vrot.slane %v2998_v7, 4  ;;  %v3537_v30 = vrot.slane %v3535_v53, 1  ;;  %v3542_v36 = vrot.slane %v3540_v55, 1  ;;  %v5945_v35 = vld [vmem:[#allocation2 + $0xc8] ss:$0 sps:$4 sm:$0x11]  }
 0x2af   : > { %v3019_v26 = vsel %vm6996_vm8, %v3011_v33, %v3018_v47  ;;  %v3222_v63 = vsel %vm6818_vm7, %v3020_v15, %v3221_v57  ;;  %3702 = vrot.lane.b32.xlu0 %v3665_v6, %s6060_s8  ;;  %v3550_v39 = vor.u32 %v3549_v42, %v3545_v25  ;;  %v3669_v49 = vrot.slane %v7541_v28, 1  ;;  %v7619_v53 = vld [vmem:[#allocation2] sm:$0xff]  }
 0x2b0   : > { %3220 = vst.msk [vmem:[#allocation2 + $0xe8] sm:$0xf] %vm8076_vm0, %v3019_v26  ;;  %3223 = vst [vmem:[#allocation2 + $0xec] sm:$0x1] %v3222_v63  ;;  %v3002_v54 = vsel %vm6996_vm8, %v2994_v60, %v3001_v37  ;;  %v3215_v0 = vsel %vm6818_vm7, %v3003_v19, %v3214_v56  ;;  %v3538_v31 = vor.u32 %v3537_v30, %v3533_v10  ;;  %v3670_v32 = vrot.slane %v7548_v38, 1 }
 0x2b1   : > { %3213 = vst.msk [vmem:[#allocation2 + $0xdc] sm:$0xf] %vm8077_vm15, %v3002_v54  ;;  %3216 = vst [vmem:[#allocation2 + $0xe0] sm:$0x1] %v3215_v0  ;;  %v3555_v13 = vsel %vm8078_vm13, %v3550_v39, %v3554_v41  ;;  %v3666_v45 = vrot.slane %v7554_v9, 1  ;;  %v3667_v50 = vrot.slane %v7550_v27, 1 }
 0x2b2   : > { %v3543_v22 = vsel %vm8079_vm11, %v3538_v31, %v3542_v36  ;;  %v3571_v62 = vshll.u32 %v7568_v4, 16  ;;  %v3576_v58 = vshll.u32 %v7570_v51, 16  ;;  %v3559_v40 = vshll.u32 %v7577_v20, 16  ;;  %vm8080_vm7 = vmmov %vm8059_vm1  ;;  %v7632_v0 = vld [vmem:[#allocation2 + $0x78] sm:$0xff]  }
 0x2b3   : > { %3626 = vrot.lane.b32.xlu0 %v3555_v13, %s6061_s9  ;;  %3624 = vrot.lane.b32.xlu1 %v3543_v22, %s6061_s9  ;;  %v3569_v38 = vshrl.u32 %v7568_v4, 16  ;;  %v3564_v23 = vshll.u32 %v5941_v46, 16  ;;  %v3671_v27 = vsel %vm8080_vm7, %v3669_v49, %v3670_v32  ;;  %vm8081_vm8 = vmmov %vm8059_vm1  ;;  %v3557_v33 = vshrl.u32 %v7577_v20, 16  ;;  %v5949_v13 = vld [vmem:[#allocation2 + $0x8] ss:$0 sps:$4 sm:$0x11]  }
 0x2b4   : > { %v3573_v14 = vrot.slane %v3571_v62, 1  ;;  %v3668_v18 = vsel %vm8081_vm8, %v3666_v45, %v3667_v50  ;;  %v3561_v5 = vrot.slane %v3559_v40, 1  ;;  %v3578_v3 = vrot.slane %v3576_v58, 1  ;;  %vm8082_vm1 = vmmov %vm8074_vm4  ;;  %v7640_v58 = vld [vmem:[#allocation2 + $0x6c] sm:$0xff]  }
 0x2b5   : > { %v3675_v60 = vrot.slane %v7568_v4, 1  ;;  %v3595_v29 = vshll.u32 %v7593_v48, 16  ;;  %v3566_v16 = vrot.slane %v3564_v23, 1  ;;  %v3676_v61 = vrot.slane %v7570_v51, 1  ;;  %vm8083_vm6 = vmmov %vm8082_vm1 }
 0x2b6   : > { %v3574_v25 = vor.u32 %v3573_v14, %v3569_v38  ;;  %v3562_v12 = vor.u32 %v3561_v5, %v3557_v33  ;;  %v3672_v52 = vrot.slane %v7577_v20, 1  ;;  %v3583_v57 = vshll.u32 %v7599_v1, 16  ;;  %vm8086_vm5 = vmmov %vm8082_vm1  ;;  %v5951_v23 = vld [vmem:[#allocation2 + $0x80] ss:$0 sps:$4 sm:$0x11]  }
 0x2b7   : > { %3706 = vrot.lane.b32.xlu0 %v3671_v27, %s6060_s8  ;;  %3704 = vrot.lane.b32.xlu1 %v3668_v18, %s6060_s8  ;;  %v3597_v44 = vrot.slane %v3595_v29, 1  ;;  %v3673_v7 = vrot.slane %v5941_v46, 1  ;;  %v3593_v21 = vshrl.u32 %v7593_v48, 16  ;;  %v3600_v10 = vshll.u32 %v7604_v59, 16  ;;  %vm8087_vm2 = vmmov %vm8082_vm1 }
 0x2b8   : > { %v3579_v17 = vsel %vm8082_vm1, %v3574_v25, %v3578_v3  ;;  %v7614_v6 = vld [vmem:[#allocation2 + $0xd8] sm:$0xff]   ;;  %v3567_v43 = vsel %vm8083_vm6, %v3562_v12, %v3566_v16  ;;  %v3581_v47 = vshrl.u32 %v7599_v1, 16  ;;  %v3585_v15 = vrot.slane %v3583_v57, 1  ;;  %v7622_v42 = vld [vmem:[#allocation2 + $0xe0] ss:$0 sps:$4 sm:$0x11]   ;;  %vm8088_vm9 = vmmov %vm8082_vm1 }
 0x2b9   : > { %v3588_v56 = vshll.u32 %v5945_v35, 16  ;;  %v3823_v55 = vshll.u32 %v7614_v6, 16  ;;  %v3598_v37 = vor.u32 %v3597_v44, %v3593_v21  ;;  %v3677_v41 = vsel %vm8084_vm3, %v3675_v60, %v3676_v61  ;;  %v7650_v60 = vld [vmem:[#allocation2 + $0xe4] sm:$0xff]   ;;  %v5953_v16 = vld [vmem:[#allocation2 + $0x74] ss:$0 sps:$4 sm:$0x11]   ;;  %vm8090_vm4 = vmmov %vm8084_vm3 }
 0x2ba   : > { %v3586_v19 = vor.u32 %v3585_v15, %v3581_v47  ;;  %v3674_v30 = vsel %vm8085_vm14, %v3672_v52, %v3673_v7  ;;  %v3602_v51 = vrot.slane %v3600_v10, 1  ;;  %v3821_v39 = vshrl.u32 %v7614_v6, 16  ;;  %vm8091_vm12 = vmmov %vm8082_vm1  ;;  %v5955_v47 = vld [vmem:[#allocation2 + $0xec] ss:$0 sps:$4 sm:$0x11]  }
 0x2bb   : > { %3630 = vrot.lane.b32.xlu0 %v3579_v17, %s6061_s9  ;;  %3628 = vrot.lane.b32.xlu1 %v3567_v43, %s6061_s9  ;;  %v3825_v26 = vrot.slane %v3823_v55, 1  ;;  %v3590_v63 = vrot.slane %v3588_v56, 1  ;;  %v3828_v36 = vshll.u32 %v7622_v42, 16  ;;  %v3415_v54 = vshll.u32 %v7619_v53, 16  ;;  %vm8092_vm0 = vmmov %vm8084_vm3 }
 0x2bc   : > { %v3603_v31 = vsel %vm8086_vm5, %v3598_v37, %v3602_v51  ;;  %v3678_v32 = vrot.slane %v7599_v1, 1  ;;  %v3679_v45 = vrot.slane %v5945_v35, 1  ;;  %v3511_v62 = vshll.u32 %v7632_v0, 16  ;;  %vm8093_vm15 = vmmov %vm8082_vm1 }
 0x2bd   : > { %v3591_v49 = vsel %vm8087_vm2, %v3586_v19, %v3590_v63  ;;  %v3826_v46 = vor.u32 %v3825_v26, %v3821_v39  ;;  %v3830_v50 = vrot.slane %v3828_v36, 1  ;;  %v3417_v22 = vrot.slane %v3415_v54, 1  ;;  %vm8094_vm13 = vmmov %vm8092_vm0 }
 0x2be   : > { %v3413_v38 = vshrl.u32 %v7619_v53, 16  ;;  %v3420_v14 = vshll.u32 %v5949_v13, 16  ;;  %v3681_v27 = vrot.slane %v7593_v48, 1  ;;  %v3682_v18 = vrot.slane %v7604_v59, 1  ;;  %vm8095_vm11 = vmmov %vm8082_vm1 }
 0x2bf   : > { %3710 = vrot.lane.b32.xlu0 %v3677_v41, %s6060_s8  ;;  %3708 = vrot.lane.b32.xlu1 %v3674_v30, %s6060_s8  ;;  %v3831_v40 = vsel %vm8088_vm9, %v3826_v46, %v3830_v50  ;;  %v3680_v33 = vsel %vm8089_vm10, %v3678_v32, %v3679_v45  ;;  %v3513_v25 = vrot.slane %v3511_v62, 1  ;;  %v4316_v3 = vshll.u32 %v7640_v58, 16  ;;  %vm8099_vm6 = vmmov %vm8092_vm0 }
 0x2c0   : > { %v3418_v5 = vor.u32 %v3417_v22, %v3413_v38  ;;  %v3422_v29 = vrot.slane %v3420_v14, 1  ;;  %v3509_v35 = vshrl.u32 %v7632_v0, 16  ;;  %v3516_v12 = vshll.u32 %v5951_v23, 16  ;;  %vm8100_vm3 = vmmov %vm8087_vm2 }
 0x2c1   : > { %v3683_v61 = vsel %vm8090_vm4, %v3681_v27, %v3682_v18  ;;  %v3839_v59 = vrot.slane %v7614_v6, 1  ;;  %v3840_v17 = vrot.slane %v7622_v42, 1  ;;  %v4318_v57 = vrot.slane %v4316_v3, 1  ;;  %vm8101_vm14 = vmmov %vm8092_vm0 }
 0x2c2   : > { %v3423_v52 = vsel %vm8091_vm12, %v3418_v5, %v3422_v29  ;;  %v3514_v44 = vor.u32 %v3513_v25, %v3509_v35  ;;  %v4328_v43 = vshll.u32 %v7650_v60, 16  ;;  %v3518_v7 = vrot.slane %v3516_v12, 1  ;;  %vm8102_vm5 = vmmov %vm8092_vm0  ;;  %v5976_v25 = vld [vmem:[#allocation2 + $0x18] sm:$0xff]   ;;  %v5963_v35 = vld [vmem:[%s7985_s3 + $0x8] sm:$0xff]  }
 0x2c3   : > { %3634 = vrot.lane.b32.xlu0 %v3603_v31, %s6061_s9  ;;  %3632 = vrot.lane.b32.xlu1 %v3591_v49, %s6061_s9  ;;  %v4314_v21 = vshrl.u32 %v7640_v58, 16  ;;  %v4321_v10 = vshll.u32 %v5953_v16, 16  ;;  %v3636_v15 = vrot.slane %v7619_v53, 1  ;;  %v3637_v56 = vrot.slane %v5949_v13, 1  ;;  %v5975_v49 = vld [vmem:[#allocation2 + $0xc] sm:$0xff]   ;;  %v5977_v12 = vld [vmem:[#allocation2 + $0x24] sm:$0xff]  }
 0x2c4   : > { %v3841_v42 = vsel %vm8092_vm0, %v3839_v59, %v3840_v17  ;;  %v3519_v55 = vsel %vm8093_vm15, %v3514_v44, %v3518_v7  ;;  %v4330_v19 = vrot.slane %v4328_v43, 1  ;;  %v4326_v51 = vshrl.u32 %v7650_v60, 16  ;;  %v5964_v17 = vld [vmem:[%s7985_s3 + $0x10] sm:$0xff]   ;;  %v5965_v44 = vld [vmem:[%s7985_s3 + $0x18] sm:$0xff]   ;;  %v5966_v43 = vld [vmem:[%s7985_s3 + $0x20] sm:$0xff]  }
 0x2c5   : > { %v4319_v37 = vor.u32 %v4318_v57, %v4314_v21  ;;  %v4323_v30 = vrot.slane %v4321_v10, 1  ;;  %v4333_v26 = vshll.u32 %v5955_v47, 16  ;;  %v3638_v63 = vsel %vm8094_vm13, %v3636_v15, %v3637_v56  ;;  %v5978_v7 = vld [vmem:[#allocation2 + $0x30] sm:$0xff]  }
 0x2c6   : > { %v3660_v39 = vrot.slane %v7632_v0, 1  ;;  %v3661_v36 = vrot.slane %v5951_v23, 1  ;;  %v4331_v31 = vor.u32 %v4330_v19, %v4326_v51  ;;  %vm8096_vm7 = vcmask 261120  }
 0x2c7   : > { %3712 = vrot.lane.b32.xlu1 %v3680_v33, %s6060_s8  ;;  %3834 = vrot.lane.b32.xlu0 %v3831_v40, %s6061_s9  ;;  %v4324_v54 = vsel %vm8095_vm11, %v4319_v37, %v4323_v30  ;;  %vm8097_vm8 = vcmask 523264   ;;  %v4335_v45 = vrot.slane %v4333_v26, 1  ;;  %vm8098_vm1 = vcmask 785408   ;;  %vm8103_vm2 = vmmov %vm8096_vm7  ;;  %v7733_v37 = vld [vmem:[%s7985_s3 + $0x60] sm:$0xff]  }
 0x2c8   : > { %v3662_v50 = vsel %vm8099_vm6, %v3660_v39, %v3661_v36  ;;  %v4341_v22 = vrot.slane %v7640_v58, 1  ;;  %v4342_v62 = vrot.slane %v5953_v16, 1  ;;  %v4344_v14 = vrot.slane %v7650_v60, 1  ;;  %vm8104_vm9 = vmmov %vm8103_vm2 }
 0x2c9   : > { %v4336_v40 = vsel %vm8100_vm3, %v4331_v31, %v4335_v45  ;;  %v4345_v23 = vrot.slane %v5955_v47, 1  ;;  %vm8105_vm10 = vmmov %vm8097_vm8  ;;  %v5979_v47 = vld [vmem:[#allocation2 + $0x3c] sm:$0xff]  }
 0x2ca   : > { %v4343_v38 = vsel %vm8101_vm14, %v4341_v22, %v4342_v62  ;;  %vm8106_vm4 = vmmov %vm8097_vm8 }
 0x2cb   : > { %3714 = vrot.lane.b32.xlu1 %v3683_v61, %s6060_s8  ;;  %3604 = vrot.lane.b32.xlu0 %v3423_v52, %s6061_s9  ;;  %v4346_v18 = vsel %vm8102_vm5, %v4344_v14, %v4345_v23  ;;  %vm8107_vm12 = vmmov %vm8098_vm1 }
 0x2cc   : > { %vm8108_vm0 = vmmov %vm8098_vm1 }
 0x2cd   : > { %v3607_v41 = vpop.permute.xlu0 %3606  ;;  %vm8109_vm15 = vmmov %vm8103_vm2 }
 0x2ce   : > { %v3719_v46 = vsel %vm8096_vm7, %v5975_v49, %v3607_v41  ;;  %vm8110_vm13 = vmmov %vm8103_vm2 }
 0x2cf   : > { %3844 = vrot.lane.b32.xlu1 %v3841_v42, %s6060_s8  ;;  %3620 = vrot.lane.b32.xlu0 %v3519_v55, %s6061_s9  ;;  %vm8111_vm11 = vmmov %vm8106_vm4  ;;  %v5967_v42 = vld [vmem:[%s7985_s3 + $0x28] sm:$0xff]  }
 0x2d0   : > { %vm8112_vm7 = vmmov %vm8106_vm4 }
 0x2d1   : > { %v3687_v13 = vpop.permute.xlu0 %3686  ;;  %vm8115_vm6 = vmmov %vm8103_vm2 }
 0x2d2   : > { %v7676_v32 = vsel %vm8097_vm8, %v3719_v46, %v3687_v13  ;;  %vm8113_vm8 = vmmov %vm8108_vm0 }
 0x2d3   : > { %3684 = vrot.lane.b32.xlu1 %v3638_v63, %s6060_s8  ;;  %4337 = vrot.lane.b32.xlu0 %v4324_v54, %s6061_s9  ;;  %vm8116_vm3 = vmmov %vm8106_vm4 }
 0x2d4   : > { %5508 = vmatprep.mubr.msk.bf16.mxu1 %vm8098_vm1, %v7676_v32  ;;  %vm8114_vm1 = vmmov %vm8108_vm0 }
 0x2d5   : > { %vm8117_vm14 = vmmov %vm8108_vm0 }
 0x2d6   : > { %vm8118_vm5 = vmmov %vm8103_vm2 }
 0x2d7   : > { %3700 = vrot.lane.b32.xlu1 %v3662_v50, %s6060_s8  ;;  %4339 = vrot.lane.b32.xlu0 %v4336_v40, %s6061_s9  ;;  %v3611_v27 = vpop.permute.xlu0 %3610 }
 0x2d8   : > { %v3723_v16 = vsel %vm8104_vm9, %v5977_v12, %v3611_v27  ;;  %vm8120_vm9 = vmmov %vm8108_vm0 }
 0x2db   : > { %4347 = vrot.lane.b32.xlu1 %v4343_v38, %s6060_s8 }
 0x2de   : > { %v3609_v33 = vpop.permute.xlu1 %3608  ;;  %v3691_v5 = vpop.permute.xlu0 %3690 }
 0x2df   : > { %4349 = vrot.lane.b32.xlu1 %v4346_v18, %s6060_s8  ;;  %v3721_v3 = vsel %vm8103_vm2, %v5976_v25, %v3609_v33  ;;  %v7699_v59 = vsel %vm8106_vm4, %v3723_v16, %v3691_v5  ;;  %vm8119_vm2 = vmmov %vm8116_vm3  ;;  %s4828_s8 = sshll.u32 %s6238_s14, 6 }
 0x2e0   : > { %vm8122_vm4 = vmmov %vm8119_vm2  ;;  %s7916_s13 = scalar_lea.vmem [#allocation4], %s4828_s8 }
 0x2e1   : > { %s4741_s15 = sshll.u32 %s7916_s13, 4  ;;  %s7926_s15 = int_to_ptr.vmem [resolvable:$true] %s4741_s15 }
 0x2e2   : > { %v3689_v29 = vpop.permute.xlu1 %3688  ;;  %s5980_s29 = scalar_lea.vmem %s7926_s15, 1024  ;;  %p5987_p3 = scmp.lt.s32.totalorder %s7926_s15, %s5985_s7 }
 0x2e3   : > { %v7696_v61 = vsel %vm8105_vm10, %v3721_v3, %v3689_v29  ;;  %vm8121_vm10 = vmmov %vm8118_vm5  ;;  %p5981_p0 = scmp.ne.s32.totalorder %s7926_s15, %s5980_s29  ;;  %p5988_p4 = scmp.lt.s32.totalorder %s5986_s10, %s5980_s29 }
 0x2e4   : > { %5509 = vmatmul.mubr.msk.bf16.vlgmr.msra.gmra.mrb[12].mxu1 %vm8107_vm12, %v7696_v61  ;;  %vm8123_vm12 = vmmov %vm8108_vm0 }
 0x2e5   : > { %5512 = vmatprep.mubr.msk.bf16.mxu1 %vm8108_vm0, %v7699_v59  ;;  %5541 = vmatpush3.bf16.msra.mxu1 %v7375_v11  ;;  %vm8124_vm0 = vmmov %vm8118_vm5  ;;  %p5982_p1 = pnand %p5981_p0, %p6136_p5  ;;  %p5989_p6 = por %p5988_p4, %p5987_p3 }
 0x2e6   : > { %5542 = vmatprep.subr.bf16.mxu1 %v5963_v35 }
 0x2e7   : > { %p5983_p2 = pneg %p5982_p1 }
 0x2e8   : > { %v3615_v52 = vpop.permute.xlu0 %3614 }
 0x2e9   : > { %5543 = vmatpush3.bf16.msra.mxu1 %v5963_v35  ;;  %v3727_v15 = vsel %vm8110_vm13, %v5979_v47, %v3615_v52  ;;  %vm8126_vm13 = vmmov %vm8114_vm1  ;;  %v5969_v47 = vld [vmem:[%s7985_s3 + $0x68] sm:$0xff]   ;;  %p5990_p7 = pnand %p5989_p6, %p5983_p2 }
 0x2ea   : > { %5544 = vmatprep.subr.bf16.mxu1 %v5964_v17  ;;  %v3613_v57 = vpop.permute.xlu1 %3612 }
 0x2eb   : > { %v3725_v21 = vsel %vm8109_vm15, %v5978_v7, %v3613_v57  ;;  %vm8125_vm15 = vmmov %vm8119_vm2 }
 0x2ed   : > { %5545 = vmatpush3.bf16.msra.mxu1 %v5964_v17  ;;  %v3695_v11 = vpop.permute.xlu0 %3694 }
 0x2ee   : > { %5546 = vmatprep.subr.bf16.mxu1 %v5965_v44  ;;  %v7724_v55 = vsel %vm8112_vm7, %v3727_v15, %v3695_v11  ;;  %vm8128_vm7 = vmmov %vm8124_vm0  ;;  %v6062_v11 = vmov 0   ;;  %v4671_v15 = vld [vmem:[%s7986_s4 + $0x10] sm:$0xff] }
 0x2ef   : > { %5848 = vset.pattern.permute.xlu1 %v6062_v11 }
 0x2f1   : > { %v3693_v10 = vpop.permute.xlu1 %3692  ;;  %5547 = vmatpush3.bf16.msra.mxu1 %v5965_v44 }
 0x2f2   : > { %v7718_v56 = vsel %vm8111_vm11, %v3725_v21, %v3693_v10  ;;  %5548 = vmatprep.subr.bf16.mxu1 %v5966_v43  ;;  %vm8127_vm11 = vmmov %vm8124_vm0  ;;  %v4670_v10 = vld [vmem:[%s7986_s4 + $0x8] sm:$0xff] }
 0x2f3   : > { %5513 = vmatmul.mubr.msk.bf16.gmra.mrb[16].mxu1 %vm8113_vm8, %v7718_v56  ;;  %vm8129_vm8 = vmmov %vm8119_vm2 }
 0x2f4   : > { %5516 = vmatprep.mubr.msk.bf16.mxu1 %vm8114_vm1, %v7724_v55  ;;  %vm8130_vm1 = vmmov %vm8119_vm2 }
 0x2f5   : > { %5549 = vmatpush3.bf16.msra.mxu1 %v5966_v43 }
 0x2f6   : > { %5550 = vmatprep.subr.bf16.mxu1 %v5967_v42 }
 0x2f8   : > { %v3619_v26 = vpop.permute.xlu0 %3618 }
 0x2f9   : > { %5551 = vmatpush3.bf16.msra.mxu1 %v5967_v42  ;;  %v3731_v63 = vsel %vm8118_vm5, %v7387_v2, %v3619_v26  ;;  %vm8134_vm5 = vmmov %vm8124_vm0  ;;  %v4672_v42 = vld [vmem:[%s7986_s4 + $0x18] sm:$0xff] }
 0x2fa   : > { %v3617_v19 = vpop.permute.xlu1 %3616  ;;  %5584 = vmatprep.subr.bf16.mxu1 %v7733_v37 }
 0x2fb   : > { %v3729_v41 = vsel %vm8115_vm6, %v7400_v24, %v3617_v19  ;;  %vm8131_vm6 = vmmov %vm8120_vm9  ;;  %v5973_v19 = vld [vmem:[%s7985_s3 + $0x88] sm:$0xff]  }
 0x2ff   : > { %v3697_v30 = vpop.permute.xlu1 %3696 }
 0x300   : > { %v7739_v51 = vsel %vm8116_vm3, %v3729_v41, %v3697_v30  ;;  %vm8132_vm3 = vmmov %vm8131_vm6 }
 0x301   : > { %5517 = vmatmul.mubr.msk.bf16.gmra.mrb[20].mxu1 %vm8117_vm14, %v7739_v51  ;;  %vm8133_vm14 = vmmov %vm8124_vm0 }
 0x307   : > { %v3699_v39 = vpop.permute.xlu1 %3698 }
 0x308   : > { %v7746_v36 = vsel %vm8119_vm2, %v3731_v63, %v3699_v39  ;;  %vm8135_vm2 = vmmov %vm8130_vm1 }
 0x309   : > { %5520 = vmatprep.mubr.msk.bf16.mxu1 %vm8120_vm9, %v7746_v36  ;;  %vm8136_vm9 = vmmov %vm8130_vm1 }
 0x30c   : > { %v3833_v54 = vpop.permute.xlu0 %3832 }
 0x30d   : > { %v3847_v24 = vsel %vm8121_vm10, %v7457_v34, %v3833_v54  ;;  %v3843_v31 = vpop.permute.xlu1 %3842  ;;  %vm8137_vm10 = vmmov %vm8132_vm3 }
 0x30e   : > { %v7753_v49 = vsel %vm8122_vm4, %v3847_v24, %v3843_v31  ;;  %vm8138_vm4 = vmmov %vm8132_vm3 }
 0x30f   : > { %5521 = vmatmul.mubr.msk.bf16.gmra.mrb[24].mxu1 %vm8123_vm12, %v7753_v49  ;;  %vm8139_vm12 = vmmov %vm8124_vm0 }
 0x31d   : > { %v3623_v46 = vpop.permute.xlu0 %3622 }
 0x31e   : > { %v3735_v2 = vsel %vm8124_vm0, %v7518_v8, %v3623_v46  ;;  %vm8140_vm0 = vmmov %vm8130_vm1 }
 0x321   : > { %v3703_v13 = vpop.permute.xlu0 %3702 }
 0x322   : > { %v7760_v45 = vsel %vm8125_vm15, %v3735_v2, %v3703_v13  ;;  %vm8141_vm15 = vmmov %vm8132_vm3 }
 0x323   : > { %5524 = vmatprep.mubr.msk.bf16.mxu1 %vm8126_vm13, %v7760_v45  ;;  %vm8142_vm13 = vmmov %vm8134_vm5 }
 0x325   : > { %v3627_v50 = vpop.permute.xlu0 %3626  ;;  %v3625_v34 = vpop.permute.xlu1 %3624 }
 0x326   : > { %v3737_v22 = vsel %vm8127_vm11, %v7554_v9, %v3625_v34  ;;  %v3739_v38 = vsel %vm8128_vm7, %v7541_v28, %v3627_v50  ;;  %vm8143_vm11 = vmmov %vm8140_vm0 }
 0x327   : > { %vm8144_vm7 = vmmov %vm8132_vm3 }
 0x329   : > { %v3707_v62 = vpop.permute.xlu0 %3706  ;;  %v3705_v40 = vpop.permute.xlu1 %3704 }
 0x32a   : > { %v7769_v14 = vsel %vm8129_vm8, %v3737_v22, %v3705_v40  ;;  %v7772_v8 = vsel %vm8130_vm1, %v3739_v38, %v3707_v62  ;;  %vm8145_vm8 = vmmov %vm8134_vm5 }
 0x32b   : > { %5525 = vmatmul.mubr.msk.bf16.gmra.mrb[28].mxu1 %vm8131_vm6, %v7769_v14  ;;  %vm8146_vm1 = vmmov %vm8140_vm0 }
 0x32c   : > { %5528 = vmatprep.mubr.msk.bf16.mxu1 %vm8132_vm3, %v7772_v8  ;;  %vm8147_vm6 = vmmov %vm8132_vm3 }
 0x32d   : > { %v3631_v23 = vpop.permute.xlu0 %3630  ;;  %v3629_v27 = vpop.permute.xlu1 %3628  ;;  %vm8148_vm3 = vmmov %vm8134_vm5 }
 0x32e   : > { %v3741_v9 = vsel %vm8133_vm14, %v7577_v20, %v3629_v27  ;;  %v3743_v28 = vsel %vm8134_vm5, %v7568_v4, %v3631_v23  ;;  %vm8149_vm14 = vmmov %vm8140_vm0 }
 0x32f   : > { %vm8150_vm5 = vmmov %vm8138_vm4 }
 0x331   : > { %v3711_v18 = vpop.permute.xlu0 %3710  ;;  %v3709_v33 = vpop.permute.xlu1 %3708 }
 0x332   : > { %v7783_v5 = vsel %vm8135_vm2, %v3741_v9, %v3709_v33  ;;  %v7786_v25 = vsel %vm8136_vm9, %v3743_v28, %v3711_v18  ;;  %vm8151_vm2 = vmmov %vm8138_vm4 }
 0x333   : > { %5529 = vmatmul.mubr.msk.bf16.gmra.mrb[32].mxu1 %vm8137_vm10, %v7783_v5  ;;  %vm8152_vm9 = vmmov %vm8151_vm2 }
 0x334   : > { %5532 = vmatprep.mubr.msk.bf16.mxu1 %vm8138_vm4, %v7786_v25  ;;  %vm8153_vm10 = vmmov %vm8151_vm2 }
 0x335   : > { %v3633_v3 = vpop.permute.xlu1 %3632  ;;  %v3635_v29 = vpop.permute.xlu0 %3634  ;;  %vm8154_vm4 = vmmov %vm8151_vm2 }
 0x336   : > { %v3745_v20 = vsel %vm8139_vm12, %v7599_v1, %v3633_v3  ;;  %v3747_v16 = vsel %vm8142_vm13, %v7593_v48, %v3635_v29  ;;  %v4669_v48 = vld [vmem:[%s7986_s4] sm:$0xff]  ;;  %vm8155_vm12 = vmmov %vm8151_vm2 }
 0x337   : > { %4675 = vperm.xlu1 %5848, %v4669_v48   ;;  %vm8158_vm13 = vmmov %vm8146_vm1 }
 0x339   : > { %v3713_v35 = vpop.permute.xlu1 %3712  ;;  %v3835_v12 = vpop.permute.xlu0 %3834 }
 0x33a   : > { %v7795_v4 = vsel %vm8140_vm0, %v3745_v20, %v3713_v35  ;;  %v3849_v1 = vsel %vm8145_vm8, %v7614_v6, %v3835_v12  ;;  %vm8156_vm0 = vmmov %vm8151_vm2 }
 0x33b   : > { %5533 = vmatmul.mubr.msk.bf16.gmra.mrb[36].mxu1 %vm8141_vm15, %v7795_v4  ;;  %4680 = vperm.xlu1 %5848, %v4670_v10   ;;  %vm8157_vm15 = vmmov %vm8148_vm3 }
 0x33c   : > { %vm8161_vm8 = vmmov %vm8156_vm0 }
 0x33d   : > { %v3715_v17 = vpop.permute.xlu1 %3714  ;;  %v3605_v43 = vpop.permute.xlu0 %3604 }
 0x33e   : > { %v7802_v52 = vsel %vm8143_vm11, %v3747_v16, %v3715_v17  ;;  %v3717_v7 = vsel %vm8148_vm3, %v7619_v53, %v3605_v43  ;;  %v5970_v53 = vld [vmem:[%s7985_s3 + $0x70] sm:$0xff]   ;;  %vm8159_vm11 = vmmov %vm8156_vm0 }
 0x33f   : > { %5536 = vmatprep.mubr.msk.bf16.mxu1 %vm8144_vm7, %v7802_v52  ;;  %4685 = vperm.xlu1 %5848, %v4671_v15   ;;  %vm8160_vm7 = vmmov %vm8156_vm0 }
 0x340   : > { %vm8164_vm3 = vmmov %vm8156_vm0 }
 0x341   : > { %v3845_v44 = vpop.permute.xlu1 %3844  ;;  %v3621_v41 = vpop.permute.xlu0 %3620 }
 0x342   : > { %v7809_v57 = vsel %vm8146_vm1, %v3849_v1, %v3845_v44  ;;  %v3733_v26 = vsel %vm8157_vm15, %v7632_v0, %v3621_v41  ;;  %vm8162_vm1 = vmmov %vm8156_vm0 }
 0x343   : > { %5537 = vmatmul.mubr.msk.bf16.gmra.mrb[40].mxu1 %vm8147_vm6, %v7809_v57  ;;  %4690 = vperm.xlu1 %5848, %v4672_v42   ;;  %vm8163_vm6 = vmmov %vm8156_vm0 }
 0x344   : > { %vm8172_vm15 = vmmov %vm8156_vm0 }
 0x345   : > { %v3685_v21 = vpop.permute.xlu1 %3684  ;;  %v4338_v0 = vpop.permute.xlu0 %4337 }
 0x346   : > { %v3749_v6 = vsel %vm8149_vm14, %v3717_v7, %v3685_v21  ;;  %vm8165_vm14 = vmmov %vm8156_vm0 }
 0x347   : > { %5552 = vmatprep.mubr.msk.bf16.mxu1 %vm8150_vm5, %v3749_v6  ;;  %vm8166_vm5 = vmmov %vm8156_vm0 }
 0x349   : > { %v3701_v30 = vpop.permute.xlu1 %3700 }
 0x34a   : > { %v3765_v63 = vsel %vm8158_vm13, %v3733_v26, %v3701_v30  ;;  %vm8173_vm13 = vmmov %vm8156_vm0 }
 0x34b   : > { %5553 = vmatmul.mubr.msk.bf16.vlgmr.msra.gmra.mrb[12].mxu1 %vm8151_vm2, %v7676_v32  ;;  %v5971_v32 = vld [vmem:[%s7985_s3 + $0x78] sm:$0xff]   ;;  %vm8167_vm2 = vmmov %vm8156_vm0 }
 0x34c   : > { %5585 = vmatpush3.bf16.msra.mxu1 %v7733_v37  ;;  %5556 = vmatprep.mubr.msk.bf16.mxu1 %vm8152_vm9, %v7696_v61  ;;  %v5972_v37 = vld [vmem:[%s7985_s3 + $0x80] sm:$0xff]   ;;  %vm8168_vm9 = vmmov %vm8156_vm0 }
 0x34d   : > { %5586 = vmatprep.subr.bf16.mxu1 %v5969_v47 }
 0x350   : > { %5587 = vmatpush3.bf16.msra.mxu1 %v5969_v47 }
 0x351   : > { %5588 = vmatprep.subr.bf16.mxu1 %v5970_v53 }
 0x353   : > { %5557 = vmatmul.mubr.msk.bf16.gmra.mrb[16].mxu1 %vm8153_vm10, %v7699_v59  ;;  %vm8169_vm10 = vmmov %vm8156_vm0 }
 0x354   : > { %5560 = vmatprep.mubr.msk.bf16.mxu1 %vm8154_vm4, %v7718_v56  ;;  %5589 = vmatpush3.bf16.msra.mxu1 %v5970_v53  ;;  %vm8170_vm4 = vmmov %vm8156_vm0 }
 0x355   : > { %5590 = vmatprep.subr.bf16.mxu1 %v5971_v32 }
 0x358   : > { %5591 = vmatpush3.bf16.msra.mxu1 %v5971_v32 }
 0x359   : > { %5592 = vmatprep.subr.bf16.mxu1 %v5972_v37 }
 0x35b   : > { %5561 = vmatmul.mubr.msk.bf16.gmra.mrb[20].mxu1 %vm8155_vm12, %v7724_v55  ;;  %vm8171_vm12 = vmmov %vm8156_vm0 }
 0x35c   : > { %5564 = vmatprep.mubr.msk.bf16.mxu1 %vm8156_vm0, %v7739_v51  ;;  %5593 = vmatpush3.bf16.msra.mxu1 %v5972_v37 }
 0x35d   : > { %5594 = vmatprep.subr.bf16.mxu1 %v5973_v19 }
 0x360   : > { %5595 = vmatpush3.bf16.msra.mxu1 %v5973_v19 }
 0x363   : > { %5565 = vmatmul.mubr.msk.bf16.gmra.mrb[24].mxu1 %vm8159_vm11, %v7746_v36  ;;  %vm8174_vm11 = vcmask 261120  }
 0x364   : > { %5568 = vmatprep.mubr.msk.bf16.mxu1 %vm8160_vm7, %v3765_v63  ;;  %vm8175_vm7 = vcmask 523264  }
 0x36b   : > { %5569 = vmatmul.mubr.msk.bf16.gmra.mrb[28].mxu1 %vm8161_vm8, %v7760_v45  ;;  %vm8176_vm8 = vmmov %vm8156_vm0 }
 0x36c   : > { %5572 = vmatprep.mubr.msk.bf16.mxu1 %vm8162_vm1, %v7769_v14  ;;  %vm8177_vm1 = vmmov %vm8156_vm0 }
 0x373   : > { %5573 = vmatmul.mubr.msk.bf16.gmra.mrb[32].mxu1 %vm8163_vm6, %v7772_v8  ;;  %vm8178_vm6 = vmmov %vm8156_vm0 }
 0x374   : > { %5576 = vmatprep.mubr.msk.bf16.mxu1 %vm8164_vm3, %v7783_v5  ;;  %vm8179_vm3 = vmmov %vm8156_vm0 }
 0x37b   : > { %5577 = vmatmul.mubr.msk.bf16.gmra.mrb[36].mxu1 %vm8165_vm14, %v7786_v25  ;;  %vm8180_vm14 = vmmov %vm8156_vm0 }
 0x37c   : > { %5580 = vmatprep.mubr.msk.bf16.mxu1 %vm8166_vm5, %v7795_v4  ;;  %vm8181_vm5 = vmmov %vm8156_vm0 }
 0x383   : > { %5581 = vmatmul.mubr.msk.bf16.gmra.mrb[40].mxu1 %vm8167_vm2, %v7802_v52  ;;  %vm8182_vm2 = vmmov %vm8156_vm0 }
 0x384   : > { %5596 = vmatprep.mubr.msk.bf16.mxu1 %vm8168_vm9, %v7696_v61  ;;  %v4348_v61 = vpop.permute.xlu1 %4347  ;;  %vm8183_vm9 = vmmov %vm8156_vm0 }
 0x38b   : > { %5597 = vmatmul.mubr.msk.bf16.vlgmr.msra.gmra.mrb[12].mxu1 %vm8169_vm10, %v7699_v59  ;;  %v4352_v59 = vsel %vm8174_vm11, %v7640_v58, %v4338_v0  ;;  %v4340_v58 = vpop.permute.xlu0 %4339  ;;  %vm8184_vm10 = vmmov %vm8174_vm11 }
 0x38c   : > { %5600 = vmatprep.mubr.msk.bf16.mxu1 %vm8170_vm4, %v7718_v56  ;;  %v4356_v39 = vsel %vm8175_vm7, %v4352_v59, %v4348_v61  ;;  %v4350_v56 = vpop.permute.xlu1 %4349  ;;  %vm8185_vm4 = vmmov %vm8175_vm7 }
 0x393   : > { %5601 = vmatmul.mubr.msk.bf16.gmra.mrb[16].mxu1 %vm8171_vm12, %v7724_v55  ;;  %v4354_v55 = vsel %vm8184_vm10, %v7650_v60, %v4340_v58  ;;  %vm8186_vm12 = vmmov %vm8156_vm0 }
 0x394   : > { %5604 = vmatprep.mubr.msk.bf16.mxu1 %vm8156_vm0, %v7739_v51  ;;  %v4358_v51 = vsel %vm8185_vm4, %v4354_v55, %v4350_v56 }
 0x39b   : > { %5605 = vmatmul.mubr.msk.bf16.gmra.mrb[20].mxu1 %vm8172_vm15, %v7746_v36 }
 0x39c   : > { %5608 = vmatprep.mubr.msk.bf16.mxu1 %vm8173_vm13, %v7753_v49 }
 0x3a3   : > { %5609 = vmatmul.mubr.msk.bf16.gmra.mrb[24].mxu1 %vm8176_vm8, %v4356_v39 }
 0x3a4   : > { %5612 = vmatprep.mubr.msk.bf16.mxu1 %vm8177_vm1, %v7769_v14 }
 0x3ab   : > { %5613 = vmatmul.mubr.msk.bf16.gmra.mrb[28].mxu1 %vm8178_vm6, %v7772_v8 }
 0x3ac   : > { %5616 = vmatprep.mubr.msk.bf16.mxu1 %vm8179_vm3, %v7783_v5 }
 0x3b3   : > { %5617 = vmatmul.mubr.msk.bf16.gmra.mrb[32].mxu1 %vm8180_vm14, %v7786_v25 }
 0x3b4   : > { %5620 = vmatprep.mubr.msk.bf16.mxu1 %vm8181_vm5, %v7795_v4 }
 0x3b6   : > { %v4676_v16 = vpop.permute.xlu1 %4675 }
 0x3ba   : > { %v4681_v17 = vpop.permute.xlu1 %4680 }
 0x3bb   : > { %5621 = vmatmul.mubr.msk.bf16.gmra.mrb[36].mxu1 %vm8182_vm2, %v7802_v52 }
 0x3bc   : > { %5624 = vmatprep.mubr.msk.bf16.mxu1 %vm8183_vm9, %v7809_v57 }
 0x3be   : > { %v4686_v7 = vpop.permute.xlu1 %4685 }
 0x3c2   : > { %v4691_v15 = vpop.permute.xlu1 %4690 }
 0x3c3   : > { %5625 = vmatmul.mubr.msk.bf16.gmra.mrb[40].mxu1 %vm8186_vm12, %v4358_v51 }
 0x45e   : > { %v5598_v36 = vpop.f32.mrb[12].mxu1 }
 0x45f   : > { %v4446_v54 = vpop.f32.mrb[13].mxu1 }
 0x460   : > { %4605 = vxpose.xlu0.b32.start [1/16] (narrow) %v4446_v54, 32  ;;  %v5599_v24 = vpop.f32.mrb[14].mxu1 }
 0x461   : > { %v4449_v31 = vpop.f32.mrb[15].mxu1 }
 0x464   : > { %4606 = vxpose.xlu0.b32.cont [2/16] (narrow) %v4449_v31, 32 }
 0x466   : > { %v5602_v49 = vpop.f32.mrb[16].mxu1 }
 0x467   : > { %v4462_v46 = vpop.f32.mrb[17].mxu1 }
 0x468   : > { %4607 = vxpose.xlu0.b32.cont [3/16] (narrow) %v5598_v36, 32  ;;  %v5603_v2 = vpop.f32.mrb[18].mxu1 }
 0x469   : > { %v4465_v13 = vpop.f32.mrb[19].mxu1 }
 0x46c   : > { %4608 = vxpose.xlu0.b32.cont [4/16] (narrow) %v5599_v24, 32 }
 0x46e   : > { %v5606_v45 = vpop.f32.mrb[20].mxu1 }
 0x46f   : > { %v4478_v50 = vpop.f32.mrb[21].mxu1 }
 0x470   : > { %4609 = vxpose.xlu0.b32.cont [5/16] (narrow) %v4462_v46, 32  ;;  %v5607_v60 = vpop.f32.mrb[22].mxu1 }
 0x471   : > { %v4481_v34 = vpop.f32.mrb[23].mxu1 }
 0x474   : > { %4610 = vxpose.xlu0.b32.cont [6/16] (narrow) %v4465_v13, 32 }
 0x476   : > { %v5610_v22 = vpop.f32.mrb[24].mxu1 }
 0x477   : > { %v4494_v62 = vpop.f32.mrb[25].mxu1 }
 0x478   : > { %4611 = vxpose.xlu0.b32.cont [7/16] (narrow) %v5602_v49, 32  ;;  %v5611_v40 = vpop.f32.mrb[26].mxu1 }
 0x479   : > { %v4497_v38 = vpop.f32.mrb[27].mxu1 }
 0x47c   : > { %4612 = vxpose.xlu0.b32.cont [8/16] (narrow) %v5603_v2, 32 }
 0x47e   : > { %v5614_v14 = vpop.f32.mrb[28].mxu1 }
 0x47f   : > { %v4510_v8 = vpop.f32.mrb[29].mxu1 }
 0x480   : > { %4613 = vxpose.xlu0.b32.cont [9/16] (narrow) %v4478_v50, 32  ;;  %4637 = vxpose.xlu1.b32.start [1/16] (narrow) %v4510_v8, 32  ;;  %v5615_v23 = vpop.f32.mrb[30].mxu1 }
 0x481   : > { %v4513_v27 = vpop.f32.mrb[31].mxu1 }
 0x484   : > { %4614 = vxpose.xlu0.b32.cont [10/16] (narrow) %v4481_v34, 32  ;;  %4638 = vxpose.xlu1.b32.cont [2/16] (narrow) %v4513_v27, 32 }
 0x486   : > { %v5618_v9 = vpop.f32.mrb[32].mxu1 }
 0x487   : > { %v4526_v18 = vpop.f32.mrb[33].mxu1 }
 0x488   : > { %4615 = vxpose.xlu0.b32.cont [11/16] (narrow) %v5606_v45, 32  ;;  %4639 = vxpose.xlu1.b32.cont [3/16] (narrow) %v5614_v14, 32  ;;  %v5619_v33 = vpop.f32.mrb[34].mxu1 }
 0x489   : > { %v4529_v28 = vpop.f32.mrb[35].mxu1 }
 0x48c   : > { %4616 = vxpose.xlu0.b32.cont [12/16] (narrow) %v5607_v60, 32  ;;  %4640 = vxpose.xlu1.b32.cont [4/16] (narrow) %v5615_v23, 32 }
 0x48e   : > { %v5622_v5 = vpop.f32.mrb[36].mxu1 }
 0x48f   : > { %v4542_v25 = vpop.f32.mrb[37].mxu1 }
 0x490   : > { %4617 = vxpose.xlu0.b32.cont [13/16] (narrow) %v4494_v62, 32  ;;  %4641 = vxpose.xlu1.b32.cont [5/16] (narrow) %v4526_v18, 32  ;;  %v5623_v3 = vpop.f32.mrb[38].mxu1 }
 0x491   : > { %v4545_v29 = vpop.f32.mrb[39].mxu1 }
 0x494   : > { %4618 = vxpose.xlu0.b32.cont [14/16] (narrow) %v4497_v38, 32  ;;  %4642 = vxpose.xlu1.b32.cont [6/16] (narrow) %v4529_v28, 32 }
 0x496   : > { %v5626_v20 = vpop.f32.mrb[40].mxu1 }
 0x497   : > { %v4558_v35 = vpop.f32.mrb[41].mxu1 }
 0x498   : > { %4619 = vxpose.xlu0.b32.cont [15/16] (narrow) %v5610_v22, 32  ;;  %4643 = vxpose.xlu1.b32.cont [7/16] (narrow) %v5618_v9, 32  ;;  %v5627_v4 = vpop.f32.mrb[42].mxu1 }
 0x499   : > { %v4561_v12 = vpop.f32.mrb[43].mxu1 }
 0x49c   : > { %4620 = vxpose.xlu0.b32.end [16/16] (narrow) %v5611_v40, 32  ;;  %4644 = vxpose.xlu1.b32.cont [8/16] (narrow) %v5619_v33, 32 }
 0x4a0   : > { %4645 = vxpose.xlu1.b32.cont [9/16] (narrow) %v4542_v25, 32 }
 0x4a4   : > { %4646 = vxpose.xlu1.b32.cont [10/16] (narrow) %v4545_v29, 32 }
 0x4a8   : > { %4647 = vxpose.xlu1.b32.cont [11/16] (narrow) %v5622_v5, 32 }
 0x4ac   : > { %4648 = vxpose.xlu1.b32.cont [12/16] (narrow) %v5623_v3, 32 }
 0x4b0   : > { %4649 = vxpose.xlu1.b32.cont [13/16] (narrow) %v4558_v35, 32 }
 0x4b4   : > { %4650 = vxpose.xlu1.b32.cont [14/16] (narrow) %v4561_v12, 32 }
 0x4b8   : > { %4651 = vxpose.xlu1.b32.cont [15/16] (narrow) %v5626_v20, 32 }
 0x4bc   : > { %4652 = vxpose.xlu1.b32.end [16/16] (narrow) %v5627_v4, 32 }
 0x4c5   : > { %5849 = vset.pattern.permute.xlu0 %v6062_v11 }
 0x4e0   : > { %v4621_v52 = vpop.trf.xlu0 }
 0x4e1   : > { %v4693_v1 = vadd.f32 %v4676_v16, %v4621_v52 }
 0x4e3   : > { %v4701_v44 = vmul.f32 0.2, %v4693_v1 }
 0x4e4   : > { %v4622_v57 = vpop.trf.xlu0 }
 0x4e5   : > { %v4709_v43 = vmax.f32 %v4693_v1, %v4701_v44  ;;  %v4694_v48 = vadd.f32 %v4681_v17, %v4622_v57 }
 0x4e7   : > { %4717 = vst [vmem:[%s7916_s13] sm:$0xff] %v4709_v43  ;;  %v4702_v21 = vmul.f32 0.2, %v4694_v48 }
 0x4e8   : > { %v4623_v6 = vpop.trf.xlu0 }
 0x4e9   : > { %v4710_v11 = vmax.f32 %v4694_v48, %v4702_v21  ;;  %v4695_v10 = vadd.f32 %v4686_v7, %v4623_v6 }
 0x4eb   : > { %4718 = vst [vmem:[%s7916_s13 + $0x8] sm:$0xff] %v4710_v11  ;;  %v4703_v47 = vmul.f32 0.2, %v4695_v10 }
 0x4ec   : > { %v4624_v53 = vpop.trf.xlu0 }
 0x4ed   : > { %v4711_v42 = vmax.f32 %v4695_v10, %v4703_v47  ;;  %v4696_v32 = vadd.f32 %v4691_v15, %v4624_v53 }
 0x4ef   : > { %4719 = vst [vmem:[%s7916_s13 + $0x10] sm:$0xff] %v4711_v42  ;;  %v4704_v37 = vmul.f32 0.2, %v4696_v32 }
 0x4f1   : > { %v4712_v19 = vmax.f32 %v4696_v32, %v4704_v37 }
 0x4f3   : > { %4720 = vst [vmem:[%s7916_s13 + $0x18] sm:$0xff] %v4712_v19 }
 0x500   : > { %v4653_v41 = vpop.trf.xlu1 }
 0x501   : > { %v4697_v30 = vadd.f32 %v4676_v16, %v4653_v41 }
 0x503   : > { %v4705_v26 = vmul.f32 0.2, %v4697_v30 }
 0x504   : > { %v4654_v63 = vpop.trf.xlu1 }
 0x505   : > { %v4713_v0 = vmax.f32 %v4697_v30, %v4705_v26  ;;  %v4698_v61 = vadd.f32 %v4681_v17, %v4654_v63 }
 0x507   : > { %4721 = vst [vmem:[%s7916_s13 + $0x20] sm:$0xff] %v4713_v0  ;;  %v4706_v59 = vmul.f32 0.2, %v4698_v61 }
 0x508   : > { %v4655_v39 = vpop.trf.xlu1 }
 0x509   : > { %v4714_v58 = vmax.f32 %v4698_v61, %v4706_v59  ;;  %v4699_v56 = vadd.f32 %v4686_v7, %v4655_v39 }
 0x50b   : > { %4722 = vst [vmem:[%s7916_s13 + $0x28] sm:$0xff] %v4714_v58  ;;  %v4707_v55 = vmul.f32 0.2, %v4699_v56 }
 0x50c   : > { %v4656_v51 = vpop.trf.xlu1 }
 0x50d   : > { %v4715_v36 = vmax.f32 %v4699_v56, %v4707_v55  ;;  %v4700_v54 = vadd.f32 %v4691_v15, %v4656_v51 }
 0x50f   : > { %4723 = vst [vmem:[%s7916_s13 + $0x30] sm:$0xff] %v4715_v36  ;;  %v4708_v24 = vmul.f32 0.2, %v4700_v54 }
 0x511   : > { %v4716_v31 = vmax.f32 %v4700_v54, %v4708_v24 }
 0x513   : > { %4724 = vst [vmem:[%s7916_s13 + $0x38] sm:$0xff] %v4716_v31 }
 0x514   : > { %5993 = shalt.err (!%p5990_p7)
}
 0x515   : > { %s5994_s11 = scalar_lea.hbm %s7932_s25, 1024  ;;  %s5998_s8 = scalar_lea.hbm %s7987_s5, 2048 }
 0x516   : > { %p5995_p8 = scmp.ne.s32.totalorder %s7932_s25, %s5994_s11  ;;  %p5999_p13 = scmp.lt.u32.totalorder %s7932_s25, %s7987_s5 }
 0x517   : > { %p6000_p0 = scmp.lt.u32.totalorder %s5998_s8, %s5994_s11  ;;  %p6002_p2 = scmp.lt.u32.totalorder %s5994_s11, %s7932_s25 }
 0x518   : > { %p5996_p11 = pnand %p5995_p8, %p6136_p5 }
 0x519   : > { %p6001_p1 = por %p6000_p0, %p5999_p13 }
 0x51a   : > { %p5997_p12 = pneg %p5996_p11 }
 0x51b   : > { %p6003_p3 = por %p6002_p2, %p6001_p1 }
 0x51d   : > { %p6004_p4 = pnand %p6003_p3, %p5997_p12 }
 0x51f   : > { %6007 = shalt.err (!%p6004_p4)
}
 0x520   : > { %s6064_s17 = smov 128   ;;  %s6065_s24 = smov 256  }
 0x521   : > { %s6066_s29 = smov 8  }
 0x522   : > { %5787 = dma.vmem_to_hbm [thread:$0]  (%p6136_p5), %s7926_s15, 1024, %s7932_s25, %s4726_s27, %s6064_s17, %s6065_s24, %s6066_s29  }
 0x523 PF: > { %s4756_s21 = sand.u32 1, %s6038_s18   ;;  %p5790_p6 = pnand %p4825_p10, %p6147_p9 }
 0x524   : > { %s4757_s7 = scalar_lea.sflag [#allocation5], %s4756_s21 }
 0x525   : > { %6033 = dma.done.wait (!%p5790_p6), %s4757_s7, 1024  }
 0x526   : > { %6035 = vsyncadd (!%p5790_p6), %s4757_s7, 4294966272  ;;  %s18_s23 = sadd.s32 1, %s6058_s23   ;;  %s8187_s18 = smov %s6042_s19 }
 0x527   : > { %p15_p7 = scmp.ge.s32.totalorder %s18_s23, 4   ;;  %s8188_s19 = smov %s6046_s20 }
 0x528   : > { %s8189_s20 = smov %s6145_s30  ;;  %s8190_s21 = smov %s6054_s22 }
 0x529   : > { %s8191_s22 = smov %s8193_s26  ;;  %17 = sbr.rel (!%p15_p7) target bundleno = 4 (0x4), region = 125 }
 0x530   :  { %4762 = vsyncpa [#allocation5], 1 }
 0x531   :  { %4764 = vsyncpa [#allocation5 + $0x1], 1 }

</bundles_post_ra>
